<compile_context>
chip_gen: v7x
topology: tpu7x:2x2x1
jax: 0.10.0
libtpu: 0.0.40
codegen_flags: <defaults>
</compile_context>

<pallas_src>
import numpy as np
import jax
import jax.numpy as jnp
from jax.experimental import pallas as pl
from jax.experimental.pallas import tpu as pltpu

TB = 8  # batch rows per grid step; must be a multiple of 8 (f32 sublane tile)


# ------------------------------ fused kernel -------------------------------

def fused_net_kernel(x_ref, w1t_ref, b1_ref, w2t_ref, b2_ref,
                     wf1_ref, bf1_ref, wf2_ref, bf2_ref, wf3_ref, bf3_ref,
                     out_ref, p1_ref):
    f32, bf16 = jnp.float32, jnp.bfloat16

    # ---- conv1 + ReLU: 5 W-Toeplitz matmuls, one per kernel row kh ----
    # x_ref: (28, TB, 32) = (input row h, batch, width padded 28->32).
    # Output rows are (h_out, batch); output lanes encode
    # (w_out % 2) * 256 + (w_out // 2) * 16 + c_out  (512 lanes, lane-dense).
    acc1 = None
    for kh in range(5):
        lhs = x_ref[kh:kh + 24].reshape(24 * TB, 32).astype(bf16)
        d = jnp.dot(lhs, w1t_ref[kh], preferred_element_type=f32)
        acc1 = d if acc1 is None else acc1 + d
    y1 = jnp.maximum(acc1 + b1_ref[...], 0.0)                 # (24*TB, 512)

    # ---- 2x2 max-pool #1 (fused epilogue) ----
    y1 = jnp.maximum(y1[:, 0:256], y1[:, 256:512])            # W-pool (lanes)
    for hp in range(12):                                      # H-pool (rows)
        p1_ref[hp] = jnp.maximum(
            y1[(2 * hp) * TB:(2 * hp + 1) * TB, :],
            y1[(2 * hp + 1) * TB:(2 * hp + 2) * TB, :])       # (TB, 256)

    # ---- conv2 + ReLU ----
    # p1_ref: (12, TB, 256); lanes 0..191 = w'*16 + c_in, 192..255 = zeros.
    acc2 = None
    for kh in range(5):
        lhs = p1_ref[kh:kh + 8].reshape(8 * TB, 256).astype(bf16)
        d = jnp.dot(lhs, w2t_ref[kh], preferred_element_type=f32)
        acc2 = d if acc2 is None else acc2 + d
    y2 = jnp.maximum(acc2 + b2_ref[...], 0.0)                 # (8*TB, 256)

    # ---- 2x2 max-pool #2 fused directly into fc1 (no flatten / transpose) ----
    y2 = jnp.maximum(y2[:, 0:128], y2[:, 128:256])            # (8*TB, 128)
    acc3 = None
    for hp in range(4):
        slab = jnp.maximum(
            y2[(2 * hp) * TB:(2 * hp + 1) * TB, :],
            y2[(2 * hp + 1) * TB:(2 * hp + 2) * TB, :])       # (TB, 128)
        d = jnp.dot(slab.astype(bf16), wf1_ref[hp], preferred_element_type=f32)
        acc3 = d if acc3 is None else acc3 + d
    h = jnp.maximum(acc3 + bf1_ref[...], 0.0)                 # fc1 -> (TB, 128)

    h = jnp.dot(h.astype(bf16), wf2_ref[...], preferred_element_type=f32)
    h = jnp.maximum(h + bf2_ref[...], 0.0)                    # fc2 -> (TB, 128)

    h = jnp.dot(h.astype(bf16), wf3_ref[...], preferred_element_type=f32)
    out_ref[...] = h + bf3_ref[...]                           # fc3 -> (TB, 128)


# -------------------------------- wrapper -----------------------------------

@jax.jit
def net_forward(params, x):
    """x: (N, 1, 28, 28) float32 NCHW -> logits (N, 10) float32."""
    N = x.shape[0]
    Np = ((N + TB - 1) // TB) * TB
    # (N,1,28,28) -> (28, Np, 32): rows ordered (h, batch), width padded to 32.
    xt = jnp.transpose(x[:, 0, :, :], (1, 0, 2)).astype(jnp.float32)
    xt = jnp.pad(xt, ((0, 0), (0, Np - N), (0, 32 - 28)))

    nsteps = Np // TB
    flops = nsteps * (5 * (24 * TB) * 32 * 512 * 2
                      + 5 * (8 * TB) * 256 * 256 * 2
                      + 6 * TB * 128 * 128 * 2)
    w_args = (params["w1t"], params["b1r"], params["w2t"], params["b2r"],
              params["wf1h"], params["bf1r"], params["wf2p"], params["bf2r"],
              params["wf3p"], params["bf3r"])
    bytes_accessed = (Np * 28 * 32 * 4 + Np * 128 * 4
                      + sum(int(np.prod(a.shape)) * a.dtype.itemsize
                            for a in w_args))

    out = pl.pallas_call(
        fused_net_kernel,
        out_shape=jax.ShapeDtypeStruct((Np, 128), jnp.float32),
        grid_spec=pltpu.PrefetchScalarGridSpec(
            num_scalar_prefetch=0,
            grid=(nsteps,),
            in_specs=[
                pl.BlockSpec((28, TB, 32), lambda i: (0, i, 0)),    # x tile
                pl.BlockSpec((5, 32, 512), lambda i: (0, 0, 0)),    # conv1 Toeplitz
                pl.BlockSpec((1, 512), lambda i: (0, 0)),           # b1 (expanded)
                pl.BlockSpec((5, 256, 256), lambda i: (0, 0, 0)),   # conv2 Toeplitz
                pl.BlockSpec((1, 256), lambda i: (0, 0)),           # b2 (expanded)
                pl.BlockSpec((4, 128, 128), lambda i: (0, 0, 0)),   # fc1 (per pooled-h)
                pl.BlockSpec((1, 128), lambda i: (0, 0)),           # bf1
                pl.BlockSpec((128, 128), lambda i: (0, 0)),         # fc2 (padded)
                pl.BlockSpec((1, 128), lambda i: (0, 0)),           # bf2
                pl.BlockSpec((128, 128), lambda i: (0, 0)),         # fc3 (padded)
                pl.BlockSpec((1, 128), lambda i: (0, 0)),           # bf3
            ],
            out_specs=pl.BlockSpec((TB, 128), lambda i: (i, 0)),
            scratch_shapes=[pltpu.VMEM((12, TB, 256), jnp.float32)],
        ),
        compiler_params=pltpu.CompilerParams(
            dimension_semantics=("parallel",),        # shard batch tiles on v7x
            vmem_limit_bytes=32 * 1024 * 1024,        # explicit, fits v7x 64 MiB
        ),
        cost_estimate=pl.CostEstimate(flops=flops, transcendentals=0,
                                      bytes_accessed=bytes_accessed),
    )(xt, *w_args)
    return out[:N, :10]


# ------------------------------- parameters ---------------------------------

def init_params(key):
    """PyTorch-style U(-1/sqrt(fan_in), +) init, returned twice:
       raw    -- torch-layout tensors (for the pure-JAX reference),
       kernel -- fused-kernel layout (W-Toeplitz conv weights, permuted/padded
                 fc weights, lane-expanded biases), matmul weights in bf16.
       Weights are pre-rounded through bf16 so both paths share exact values."""
    ks = jax.random.split(key, 10)

    def u(k, shape, fan_in):
        b = 1.0 / np.sqrt(fan_in)
        return np.asarray(jax.random.uniform(k, shape, jnp.float32, -b, b))

    def rb(a):  # round through bf16 once
        return np.asarray(jnp.asarray(a).astype(jnp.bfloat16).astype(jnp.float32))

    W1 = rb(u(ks[0], (16, 1, 5, 5), 25));    b1 = u(ks[1], (16,), 25)
    W2 = rb(u(ks[2], (32, 16, 5, 5), 400));  b2 = u(ks[3], (32,), 400)
    Wf1 = rb(u(ks[4], (120, 512), 512));     bf1 = u(ks[5], (120,), 512)
    Wf2 = rb(u(ks[6], (84, 120), 120));      bf2 = u(ks[7], (84,), 120)
    Wf3 = rb(u(ks[8], (10, 84), 84));        bf3 = u(ks[9], (10,), 84)

    raw = dict(W1=W1, b1=b1, W2=W2, b2=b2, Wf1=Wf1, bf1=bf1,
               Wf2=Wf2, bf2=bf2, Wf3=Wf3, bf3=bf3)

    # conv1 block-Toeplitz over width: (kh, w_in<=31, 512); output lane =
    # (w_out%2)*256 + (w_out//2)*16 + c_out; lanes 192..255 of each half = 0.
    w1t = np.zeros((5, 32, 512), np.float32)
    b1r = np.zeros((1, 512), np.float32)
    co1 = np.arange(16)
    for wo in range(24):
        col = (wo % 2) * 256 + (wo // 2) * 16 + co1
        b1r[0, col] = b1
        for kh in range(5):
            for kw in range(5):
                w1t[kh, wo + kw, col] = W1[:, 0, kh, kw]

    # conv2: input lane = w'*16 + c_in (0..191, +64 zero lanes); output lane =
    # (w2%2)*128 + (w2//2)*32 + c_out.
    w2t = np.zeros((5, 256, 256), np.float32)
    b2r = np.zeros((1, 256), np.float32)
    co2 = np.arange(32)
    for w2 in range(8):
        col = (w2 % 2) * 128 + (w2 // 2) * 32 + co2
        b2r[0, col] = b2
        for kh in range(5):
            for kw in range(5):
                for ci in range(16):
                    w2t[kh, (w2 + kw) * 16 + ci, col] = W2[:, ci, kh, kw]

    # fc1 split into 4 pooled-h slabs of 128 lanes (= w*32 + c); the PyTorch
    # NCHW flatten order c*16 + h*4 + w is folded into this permutation.
    wf1h = np.zeros((4, 128, 128), np.float32)
    for h in range(4):
        for w in range(4):
            for c in range(32):
                wf1h[h, w * 32 + c, :120] = Wf1[:, c * 16 + h * 4 + w]
    bf1r = np.zeros((1, 128), np.float32); bf1r[0, :120] = bf1

    wf2p = np.zeros((128, 128), np.float32); wf2p[:120, :84] = Wf2.T
    bf2r = np.zeros((1, 128), np.float32);   bf2r[0, :84] = bf2
    wf3p = np.zeros((128, 128), np.float32); wf3p[:84, :10] = Wf3.T
    bf3r = np.zeros((1, 128), np.float32);   bf3r[0, :10] = bf3

    kernel_params = {
        "w1t": jnp.asarray(w1t, jnp.bfloat16), "b1r": jnp.asarray(b1r),
        "w2t": jnp.asarray(w2t, jnp.bfloat16), "b2r": jnp.asarray(b2r),
        "wf1h": jnp.asarray(wf1h, jnp.bfloat16), "bf1r": jnp.asarray(bf1r),
        "wf2p": jnp.asarray(wf2p, jnp.bfloat16), "bf2r": jnp.asarray(bf2r),
        "wf3p": jnp.asarray(wf3p, jnp.bfloat16), "bf3r": jnp.asarray(bf3r),
        # self.v: loss-only parameter in the PyTorch module; unused in forward.
        "v": jnp.array([1.0], jnp.float32),
    }
    return kernel_params, raw


# ------------------------------ reference (f32) ------------------------------

def reference_forward(raw, x):
    """Pure-JAX/XLA reference of the PyTorch Net.forward."""
    dn = ("NCHW", "OIHW", "NCHW")
    y = jax.lax.conv_general_dilated(x, jnp.asarray(raw["W1"]), (1, 1), "VALID",
                                     dimension_numbers=dn)
    y = jax.nn.relu(y + jnp.asarray(raw["b1"])[None, :, None, None])
    n, c, hh, ww = y.shape
    y = y.reshape(n, c, hh // 2, 2, ww // 2, 2).max(axis=(3, 5))
    y = jax.lax.conv_general_dilated(y, jnp.asarray(raw["W2"]), (1, 1), "VALID",
                                     dimension_numbers=dn)
    y = jax.nn.relu(y + jnp.asarray(raw["b2"])[None, :, None, None])
    n, c, hh, ww = y.shape
    y = y.reshape(n, c, hh // 2, 2, ww // 2, 2).max(axis=(3, 5))
    y = y.reshape(n, 32 * 4 * 4)
    y = jax.nn.relu(y @ jnp.asarray(raw["Wf1"]).T + jnp.asarray(raw["bf1"]))
    y = jax.nn.relu(y @ jnp.asarray(raw["Wf2"]).T + jnp.asarray(raw["bf2"]))
    return y @ jnp.asarray(raw["Wf3"]).T + jnp.asarray(raw["bf3"])


# ---------------------------------- main -------------------------------------

if __name__ == "__main__":
    key = jax.random.PRNGKey(0)
    k_params, k_x = jax.random.split(key)

    params, raw = init_params(k_params)
    # batch=2, 1 channel, 28x28 (required so the flatten is 32*4*4)
    x = jax.random.normal(k_x, (2, 1, 28, 28), jnp.float32)

    out = net_forward(params, x)
    out = jax.block_until_ready(out)

    assert out.shape == (2, 10), out.shape
    assert out.dtype == jnp.float32

    ref = reference_forward(raw, x)
    np.testing.assert_allclose(np.asarray(out), np.asarray(ref),
                               rtol=0.0, atol=5e-2)

    print("KERNEL_OK")
</pallas_src>

<mosaic_0001>
module attributes {stable_mosaic.version = 11 : i64} {
  func.func @fused_net_kernel(%arg0: i32, %arg1: memref<28x8x32xf32, #tpu.memory_space<vmem>>, %arg2: memref<5x32x512xbf16, #tpu.memory_space<vmem>>, %arg3: memref<1x512xf32, #tpu.memory_space<vmem>>, %arg4: memref<5x256x256xbf16, #tpu.memory_space<vmem>>, %arg5: memref<1x256xf32, #tpu.memory_space<vmem>>, %arg6: memref<4x128x128xbf16, #tpu.memory_space<vmem>>, %arg7: memref<1x128xf32, #tpu.memory_space<vmem>>, %arg8: memref<128x128xbf16, #tpu.memory_space<vmem>>, %arg9: memref<1x128xf32, #tpu.memory_space<vmem>>, %arg10: memref<128x128xbf16, #tpu.memory_space<vmem>>, %arg11: memref<1x128xf32, #tpu.memory_space<vmem>>, %arg12: memref<8x128xf32, #tpu.memory_space<vmem>>, %arg13: memref<12x8x256xf32, #tpu.memory_space<vmem>>) attributes {dimension_semantics = [#tpu.dimension_semantics<parallel>], iteration_bounds = array<i64: 1>, scalar_prefetch = 0 : i64, scratch_operands = 1 : i64, tpu.core_type = #tpu.core_type<tc>, window_params = [{transform_indices = @transform_0, window_bounds = array<i64: 28, 8, 32>}, {pipeline_mode = #tpu.pipeline_mode<synchronous>, transform_indices = @transform_1, window_bounds = array<i64: 5, 32, 512>}, {pipeline_mode = #tpu.pipeline_mode<synchronous>, transform_indices = @transform_2, window_bounds = array<i64: 1, 512>}, {pipeline_mode = #tpu.pipeline_mode<synchronous>, transform_indices = @transform_3, window_bounds = array<i64: 5, 256, 256>}, {pipeline_mode = #tpu.pipeline_mode<synchronous>, transform_indices = @transform_4, window_bounds = array<i64: 1, 256>}, {pipeline_mode = #tpu.pipeline_mode<synchronous>, transform_indices = @transform_5, window_bounds = array<i64: 4, 128, 128>}, {pipeline_mode = #tpu.pipeline_mode<synchronous>, transform_indices = @transform_6, window_bounds = array<i64: 1, 128>}, {pipeline_mode = #tpu.pipeline_mode<synchronous>, transform_indices = @transform_7, window_bounds = array<i64: 128, 128>}, {pipeline_mode = #tpu.pipeline_mode<synchronous>, transform_indices = @transform_8, window_bounds = array<i64: 1, 128>}, {pipeline_mode = #tpu.pipeline_mode<synchronous>, transform_indices = @transform_9, window_bounds = array<i64: 128, 128>}, {pipeline_mode = #tpu.pipeline_mode<synchronous>, transform_indices = @transform_10, window_bounds = array<i64: 1, 128>}, {transform_indices = @transform_11, window_bounds = array<i64: 8, 128>}]} {
    %c0 = arith.constant 0 : index
    %c0_0 = arith.constant 0 : index
    %c0_1 = arith.constant 0 : index
    %0 = vector.load %arg1[%c0, %c0_0, %c0_1] : memref<28x8x32xf32, #tpu.memory_space<vmem>>, vector<24x8x32xf32>
    %1 = vector.shape_cast %0 : vector<24x8x32xf32> to vector<192x32xf32>
    %2 = arith.truncf %1 : vector<192x32xf32> to vector<192x32xbf16>
    %c0_2 = arith.constant 0 : index
    %c0_3 = arith.constant 0 : index
    %c0_4 = arith.constant 0 : index
    %3 = vector.load %arg2[%c0_2, %c0_3, %c0_4] : memref<5x32x512xbf16, #tpu.memory_space<vmem>>, vector<1x32x512xbf16>
    %4 = vector.shape_cast %3 : vector<1x32x512xbf16> to vector<32x512xbf16>
    %cst = arith.constant dense<0.000000e+00> : vector<192x512xf32>
    %5 = tpu.matmul %2, %4, %cst {dimension_numbers = #tpu.dot_dimension_numbers<[1], [0], [0], [1], [0, 0, 1, 1], [], []>} : vector<192x32xbf16>, vector<32x512xbf16>, vector<192x512xf32> -> vector<192x512xf32>
    %c1 = arith.constant 1 : index
    %c0_5 = arith.constant 0 : index
    %c0_6 = arith.constant 0 : index
    %6 = vector.load %arg1[%c1, %c0_5, %c0_6] : memref<28x8x32xf32, #tpu.memory_space<vmem>>, vector<24x8x32xf32>
    %7 = vector.shape_cast %6 : vector<24x8x32xf32> to vector<192x32xf32>
    %8 = arith.truncf %7 : vector<192x32xf32> to vector<192x32xbf16>
    %c1_7 = arith.constant 1 : index
    %c0_8 = arith.constant 0 : index
    %c0_9 = arith.constant 0 : index
    %9 = vector.load %arg2[%c1_7, %c0_8, %c0_9] : memref<5x32x512xbf16, #tpu.memory_space<vmem>>, vector<1x32x512xbf16>
    %10 = vector.shape_cast %9 : vector<1x32x512xbf16> to vector<32x512xbf16>
    %cst_10 = arith.constant dense<0.000000e+00> : vector<192x512xf32>
    %11 = tpu.matmul %8, %10, %cst_10 {dimension_numbers = #tpu.dot_dimension_numbers<[1], [0], [0], [1], [0, 0, 1, 1], [], []>} : vector<192x32xbf16>, vector<32x512xbf16>, vector<192x512xf32> -> vector<192x512xf32>
    %12 = arith.addf %5, %11 : vector<192x512xf32>
    %c2 = arith.constant 2 : index
    %c0_11 = arith.constant 0 : index
    %c0_12 = arith.constant 0 : index
    %13 = vector.load %arg1[%c2, %c0_11, %c0_12] : memref<28x8x32xf32, #tpu.memory_space<vmem>>, vector<24x8x32xf32>
    %14 = vector.shape_cast %13 : vector<24x8x32xf32> to vector<192x32xf32>
    %15 = arith.truncf %14 : vector<192x32xf32> to vector<192x32xbf16>
    %c2_13 = arith.constant 2 : index
    %c0_14 = arith.constant 0 : index
    %c0_15 = arith.constant 0 : index
    %16 = vector.load %arg2[%c2_13, %c0_14, %c0_15] : memref<5x32x512xbf16, #tpu.memory_space<vmem>>, vector<1x32x512xbf16>
    %17 = vector.shape_cast %16 : vector<1x32x512xbf16> to vector<32x512xbf16>
    %cst_16 = arith.constant dense<0.000000e+00> : vector<192x512xf32>
    %18 = tpu.matmul %15, %17, %cst_16 {dimension_numbers = #tpu.dot_dimension_numbers<[1], [0], [0], [1], [0, 0, 1, 1], [], []>} : vector<192x32xbf16>, vector<32x512xbf16>, vector<192x512xf32> -> vector<192x512xf32>
    %19 = arith.addf %12, %18 : vector<192x512xf32>
    %c3 = arith.constant 3 : index
    %c0_17 = arith.constant 0 : index
    %c0_18 = arith.constant 0 : index
    %20 = vector.load %arg1[%c3, %c0_17, %c0_18] : memref<28x8x32xf32, #tpu.memory_space<vmem>>, vector<24x8x32xf32>
    %21 = vector.shape_cast %20 : vector<24x8x32xf32> to vector<192x32xf32>
    %22 = arith.truncf %21 : vector<192x32xf32> to vector<192x32xbf16>
    %c3_19 = arith.constant 3 : index
    %c0_20 = arith.constant 0 : index
    %c0_21 = arith.constant 0 : index
    %23 = vector.load %arg2[%c3_19, %c0_20, %c0_21] : memref<5x32x512xbf16, #tpu.memory_space<vmem>>, vector<1x32x512xbf16>
    %24 = vector.shape_cast %23 : vector<1x32x512xbf16> to vector<32x512xbf16>
    %cst_22 = arith.constant dense<0.000000e+00> : vector<192x512xf32>
    %25 = tpu.matmul %22, %24, %cst_22 {dimension_numbers = #tpu.dot_dimension_numbers<[1], [0], [0], [1], [0, 0, 1, 1], [], []>} : vector<192x32xbf16>, vector<32x512xbf16>, vector<192x512xf32> -> vector<192x512xf32>
    %26 = arith.addf %19, %25 : vector<192x512xf32>
    %c4 = arith.constant 4 : index
    %c0_23 = arith.constant 0 : index
    %c0_24 = arith.constant 0 : index
    %27 = vector.load %arg1[%c4, %c0_23, %c0_24] : memref<28x8x32xf32, #tpu.memory_space<vmem>>, vector<24x8x32xf32>
    %28 = vector.shape_cast %27 : vector<24x8x32xf32> to vector<192x32xf32>
    %29 = arith.truncf %28 : vector<192x32xf32> to vector<192x32xbf16>
    %c4_25 = arith.constant 4 : index
    %c0_26 = arith.constant 0 : index
    %c0_27 = arith.constant 0 : index
    %30 = vector.load %arg2[%c4_25, %c0_26, %c0_27] : memref<5x32x512xbf16, #tpu.memory_space<vmem>>, vector<1x32x512xbf16>
    %31 = vector.shape_cast %30 : vector<1x32x512xbf16> to vector<32x512xbf16>
    %cst_28 = arith.constant dense<0.000000e+00> : vector<192x512xf32>
    %32 = tpu.matmul %29, %31, %cst_28 {dimension_numbers = #tpu.dot_dimension_numbers<[1], [0], [0], [1], [0, 0, 1, 1], [], []>} : vector<192x32xbf16>, vector<32x512xbf16>, vector<192x512xf32> -> vector<192x512xf32>
    %33 = arith.addf %26, %32 : vector<192x512xf32>
    %c0_29 = arith.constant 0 : index
    %c0_30 = arith.constant 0 : index
    %34 = vector.load %arg3[%c0_29, %c0_30] : memref<1x512xf32, #tpu.memory_space<vmem>>, vector<1x512xf32>
    %35 = vector.broadcast %34 : vector<1x512xf32> to vector<192x512xf32>
    %36 = arith.addf %33, %35 : vector<192x512xf32>
    %cst_31 = arith.constant 0.000000e+00 : f32
    %37 = vector.broadcast %cst_31 : f32 to vector<192x512xf32>
    %38 = arith.maximumf %36, %37 : vector<192x512xf32>
    %39 = vector.extract_strided_slice %38 {offsets = [0, 0], sizes = [192, 256], strides = [1, 1]} : vector<192x512xf32> to vector<192x256xf32>
    %40 = vector.extract_strided_slice %38 {offsets = [0, 256], sizes = [192, 256], strides = [1, 1]} : vector<192x512xf32> to vector<192x256xf32>
    %41 = arith.maximumf %39, %40 : vector<192x256xf32>
    %42 = vector.extract_strided_slice %41 {offsets = [0, 0], sizes = [8, 256], strides = [1, 1]} : vector<192x256xf32> to vector<8x256xf32>
    %43 = vector.extract_strided_slice %41 {offsets = [8, 0], sizes = [8, 256], strides = [1, 1]} : vector<192x256xf32> to vector<8x256xf32>
    %44 = arith.maximumf %42, %43 : vector<8x256xf32>
    %c0_32 = arith.constant 0 : index
    %c0_33 = arith.constant 0 : index
    %c0_34 = arith.constant 0 : index
    %45 = vector.load %arg13[%c0_32, %c0_33, %c0_34] : memref<12x8x256xf32, #tpu.memory_space<vmem>>, vector<1x8x256xf32>
    %46 = vector.shape_cast %45 : vector<1x8x256xf32> to vector<8x256xf32>
    %47 = vector.shape_cast %44 : vector<8x256xf32> to vector<1x8x256xf32>
    tpu.vector_store %arg13[%c0_32, %c0_33, %c0_34], %47 {strides = array<i32>} : memref<12x8x256xf32, #tpu.memory_space<vmem>>, vector<1x8x256xf32>,
    %48 = vector.extract_strided_slice %41 {offsets = [16, 0], sizes = [8, 256], strides = [1, 1]} : vector<192x256xf32> to vector<8x256xf32>
    %49 = vector.extract_strided_slice %41 {offsets = [24, 0], sizes = [8, 256], strides = [1, 1]} : vector<192x256xf32> to vector<8x256xf32>
    %50 = arith.maximumf %48, %49 : vector<8x256xf32>
    %c1_35 = arith.constant 1 : index
    %c0_36 = arith.constant 0 : index
    %c0_37 = arith.constant 0 : index
    %51 = vector.load %arg13[%c1_35, %c0_36, %c0_37] : memref<12x8x256xf32, #tpu.memory_space<vmem>>, vector<1x8x256xf32>
    %52 = vector.shape_cast %51 : vector<1x8x256xf32> to vector<8x256xf32>
    %53 = vector.shape_cast %50 : vector<8x256xf32> to vector<1x8x256xf32>
    tpu.vector_store %arg13[%c1_35, %c0_36, %c0_37], %53 {strides = array<i32>} : memref<12x8x256xf32, #tpu.memory_space<vmem>>, vector<1x8x256xf32>,
    %54 = vector.extract_strided_slice %41 {offsets = [32, 0], sizes = [8, 256], strides = [1, 1]} : vector<192x256xf32> to vector<8x256xf32>
    %55 = vector.extract_strided_slice %41 {offsets = [40, 0], sizes = [8, 256], strides = [1, 1]} : vector<192x256xf32> to vector<8x256xf32>
    %56 = arith.maximumf %54, %55 : vector<8x256xf32>
    %c2_38 = arith.constant 2 : index
    %c0_39 = arith.constant 0 : index
    %c0_40 = arith.constant 0 : index
    %57 = vector.load %arg13[%c2_38, %c0_39, %c0_40] : memref<12x8x256xf32, #tpu.memory_space<vmem>>, vector<1x8x256xf32>
    %58 = vector.shape_cast %57 : vector<1x8x256xf32> to vector<8x256xf32>
    %59 = vector.shape_cast %56 : vector<8x256xf32> to vector<1x8x256xf32>
    tpu.vector_store %arg13[%c2_38, %c0_39, %c0_40], %59 {strides = array<i32>} : memref<12x8x256xf32, #tpu.memory_space<vmem>>, vector<1x8x256xf32>,
    %60 = vector.extract_strided_slice %41 {offsets = [48, 0], sizes = [8, 256], strides = [1, 1]} : vector<192x256xf32> to vector<8x256xf32>
    %61 = vector.extract_strided_slice %41 {offsets = [56, 0], sizes = [8, 256], strides = [1, 1]} : vector<192x256xf32> to vector<8x256xf32>
    %62 = arith.maximumf %60, %61 : vector<8x256xf32>
    %c3_41 = arith.constant 3 : index
    %c0_42 = arith.constant 0 : index
    %c0_43 = arith.constant 0 : index
    %63 = vector.load %arg13[%c3_41, %c0_42, %c0_43] : memref<12x8x256xf32, #tpu.memory_space<vmem>>, vector<1x8x256xf32>
    %64 = vector.shape_cast %63 : vector<1x8x256xf32> to vector<8x256xf32>
    %65 = vector.shape_cast %62 : vector<8x256xf32> to vector<1x8x256xf32>
    tpu.vector_store %arg13[%c3_41, %c0_42, %c0_43], %65 {strides = array<i32>} : memref<12x8x256xf32, #tpu.memory_space<vmem>>, vector<1x8x256xf32>,
    %66 = vector.extract_strided_slice %41 {offsets = [64, 0], sizes = [8, 256], strides = [1, 1]} : vector<192x256xf32> to vector<8x256xf32>
    %67 = vector.extract_strided_slice %41 {offsets = [72, 0], sizes = [8, 256], strides = [1, 1]} : vector<192x256xf32> to vector<8x256xf32>
    %68 = arith.maximumf %66, %67 : vector<8x256xf32>
    %c4_44 = arith.constant 4 : index
    %c0_45 = arith.constant 0 : index
    %c0_46 = arith.constant 0 : index
    %69 = vector.load %arg13[%c4_44, %c0_45, %c0_46] : memref<12x8x256xf32, #tpu.memory_space<vmem>>, vector<1x8x256xf32>
    %70 = vector.shape_cast %69 : vector<1x8x256xf32> to vector<8x256xf32>
    %71 = vector.shape_cast %68 : vector<8x256xf32> to vector<1x8x256xf32>
    tpu.vector_store %arg13[%c4_44, %c0_45, %c0_46], %71 {strides = array<i32>} : memref<12x8x256xf32, #tpu.memory_space<vmem>>, vector<1x8x256xf32>,
    %72 = vector.extract_strided_slice %41 {offsets = [80, 0], sizes = [8, 256], strides = [1, 1]} : vector<192x256xf32> to vector<8x256xf32>
    %73 = vector.extract_strided_slice %41 {offsets = [88, 0], sizes = [8, 256], strides = [1, 1]} : vector<192x256xf32> to vector<8x256xf32>
    %74 = arith.maximumf %72, %73 : vector<8x256xf32>
    %c5 = arith.constant 5 : index
    %c0_47 = arith.constant 0 : index
    %c0_48 = arith.constant 0 : index
    %75 = vector.load %arg13[%c5, %c0_47, %c0_48] : memref<12x8x256xf32, #tpu.memory_space<vmem>>, vector<1x8x256xf32>
    %76 = vector.shape_cast %75 : vector<1x8x256xf32> to vector<8x256xf32>
    %77 = vector.shape_cast %74 : vector<8x256xf32> to vector<1x8x256xf32>
    tpu.vector_store %arg13[%c5, %c0_47, %c0_48], %77 {strides = array<i32>} : memref<12x8x256xf32, #tpu.memory_space<vmem>>, vector<1x8x256xf32>,
    %78 = vector.extract_strided_slice %41 {offsets = [96, 0], sizes = [8, 256], strides = [1, 1]} : vector<192x256xf32> to vector<8x256xf32>
    %79 = vector.extract_strided_slice %41 {offsets = [104, 0], sizes = [8, 256], strides = [1, 1]} : vector<192x256xf32> to vector<8x256xf32>
    %80 = arith.maximumf %78, %79 : vector<8x256xf32>
    %c6 = arith.constant 6 : index
    %c0_49 = arith.constant 0 : index
    %c0_50 = arith.constant 0 : index
    %81 = vector.load %arg13[%c6, %c0_49, %c0_50] : memref<12x8x256xf32, #tpu.memory_space<vmem>>, vector<1x8x256xf32>
    %82 = vector.shape_cast %81 : vector<1x8x256xf32> to vector<8x256xf32>
    %83 = vector.shape_cast %80 : vector<8x256xf32> to vector<1x8x256xf32>
    tpu.vector_store %arg13[%c6, %c0_49, %c0_50], %83 {strides = array<i32>} : memref<12x8x256xf32, #tpu.memory_space<vmem>>, vector<1x8x256xf32>,
    %84 = vector.extract_strided_slice %41 {offsets = [112, 0], sizes = [8, 256], strides = [1, 1]} : vector<192x256xf32> to vector<8x256xf32>
    %85 = vector.extract_strided_slice %41 {offsets = [120, 0], sizes = [8, 256], strides = [1, 1]} : vector<192x256xf32> to vector<8x256xf32>
    %86 = arith.maximumf %84, %85 : vector<8x256xf32>
    %c7 = arith.constant 7 : index
    %c0_51 = arith.constant 0 : index
    %c0_52 = arith.constant 0 : index
    %87 = vector.load %arg13[%c7, %c0_51, %c0_52] : memref<12x8x256xf32, #tpu.memory_space<vmem>>, vector<1x8x256xf32>
    %88 = vector.shape_cast %87 : vector<1x8x256xf32> to vector<8x256xf32>
    %89 = vector.shape_cast %86 : vector<8x256xf32> to vector<1x8x256xf32>
    tpu.vector_store %arg13[%c7, %c0_51, %c0_52], %89 {strides = array<i32>} : memref<12x8x256xf32, #tpu.memory_space<vmem>>, vector<1x8x256xf32>,
    %90 = vector.extract_strided_slice %41 {offsets = [128, 0], sizes = [8, 256], strides = [1, 1]} : vector<192x256xf32> to vector<8x256xf32>
    %91 = vector.extract_strided_slice %41 {offsets = [136, 0], sizes = [8, 256], strides = [1, 1]} : vector<192x256xf32> to vector<8x256xf32>
    %92 = arith.maximumf %90, %91 : vector<8x256xf32>
    %c8 = arith.constant 8 : index
    %c0_53 = arith.constant 0 : index
    %c0_54 = arith.constant 0 : index
    %93 = vector.load %arg13[%c8, %c0_53, %c0_54] : memref<12x8x256xf32, #tpu.memory_space<vmem>>, vector<1x8x256xf32>
    %94 = vector.shape_cast %93 : vector<1x8x256xf32> to vector<8x256xf32>
    %95 = vector.shape_cast %92 : vector<8x256xf32> to vector<1x8x256xf32>
    tpu.vector_store %arg13[%c8, %c0_53, %c0_54], %95 {strides = array<i32>} : memref<12x8x256xf32, #tpu.memory_space<vmem>>, vector<1x8x256xf32>,
    %96 = vector.extract_strided_slice %41 {offsets = [144, 0], sizes = [8, 256], strides = [1, 1]} : vector<192x256xf32> to vector<8x256xf32>
    %97 = vector.extract_strided_slice %41 {offsets = [152, 0], sizes = [8, 256], strides = [1, 1]} : vector<192x256xf32> to vector<8x256xf32>
    %98 = arith.maximumf %96, %97 : vector<8x256xf32>
    %c9 = arith.constant 9 : index
    %c0_55 = arith.constant 0 : index
    %c0_56 = arith.constant 0 : index
    %99 = vector.load %arg13[%c9, %c0_55, %c0_56] : memref<12x8x256xf32, #tpu.memory_space<vmem>>, vector<1x8x256xf32>
    %100 = vector.shape_cast %99 : vector<1x8x256xf32> to vector<8x256xf32>
    %101 = vector.shape_cast %98 : vector<8x256xf32> to vector<1x8x256xf32>
    tpu.vector_store %arg13[%c9, %c0_55, %c0_56], %101 {strides = array<i32>} : memref<12x8x256xf32, #tpu.memory_space<vmem>>, vector<1x8x256xf32>,
    %102 = vector.extract_strided_slice %41 {offsets = [160, 0], sizes = [8, 256], strides = [1, 1]} : vector<192x256xf32> to vector<8x256xf32>
    %103 = vector.extract_strided_slice %41 {offsets = [168, 0], sizes = [8, 256], strides = [1, 1]} : vector<192x256xf32> to vector<8x256xf32>
    %104 = arith.maximumf %102, %103 : vector<8x256xf32>
    %c10 = arith.constant 10 : index
    %c0_57 = arith.constant 0 : index
    %c0_58 = arith.constant 0 : index
    %105 = vector.load %arg13[%c10, %c0_57, %c0_58] : memref<12x8x256xf32, #tpu.memory_space<vmem>>, vector<1x8x256xf32>
    %106 = vector.shape_cast %105 : vector<1x8x256xf32> to vector<8x256xf32>
    %107 = vector.shape_cast %104 : vector<8x256xf32> to vector<1x8x256xf32>
    tpu.vector_store %arg13[%c10, %c0_57, %c0_58], %107 {strides = array<i32>} : memref<12x8x256xf32, #tpu.memory_space<vmem>>, vector<1x8x256xf32>,
    %108 = vector.extract_strided_slice %41 {offsets = [176, 0], sizes = [8, 256], strides = [1, 1]} : vector<192x256xf32> to vector<8x256xf32>
    %109 = vector.extract_strided_slice %41 {offsets = [184, 0], sizes = [8, 256], strides = [1, 1]} : vector<192x256xf32> to vector<8x256xf32>
    %110 = arith.maximumf %108, %109 : vector<8x256xf32>
    %c11 = arith.constant 11 : index
    %c0_59 = arith.constant 0 : index
    %c0_60 = arith.constant 0 : index
    %111 = vector.load %arg13[%c11, %c0_59, %c0_60] : memref<12x8x256xf32, #tpu.memory_space<vmem>>, vector<1x8x256xf32>
    %112 = vector.shape_cast %111 : vector<1x8x256xf32> to vector<8x256xf32>
    %113 = vector.shape_cast %110 : vector<8x256xf32> to vector<1x8x256xf32>
    tpu.vector_store %arg13[%c11, %c0_59, %c0_60], %113 {strides = array<i32>} : memref<12x8x256xf32, #tpu.memory_space<vmem>>, vector<1x8x256xf32>,
    %c0_61 = arith.constant 0 : index
    %c0_62 = arith.constant 0 : index
    %c0_63 = arith.constant 0 : index
    %114 = vector.load %arg13[%c0_61, %c0_62, %c0_63] : memref<12x8x256xf32, #tpu.memory_space<vmem>>, vector<8x8x256xf32>
    %115 = vector.shape_cast %114 : vector<8x8x256xf32> to vector<64x256xf32>
    %116 = arith.truncf %115 : vector<64x256xf32> to vector<64x256xbf16>
    %c0_64 = arith.constant 0 : index
    %c0_65 = arith.constant 0 : index
    %c0_66 = arith.constant 0 : index
    %117 = vector.load %arg4[%c0_64, %c0_65, %c0_66] : memref<5x256x256xbf16, #tpu.memory_space<vmem>>, vector<1x256x256xbf16>
    %118 = vector.shape_cast %117 : vector<1x256x256xbf16> to vector<256x256xbf16>
    %cst_67 = arith.constant dense<0.000000e+00> : vector<64x256xf32>
    %119 = tpu.matmul %116, %118, %cst_67 {dimension_numbers = #tpu.dot_dimension_numbers<[1], [0], [0], [1], [0, 0, 1, 1], [], []>} : vector<64x256xbf16>, vector<256x256xbf16>, vector<64x256xf32> -> vector<64x256xf32>
    %c1_68 = arith.constant 1 : index
    %c0_69 = arith.constant 0 : index
    %c0_70 = arith.constant 0 : index
    %120 = vector.load %arg13[%c1_68, %c0_69, %c0_70] : memref<12x8x256xf32, #tpu.memory_space<vmem>>, vector<8x8x256xf32>
    %121 = vector.shape_cast %120 : vector<8x8x256xf32> to vector<64x256xf32>
    %122 = arith.truncf %121 : vector<64x256xf32> to vector<64x256xbf16>
    %c1_71 = arith.constant 1 : index
    %c0_72 = arith.constant 0 : index
    %c0_73 = arith.constant 0 : index
    %123 = vector.load %arg4[%c1_71, %c0_72, %c0_73] : memref<5x256x256xbf16, #tpu.memory_space<vmem>>, vector<1x256x256xbf16>
    %124 = vector.shape_cast %123 : vector<1x256x256xbf16> to vector<256x256xbf16>
    %cst_74 = arith.constant dense<0.000000e+00> : vector<64x256xf32>
    %125 = tpu.matmul %122, %124, %cst_74 {dimension_numbers = #tpu.dot_dimension_numbers<[1], [0], [0], [1], [0, 0, 1, 1], [], []>} : vector<64x256xbf16>, vector<256x256xbf16>, vector<64x256xf32> -> vector<64x256xf32>
    %126 = arith.addf %119, %125 : vector<64x256xf32>
    %c2_75 = arith.constant 2 : index
    %c0_76 = arith.constant 0 : index
    %c0_77 = arith.constant 0 : index
    %127 = vector.load %arg13[%c2_75, %c0_76, %c0_77] : memref<12x8x256xf32, #tpu.memory_space<vmem>>, vector<8x8x256xf32>
    %128 = vector.shape_cast %127 : vector<8x8x256xf32> to vector<64x256xf32>
    %129 = arith.truncf %128 : vector<64x256xf32> to vector<64x256xbf16>
    %c2_78 = arith.constant 2 : index
    %c0_79 = arith.constant 0 : index
    %c0_80 = arith.constant 0 : index
    %130 = vector.load %arg4[%c2_78, %c0_79, %c0_80] : memref<5x256x256xbf16, #tpu.memory_space<vmem>>, vector<1x256x256xbf16>
    %131 = vector.shape_cast %130 : vector<1x256x256xbf16> to vector<256x256xbf16>
    %cst_81 = arith.constant dense<0.000000e+00> : vector<64x256xf32>
    %132 = tpu.matmul %129, %131, %cst_81 {dimension_numbers = #tpu.dot_dimension_numbers<[1], [0], [0], [1], [0, 0, 1, 1], [], []>} : vector<64x256xbf16>, vector<256x256xbf16>, vector<64x256xf32> -> vector<64x256xf32>
    %133 = arith.addf %126, %132 : vector<64x256xf32>
    %c3_82 = arith.constant 3 : index
    %c0_83 = arith.constant 0 : index
    %c0_84 = arith.constant 0 : index
    %134 = vector.load %arg13[%c3_82, %c0_83, %c0_84] : memref<12x8x256xf32, #tpu.memory_space<vmem>>, vector<8x8x256xf32>
    %135 = vector.shape_cast %134 : vector<8x8x256xf32> to vector<64x256xf32>
    %136 = arith.truncf %135 : vector<64x256xf32> to vector<64x256xbf16>
    %c3_85 = arith.constant 3 : index
    %c0_86 = arith.constant 0 : index
    %c0_87 = arith.constant 0 : index
    %137 = vector.load %arg4[%c3_85, %c0_86, %c0_87] : memref<5x256x256xbf16, #tpu.memory_space<vmem>>, vector<1x256x256xbf16>
    %138 = vector.shape_cast %137 : vector<1x256x256xbf16> to vector<256x256xbf16>
    %cst_88 = arith.constant dense<0.000000e+00> : vector<64x256xf32>
    %139 = tpu.matmul %136, %138, %cst_88 {dimension_numbers = #tpu.dot_dimension_numbers<[1], [0], [0], [1], [0, 0, 1, 1], [], []>} : vector<64x256xbf16>, vector<256x256xbf16>, vector<64x256xf32> -> vector<64x256xf32>
    %140 = arith.addf %133, %139 : vector<64x256xf32>
    %c4_89 = arith.constant 4 : index
    %c0_90 = arith.constant 0 : index
    %c0_91 = arith.constant 0 : index
    %141 = vector.load %arg13[%c4_89, %c0_90, %c0_91] : memref<12x8x256xf32, #tpu.memory_space<vmem>>, vector<8x8x256xf32>
    %142 = vector.shape_cast %141 : vector<8x8x256xf32> to vector<64x256xf32>
    %143 = arith.truncf %142 : vector<64x256xf32> to vector<64x256xbf16>
    %c4_92 = arith.constant 4 : index
    %c0_93 = arith.constant 0 : index
    %c0_94 = arith.constant 0 : index
    %144 = vector.load %arg4[%c4_92, %c0_93, %c0_94] : memref<5x256x256xbf16, #tpu.memory_space<vmem>>, vector<1x256x256xbf16>
    %145 = vector.shape_cast %144 : vector<1x256x256xbf16> to vector<256x256xbf16>
    %cst_95 = arith.constant dense<0.000000e+00> : vector<64x256xf32>
    %146 = tpu.matmul %143, %145, %cst_95 {dimension_numbers = #tpu.dot_dimension_numbers<[1], [0], [0], [1], [0, 0, 1, 1], [], []>} : vector<64x256xbf16>, vector<256x256xbf16>, vector<64x256xf32> -> vector<64x256xf32>
    %147 = arith.addf %140, %146 : vector<64x256xf32>
    %c0_96 = arith.constant 0 : index
    %c0_97 = arith.constant 0 : index
    %148 = vector.load %arg5[%c0_96, %c0_97] : memref<1x256xf32, #tpu.memory_space<vmem>>, vector<1x256xf32>
    %149 = vector.broadcast %148 : vector<1x256xf32> to vector<64x256xf32>
    %150 = arith.addf %147, %149 : vector<64x256xf32>
    %cst_98 = arith.constant 0.000000e+00 : f32
    %151 = vector.broadcast %cst_98 : f32 to vector<64x256xf32>
    %152 = arith.maximumf %150, %151 : vector<64x256xf32>
    %153 = vector.extract_strided_slice %152 {offsets = [0, 0], sizes = [64, 128], strides = [1, 1]} : vector<64x256xf32> to vector<64x128xf32>
    %154 = vector.extract_strided_slice %152 {offsets = [0, 128], sizes = [64, 128], strides = [1, 1]} : vector<64x256xf32> to vector<64x128xf32>
    %155 = arith.maximumf %153, %154 : vector<64x128xf32>
    %156 = vector.extract_strided_slice %155 {offsets = [0, 0], sizes = [8, 128], strides = [1, 1]} : vector<64x128xf32> to vector<8x128xf32>
    %157 = vector.extract_strided_slice %155 {offsets = [8, 0], sizes = [8, 128], strides = [1, 1]} : vector<64x128xf32> to vector<8x128xf32>
    %158 = arith.maximumf %156, %157 : vector<8x128xf32>
    %159 = arith.truncf %158 : vector<8x128xf32> to vector<8x128xbf16>
    %c0_99 = arith.constant 0 : index
    %c0_100 = arith.constant 0 : index
    %c0_101 = arith.constant 0 : index
    %160 = vector.load %arg6[%c0_99, %c0_100, %c0_101] : memref<4x128x128xbf16, #tpu.memory_space<vmem>>, vector<1x128x128xbf16>
    %161 = vector.shape_cast %160 : vector<1x128x128xbf16> to vector<128x128xbf16>
    %cst_102 = arith.constant dense<0.000000e+00> : vector<8x128xf32>
    %162 = tpu.matmul %159, %161, %cst_102 {dimension_numbers = #tpu.dot_dimension_numbers<[1], [0], [0], [1], [0, 0, 1, 1], [], []>} : vector<8x128xbf16>, vector<128x128xbf16>, vector<8x128xf32> -> vector<8x128xf32>
    %163 = vector.extract_strided_slice %155 {offsets = [16, 0], sizes = [8, 128], strides = [1, 1]} : vector<64x128xf32> to vector<8x128xf32>
    %164 = vector.extract_strided_slice %155 {offsets = [24, 0], sizes = [8, 128], strides = [1, 1]} : vector<64x128xf32> to vector<8x128xf32>
    %165 = arith.maximumf %163, %164 : vector<8x128xf32>
    %166 = arith.truncf %165 : vector<8x128xf32> to vector<8x128xbf16>
    %c1_103 = arith.constant 1 : index
    %c0_104 = arith.constant 0 : index
    %c0_105 = arith.constant 0 : index
    %167 = vector.load %arg6[%c1_103, %c0_104, %c0_105] : memref<4x128x128xbf16, #tpu.memory_space<vmem>>, vector<1x128x128xbf16>
    %168 = vector.shape_cast %167 : vector<1x128x128xbf16> to vector<128x128xbf16>
    %cst_106 = arith.constant dense<0.000000e+00> : vector<8x128xf32>
    %169 = tpu.matmul %166, %168, %cst_106 {dimension_numbers = #tpu.dot_dimension_numbers<[1], [0], [0], [1], [0, 0, 1, 1], [], []>} : vector<8x128xbf16>, vector<128x128xbf16>, vector<8x128xf32> -> vector<8x128xf32>
    %170 = arith.addf %162, %169 : vector<8x128xf32>
    %171 = vector.extract_strided_slice %155 {offsets = [32, 0], sizes = [8, 128], strides = [1, 1]} : vector<64x128xf32> to vector<8x128xf32>
    %172 = vector.extract_strided_slice %155 {offsets = [40, 0], sizes = [8, 128], strides = [1, 1]} : vector<64x128xf32> to vector<8x128xf32>
    %173 = arith.maximumf %171, %172 : vector<8x128xf32>
    %174 = arith.truncf %173 : vector<8x128xf32> to vector<8x128xbf16>
    %c2_107 = arith.constant 2 : index
    %c0_108 = arith.constant 0 : index
    %c0_109 = arith.constant 0 : index
    %175 = vector.load %arg6[%c2_107, %c0_108, %c0_109] : memref<4x128x128xbf16, #tpu.memory_space<vmem>>, vector<1x128x128xbf16>
    %176 = vector.shape_cast %175 : vector<1x128x128xbf16> to vector<128x128xbf16>
    %cst_110 = arith.constant dense<0.000000e+00> : vector<8x128xf32>
    %177 = tpu.matmul %174, %176, %cst_110 {dimension_numbers = #tpu.dot_dimension_numbers<[1], [0], [0], [1], [0, 0, 1, 1], [], []>} : vector<8x128xbf16>, vector<128x128xbf16>, vector<8x128xf32> -> vector<8x128xf32>
    %178 = arith.addf %170, %177 : vector<8x128xf32>
    %179 = vector.extract_strided_slice %155 {offsets = [48, 0], sizes = [8, 128], strides = [1, 1]} : vector<64x128xf32> to vector<8x128xf32>
    %180 = vector.extract_strided_slice %155 {offsets = [56, 0], sizes = [8, 128], strides = [1, 1]} : vector<64x128xf32> to vector<8x128xf32>
    %181 = arith.maximumf %179, %180 : vector<8x128xf32>
    %182 = arith.truncf %181 : vector<8x128xf32> to vector<8x128xbf16>
    %c3_111 = arith.constant 3 : index
    %c0_112 = arith.constant 0 : index
    %c0_113 = arith.constant 0 : index
    %183 = vector.load %arg6[%c3_111, %c0_112, %c0_113] : memref<4x128x128xbf16, #tpu.memory_space<vmem>>, vector<1x128x128xbf16>
    %184 = vector.shape_cast %183 : vector<1x128x128xbf16> to vector<128x128xbf16>
    %cst_114 = arith.constant dense<0.000000e+00> : vector<8x128xf32>
    %185 = tpu.matmul %182, %184, %cst_114 {dimension_numbers = #tpu.dot_dimension_numbers<[1], [0], [0], [1], [0, 0, 1, 1], [], []>} : vector<8x128xbf16>, vector<128x128xbf16>, vector<8x128xf32> -> vector<8x128xf32>
    %186 = arith.addf %178, %185 : vector<8x128xf32>
    %c0_115 = arith.constant 0 : index
    %c0_116 = arith.constant 0 : index
    %187 = vector.load %arg7[%c0_115, %c0_116] : memref<1x128xf32, #tpu.memory_space<vmem>>, vector<1x128xf32>
    %188 = vector.broadcast %187 : vector<1x128xf32> to vector<8x128xf32>
    %189 = arith.addf %186, %188 : vector<8x128xf32>
    %cst_117 = arith.constant 0.000000e+00 : f32
    %190 = vector.broadcast %cst_117 : f32 to vector<8x128xf32>
    %191 = arith.maximumf %189, %190 : vector<8x128xf32>
    %192 = arith.truncf %191 : vector<8x128xf32> to vector<8x128xbf16>
    %c0_118 = arith.constant 0 : index
    %c0_119 = arith.constant 0 : index
    %193 = vector.load %arg8[%c0_118, %c0_119] : memref<128x128xbf16, #tpu.memory_space<vmem>>, vector<128x128xbf16>
    %cst_120 = arith.constant dense<0.000000e+00> : vector<8x128xf32>
    %194 = tpu.matmul %192, %193, %cst_120 {dimension_numbers = #tpu.dot_dimension_numbers<[1], [0], [0], [1], [0, 0, 1, 1], [], []>} : vector<8x128xbf16>, vector<128x128xbf16>, vector<8x128xf32> -> vector<8x128xf32>
    %c0_121 = arith.constant 0 : index
    %c0_122 = arith.constant 0 : index
    %195 = vector.load %arg9[%c0_121, %c0_122] : memref<1x128xf32, #tpu.memory_space<vmem>>, vector<1x128xf32>
    %196 = vector.broadcast %195 : vector<1x128xf32> to vector<8x128xf32>
    %197 = arith.addf %194, %196 : vector<8x128xf32>
    %cst_123 = arith.constant 0.000000e+00 : f32
    %198 = vector.broadcast %cst_123 : f32 to vector<8x128xf32>
    %199 = arith.maximumf %197, %198 : vector<8x128xf32>
    %200 = arith.truncf %199 : vector<8x128xf32> to vector<8x128xbf16>
    %c0_124 = arith.constant 0 : index
    %c0_125 = arith.constant 0 : index
    %201 = vector.load %arg10[%c0_124, %c0_125] : memref<128x128xbf16, #tpu.memory_space<vmem>>, vector<128x128xbf16>
    %cst_126 = arith.constant dense<0.000000e+00> : vector<8x128xf32>
    %202 = tpu.matmul %200, %201, %cst_126 {dimension_numbers = #tpu.dot_dimension_numbers<[1], [0], [0], [1], [0, 0, 1, 1], [], []>} : vector<8x128xbf16>, vector<128x128xbf16>, vector<8x128xf32> -> vector<8x128xf32>
    %c0_127 = arith.constant 0 : index
    %c0_128 = arith.constant 0 : index
    %203 = vector.load %arg11[%c0_127, %c0_128] : memref<1x128xf32, #tpu.memory_space<vmem>>, vector<1x128xf32>
    %204 = vector.broadcast %203 : vector<1x128xf32> to vector<8x128xf32>
    %205 = arith.addf %202, %204 : vector<8x128xf32>
    %c0_129 = arith.constant 0 : index
    %c0_130 = arith.constant 0 : index
    %206 = vector.load %arg12[%c0_129, %c0_130] : memref<8x128xf32, #tpu.memory_space<vmem>>, vector<8x128xf32>
    tpu.vector_store %arg12[%c0_129, %c0_130], %205 {strides = array<i32>} : memref<8x128xf32, #tpu.memory_space<vmem>>, vector<8x128xf32>,
    return
  }
  func.func @transform_0(%arg0: i32) -> (i32, i32, i32) {
    %c0_i32 = arith.constant 0 : i32
    %c0_i32_0 = arith.constant 0 : i32
    %c0_i32_1 = arith.constant 0 : i32
    return %c0_i32, %arg0, %c0_i32_0 : i32, i32, i32
  }
  func.func @transform_1(%arg0: i32) -> (i32, i32, i32) {
    %c0_i32 = arith.constant 0 : i32
    %c0_i32_0 = arith.constant 0 : i32
    %c0_i32_1 = arith.constant 0 : i32
    %c0_i32_2 = arith.constant 0 : i32
    return %c0_i32, %c0_i32_0, %c0_i32_1 : i32, i32, i32
  }
  func.func @transform_2(%arg0: i32) -> (i32, i32) {
    %c0_i32 = arith.constant 0 : i32
    %c0_i32_0 = arith.constant 0 : i32
    %c0_i32_1 = arith.constant 0 : i32
    return %c0_i32, %c0_i32_0 : i32, i32
  }
  func.func @transform_3(%arg0: i32) -> (i32, i32, i32) {
    %c0_i32 = arith.constant 0 : i32
    %c0_i32_0 = arith.constant 0 : i32
    %c0_i32_1 = arith.constant 0 : i32
    %c0_i32_2 = arith.constant 0 : i32
    return %c0_i32, %c0_i32_0, %c0_i32_1 : i32, i32, i32
  }
  func.func @transform_4(%arg0: i32) -> (i32, i32) {
    %c0_i32 = arith.constant 0 : i32
    %c0_i32_0 = arith.constant 0 : i32
    %c0_i32_1 = arith.constant 0 : i32
    return %c0_i32, %c0_i32_0 : i32, i32
  }
  func.func @transform_5(%arg0: i32) -> (i32, i32, i32) {
    %c0_i32 = arith.constant 0 : i32
    %c0_i32_0 = arith.constant 0 : i32
    %c0_i32_1 = arith.constant 0 : i32
    %c0_i32_2 = arith.constant 0 : i32
    return %c0_i32, %c0_i32_0, %c0_i32_1 : i32, i32, i32
  }
  func.func @transform_6(%arg0: i32) -> (i32, i32) {
    %c0_i32 = arith.constant 0 : i32
    %c0_i32_0 = arith.constant 0 : i32
    %c0_i32_1 = arith.constant 0 : i32
    return %c0_i32, %c0_i32_0 : i32, i32
  }
  func.func @transform_7(%arg0: i32) -> (i32, i32) {
    %c0_i32 = arith.constant 0 : i32
    %c0_i32_0 = arith.constant 0 : i32
    %c0_i32_1 = arith.constant 0 : i32
    return %c0_i32, %c0_i32_0 : i32, i32
  }
  func.func @transform_8(%arg0: i32) -> (i32, i32) {
    %c0_i32 = arith.constant 0 : i32
    %c0_i32_0 = arith.constant 0 : i32
    %c0_i32_1 = arith.constant 0 : i32
    return %c0_i32, %c0_i32_0 : i32, i32
  }
  func.func @transform_9(%arg0: i32) -> (i32, i32) {
    %c0_i32 = arith.constant 0 : i32
    %c0_i32_0 = arith.constant 0 : i32
    %c0_i32_1 = arith.constant 0 : i32
    return %c0_i32, %c0_i32_0 : i32, i32
  }
  func.func @transform_10(%arg0: i32) -> (i32, i32) {
    %c0_i32 = arith.constant 0 : i32
    %c0_i32_0 = arith.constant 0 : i32
    %c0_i32_1 = arith.constant 0 : i32
    return %c0_i32, %c0_i32_0 : i32, i32
  }
  func.func @transform_11(%arg0: i32) -> (i32, i32) {
    %c0_i32 = arith.constant 0 : i32
    %c0_i32_0 = arith.constant 0 : i32
    return %arg0, %c0_i32 : i32, i32
  }
}

</mosaic_0001>

<bundles_post_ra>
// kernel: net_forward.1
= control target key start
LH: loop header
LB: loop body
LE: loop exit
PB: predicated region body
PF: predicated region fallthrough
CT: control target
= control target key end

     0   :  { %16 = vsyncpa [#allocation4], 0  ;;  %s7844_s0 = inlined_call_operand.vmem [shape: f32[28,8,32], index: 0, kind: input, shape index: {}]   ;;  %s7845_s1 = inlined_call_operand.vmem [shape: bf16[5,32,512], index: 1, kind: input, shape index: {}]   ;;  %s7846_s2 = inlined_call_operand.vmem [shape: f32[1,512], index: 2, kind: input, shape index: {}]   ;;  %s7847_s3 = inlined_call_operand.hbm [shape: bf16[5,256,256], index: 3, kind: input, shape index: {}]   ;;  %s7848_s4 = inlined_call_operand.vmem [shape: f32[1,256], index: 4, kind: input, shape index: {}]   ;;  %s7849_s5 = inlined_call_operand.hbm [shape: bf16[4,128,128], index: 5, kind: input, shape index: {}]   ;;  %s7850_s6 = inlined_call_operand.vmem [shape: f32[1,128], index: 6, kind: input, shape index: {}]   ;;  %s7851_s7 = inlined_call_operand.vmem [shape: bf16[128,128], index: 7, kind: input, shape index: {}]   ;;  %s7852_s8 = inlined_call_operand.vmem [shape: f32[1,128], index: 8, kind: input, shape index: {}]   ;;  %s7853_s9 = inlined_call_operand.hbm [shape: bf16[128,128], index: 9, kind: input, shape index: {}]   ;;  %s7854_s10 = inlined_call_operand.vmem [shape: f32[1,128], index: 10, kind: input, shape index: {}]   ;;  %s7855_s11 = inlined_call_operand.vmem [shape: f32[8,128], index: 11, kind: output, shape index: {}]  }
   0x1   :  { %17 = vsyncpa [#allocation6], 0  ;;  %s6601_s17 = smov [#allocation5]   ;;  %s6531_s21 = scalar_lea.hbm %s7849_s5, 4096 }
   0x2   :  { %s43_s18 = sshll.u32 %s6601_s17, 4  ;;  %p6532_p0 = scmp.ne.s32.totalorder %s7849_s5, %s6531_s21  ;;  %s44_s18 = int_to_ptr.vmem [resolvable:$true] %s43_s18 }
   0x3   :  { %p6535_p1 = scmp.lt.u32.totalorder %s6531_s21, %s7849_s5 }
   0x5   :  { %p6537_p2 = pnand %p6535_p1, %p6532_p0 }
   0x7   :  { %6540 = shalt.err (!%p6537_p2)
}
   0x8   :  { %s6541_s26 = scalar_lea.vmem %s44_s18, 4096  ;;  %p6546_p4 = scmp.lt.s32.totalorder %s44_s18, %s44_s18 }
   0x9   :  { %p6542_p3 = scmp.ne.s32.totalorder %s44_s18, %s6541_s26  ;;  %p6547_p5 = scmp.lt.s32.totalorder %s6541_s26, %s6541_s26 }
   0xb   :  { %p6548_p6 = por %p6547_p5, %p6546_p4 }
   0xd   :  { %p6549_p7 = pnand %p6548_p6, %p6542_p3 }
   0xf   :  { %6552 = shalt.err (!%p6549_p7)
}
  0x10   :  { %s6602_s27 = smov 64   ;;  %s6603_s28 = smov 4  }
  0x11   :  { %49 = dma.hbm_to_vmem [thread:$0]  %s7849_s5, 4096, %s44_s18, [#allocation6], %s6602_s27, %s6602_s27, %s6603_s28  }
  0x12   :  { %s6604_s12 = smov [#allocation3]   ;;  %s6553_s16 = scalar_lea.hbm %s7847_s3, 20480 }
  0x13   :  { %s29_s13 = sshll.u32 %s6604_s12, 4  ;;  %p6554_p8 = scmp.ne.s32.totalorder %s7847_s3, %s6553_s16  ;;  %s30_s13 = int_to_ptr.vmem [resolvable:$true] %s29_s13 }
  0x14   :  { %p6557_p9 = scmp.lt.u32.totalorder %s6553_s16, %s7847_s3 }
  0x16   :  { %p6559_p10 = pnand %p6557_p9, %p6554_p8 }
  0x18   :  { %6562 = shalt.err (!%p6559_p10)
}
  0x19   :  { %s6563_s22 = scalar_lea.vmem %s30_s13, 20480  ;;  %p6568_p12 = scmp.lt.s32.totalorder %s30_s13, %s30_s13 }
  0x1a   :  { %p6564_p11 = scmp.ne.s32.totalorder %s30_s13, %s6563_s22  ;;  %p6569_p13 = scmp.lt.s32.totalorder %s6563_s22, %s6563_s22 }
  0x1c   :  { %p6570_p0 = por %p6569_p13, %p6568_p12 }
  0x1e   :  { %p6571_p1 = pnand %p6570_p0, %p6564_p11 }
  0x20   :  { %6574 = shalt.err (!%p6571_p1)
}
  0x21   :  { %s6605_s5 = smov 128   ;;  %s6606_s18 = smov 8  }
  0x22   :  { %35 = dma.hbm_to_vmem [thread:$0]  %s7847_s3, 20480, %s30_s13, [#allocation4], %s6605_s5, %s6605_s5, %s6606_s18  }
  0x23   :  { %s6607_s25 = smov [#allocation7]   ;;  %s6575_s12 = scalar_lea.hbm %s7853_s9, 1024 }
  0x24   :  { %s61_s26 = sshll.u32 %s6607_s25, 4  ;;  %p6576_p2 = scmp.ne.s32.totalorder %s7853_s9, %s6575_s12  ;;  %s62_s26 = int_to_ptr.vmem [resolvable:$true] %s61_s26 }
  0x25   :  { %p6579_p3 = scmp.lt.u32.totalorder %s6575_s12, %s7853_s9 }
  0x27   :  { %p6581_p4 = pnand %p6579_p3, %p6576_p2 }
  0x29   :  { %6584 = shalt.err (!%p6581_p4)
}
  0x2a   :  { %s6585_s19 = scalar_lea.vmem %s62_s26, 1024  ;;  %p6590_p6 = scmp.lt.s32.totalorder %s62_s26, %s62_s26 }
  0x2b   :  { %p6586_p5 = scmp.ne.s32.totalorder %s62_s26, %s6585_s19  ;;  %p6591_p7 = scmp.lt.s32.totalorder %s6585_s19, %s6585_s19 }
  0x2d   :  { %p6592_p8 = por %p6591_p7, %p6590_p6 }
  0x2f   :  { %p6593_p9 = pnand %p6592_p8, %p6586_p5 }
  0x31   :  { %6596 = shalt.err (!%p6593_p9)
}
  0x32   :  { %67 = dma.hbm_to_vmem [thread:$0]  %s7853_s9, 1024, %s62_s26, [#allocation6], %s6602_s27, %s6602_s27, %s6603_s28  }
  0x33   :  { %6597 = dma.done.wait [#allocation4], 20480  }
  0x34   :  { %6598 = vsyncadd [#allocation4], 4294946816 }
  0x35   :  { %6599 = dma.done.wait [#allocation6], 5120  }
  0x36   :  { %6600 = vsyncadd [#allocation6], 4294962176  ;;  %v6608_v0 = vmov 0   ;;  %v6182_v1 = vld [vmem:[%s7845_s1 + $0x44] ss:$16 sps:$4 sm:$0xff]   ;;  %v6730_v5 = vld [vmem:[%s7844_s0 + $0x8] sm:$0xff] }
  0x37   :  { %279 = vmatprep.mubr.bf16.mxu0 %v6608_v0  ;;  %389 = vmatprep.mubr.bf16.mxu1 %v6608_v0  ;;  %v6184_v2 = vld [vmem:[%s7845_s1 + $0x40] ss:$16 sps:$4 sm:$0xff]   ;;  %v6185_v3 = vld [vmem:[%s7845_s1 + $0x64] ss:$16 sps:$4 sm:$0xff]   ;;  %v6738_v7 = vld [vmem:[%s7844_s0 + $0xb8] sm:$0xff]  ;;  %vm210_vm0 = vcmask 261120  }
  0x38   :  { %247 = vmatprep.subr.bf16.mxu0 %v6182_v1  ;;  %5720 = vmatprep.subr.bf16.mxu1 %v6182_v1  ;;  %v6187_v4 = vld [vmem:[%s7845_s1 + $0x60] ss:$16 sps:$4 sm:$0xff]   ;;  %v6190_v9 = vld [vmem:[%s7845_s1 + $0x4c] ss:$16 sps:$4 sm:$0xff]   ;;  %v6188_v13 = vld [vmem:[%s7845_s1 + $0x48] ss:$16 sps:$4 sm:$0xff]  }
  0x39   :  { %248 = vmatpush1.bf16.msra.mxu0 %v6184_v2  ;;  %5722 = vmatpush1.bf16.msra.mxu1 %v6184_v2  ;;  %v5048_v6 = vld [vmem:[%s7844_s0 + $0x10] sm:$0xff]  ;;  %v5070_v8 = vld [vmem:[%s7844_s0 + $0xc0] sm:$0xff]  ;;  %v5049_v12 = vld [vmem:[%s7844_s0 + $0x18] sm:$0xff]  ;;  %vm6610_vm1 = vmmov 0  }
  0x3a   :  { %249 = vmatprep.subr.bf16.mxu0 %v6185_v3  ;;  %5721 = vmatprep.subr.bf16.mxu1 %v6185_v3  ;;  %v149_v10 = vpack.c.bf16 %v5048_v6, %v6730_v5  ;;  %v6748_v11 = vpack.c.bf16 %v5070_v8, %v6738_v7  ;;  %v6756_v14 = vpack.c.bf16 %v5049_v12, %v5048_v6  ;;  %v6193_v15 = vld [vmem:[%s7845_s1 + $0x6c] ss:$16 sps:$4 sm:$0xff]   ;;  %v5050_v16 = vld [vmem:[%s7844_s0 + $0x20] sm:$0xff]  ;;  %v6191_v18 = vld [vmem:[%s7845_s1 + $0x68] ss:$16 sps:$4 sm:$0xff]  }
  0x3b   :  { %v5051_v17 = vld [vmem:[%s7844_s0 + $0x28] sm:$0xff]  ;;  %v5052_v19 = vld [vmem:[%s7844_s0 + $0x30] sm:$0xff]  ;;  %v5053_v24 = vld [vmem:[%s7844_s0 + $0x38] sm:$0xff]  ;;  %v6818_v35 = vpack.c.bf16 %v5050_v16, %v5049_v12 }
  0x3c   :  { %v6773_v20 = vpack.c.bf16 %v5051_v17, %v5050_v16  ;;  %v6196_v21 = vld [vmem:[%s7845_s1 + $0xc] ss:$16 sps:$4 sm:$0xff]   ;;  %v6197_v22 = vld [vmem:[%s7845_s1] ss:$16 sps:$4 sm:$0xff]   ;;  %v6199_v23 = vld [vmem:[%s7845_s1 + $0x4] ss:$16 sps:$4 sm:$0xff]   ;;  %v6800_v28 = vpack.c.bf16 %v5053_v24, %v5052_v19  ;;  %v6854_v46 = vpack.c.bf16 %v5052_v19, %v5051_v17 }
  0x3d   :  { %250 = vmatpush1.bf16.msra.mxu0 %v6187_v4  ;;  %5723 = vmatpush1.bf16.msra.mxu1 %v6187_v4  ;;  %v5054_v25 = vld [vmem:[%s7844_s0 + $0x40] sm:$0xff]  ;;  %v5055_v26 = vld [vmem:[%s7844_s0 + $0x48] sm:$0xff]  ;;  %v5056_v27 = vld [vmem:[%s7844_s0 + $0x50] sm:$0xff] }
  0x3e   :  { %400 = vmatprep.subr.bf16.mxu1 %v6190_v9  ;;  %v5057_v29 = vld [vmem:[%s7844_s0 + $0x58] sm:$0xff]  ;;  %v5058_v30 = vld [vmem:[%s7844_s0 + $0x60] sm:$0xff]  ;;  %v5059_v31 = vld [vmem:[%s7844_s0 + $0x68] sm:$0xff]  ;;  %v6812_v32 = vpack.c.bf16 %v5055_v26, %v5054_v25  ;;  %629 = vmatprep.subr.bf16.mxu0 %v6199_v23  ;;  %v6870_v50 = vpack.c.bf16 %v5054_v25, %v5053_v24  ;;  %v6886_v54 = vpack.c.bf16 %v5056_v27, %v5055_v26 }
  0x3f   :  { %v6814_v33 = vpack.c.bf16 %v5057_v29, %v5056_v27  ;;  %v6816_v34 = vpack.c.bf16 %v5059_v31, %v5058_v30  ;;  %v6194_v36 = vld [vmem:[%s7845_s1 + $0x8] ss:$16 sps:$4 sm:$0xff]   ;;  %v6202_v37 = vld [vmem:[%s7845_s1 + $0x2c] ss:$16 sps:$4 sm:$0xff]   ;;  %v6205_v38 = vld [vmem:[%s7845_s1 + $0x24] ss:$16 sps:$4 sm:$0xff]   ;;  %v6902_v58 = vpack.c.bf16 %v5058_v30, %v5057_v29 }
  0x40   :  { %5087 = vmatmul.mubr.msk.bf16.vlgmr.msra.gmra.mrb[0].mxu0 %vm210_vm0, %v149_v10  ;;  %5098 = vmatmul.mubr.msk.bf16.vlgmr.msra.gmra.mrb[0].mxu1 %vm210_vm0, %v6748_v11  ;;  %v5060_v39 = vld [vmem:[%s7844_s0 + $0x70] sm:$0xff]  ;;  %v5061_v40 = vld [vmem:[%s7844_s0 + $0x78] sm:$0xff]  ;;  %v5062_v47 = vld [vmem:[%s7844_s0 + $0x80] sm:$0xff] }
  0x41   :  { %401 = vmatpush1.bf16.msra.mxu1 %v6188_v13  ;;  %289 = vmatprep.mubr.bf16.mxu0 %v6608_v0  ;;  %v6203_v41 = vld [vmem:[%s7845_s1 + $0x20] ss:$16 sps:$4 sm:$0xff]   ;;  %v6200_v42 = vld [vmem:[%s7845_s1 + $0x28] ss:$16 sps:$4 sm:$0xff]   ;;  %v6845_v43 = vpack.c.bf16 %v5061_v40, %v5060_v39  ;;  %v6208_v44 = vld [vmem:[%s7845_s1 + $0x84] ss:$16 sps:$4 sm:$0xff]   ;;  %v6916_v61 = vpack.c.bf16 %v5060_v39, %v5059_v31  ;;  %v6924_v62 = vpack.c.bf16 %v5062_v47, %v5061_v40 }
  0x42   :  { %402 = vmatprep.subr.bf16.mxu1 %v6193_v15  ;;  %432 = vmatprep.mubr.bf16.mxu1 %v6608_v0  ;;  %v6211_v45 = vld [vmem:[%s7845_s1 + $0x8c] ss:$16 sps:$4 sm:$0xff]   ;;  %v5064_v51 = vld [vmem:[%s7844_s0 + $0x90] sm:$0xff]  ;;  %v5066_v55 = vld [vmem:[%s7844_s0 + $0xa0] sm:$0xff] }
  0x43   :  { %630 = vmatpush1.bf16.msra.mxu0 %v6197_v22  ;;  %v5063_v48 = vld [vmem:[%s7844_s0 + $0x88] sm:$0xff]  ;;  %v5065_v52 = vld [vmem:[%s7844_s0 + $0x98] sm:$0xff]  ;;  %v5068_v59 = vld [vmem:[%s7844_s0 + $0xb0] sm:$0xff] }
  0x44   :  { %631 = vmatprep.subr.bf16.mxu0 %v6205_v38  ;;  %v6868_v49 = vpack.c.bf16 %v5063_v48, %v5062_v47  ;;  %v6884_v53 = vpack.c.bf16 %v5065_v52, %v5064_v51  ;;  %v5067_v56 = vld [vmem:[%s7844_s0 + $0xa8] sm:$0xff]  ;;  %v6914_v60 = vpack.c.bf16 %v6738_v7, %v5068_v59  ;;  %v6932_v63 = vpack.c.bf16 %v5064_v51, %v5063_v48  ;;  %v80_v3 = vld [vmem:[%s7844_s0] sm:$0xff]  ;;  %v6245_v47 = vld [vmem:[#allocation3 + $0x10] ss:$8 sps:$4 sm:$0xff]  }
  0x45   :  { %403 = vmatpush1.bf16.msra.mxu1 %v6191_v18  ;;  %v6900_v57 = vpack.c.bf16 %v5067_v56, %v5066_v55  ;;  %v6940_v1 = vpack.c.bf16 %v5066_v55, %v5065_v52  ;;  %v6948_v2 = vpack.c.bf16 %v5068_v59, %v5067_v56  ;;  %v104_v4 = vpack.c.bf16 %v6730_v5, %v80_v3  ;;  %v6206_v6 = vld [vmem:[%s7845_s1 + $0x80] ss:$16 sps:$4 sm:$0xff]   ;;  %v6214_v7 = vld [vmem:[%s7845_s1 + $0xa4] ss:$16 sps:$4 sm:$0xff]   ;;  %v6209_v9 = vld [vmem:[%s7845_s1 + $0x88] ss:$16 sps:$4 sm:$0xff]  }
  0x46   :  { %782 = vmatprep.subr.bf16.mxu1 %v6196_v21  ;;  %v6212_v8 = vld [vmem:[%s7845_s1 + $0xa0] ss:$16 sps:$4 sm:$0xff]   ;;  %v6220_v5 = vld [vmem:[%s7845_s1 + $0xc4] ss:$16 sps:$4 sm:$0xff]   ;;  %v6215_v12 = vld [vmem:[%s7845_s1 + $0xa8] ss:$16 sps:$4 sm:$0xff]  }
  0x47   :  { %632 = vmatpush1.bf16.msra.mxu0 %v6203_v41  ;;  %v6223_v13 = vld [vmem:[%s7845_s1 + $0xcc] ss:$16 sps:$4 sm:$0xff]   ;;  %v6218_v15 = vld [vmem:[%s7845_s1 + $0xc0] ss:$16 sps:$4 sm:$0xff]   ;;  %v6226_v16 = vld [vmem:[%s7845_s1 + $0xe4] ss:$16 sps:$4 sm:$0xff]  }
  0x48   :  { %5088 = vmatmul.mubr.msk.bf16.gmra.mrb[4].mxu0 %vm210_vm0, %v6818_v35  ;;  %5099 = vmatmul.mubr.msk.bf16.vlgmr.msra.gmra.mrb[4].mxu1 %vm210_vm0, %v149_v10  ;;  %v6217_v10 = vld [vmem:[%s7845_s1 + $0xac] ss:$16 sps:$4 sm:$0xff]   ;;  %v6224_v17 = vld [vmem:[%s7845_s1 + $0xe0] ss:$16 sps:$4 sm:$0xff]   ;;  %v6232_v18 = vld [vmem:[%s7845_s1 + $0x104] ss:$16 sps:$4 sm:$0xff]  }
  0x49   :  { %783 = vmatpush1.bf16.msra.mxu1 %v6194_v36  ;;  %299 = vmatprep.mubr.bf16.mxu0 %v6608_v0  ;;  %v6221_v19 = vld [vmem:[%s7845_s1 + $0xc8] ss:$16 sps:$4 sm:$0xff]   ;;  %v6229_v21 = vld [vmem:[%s7845_s1 + $0xec] ss:$16 sps:$4 sm:$0xff]   ;;  %v6530_v29 = vld [vmem:[%s7844_s0 + $0xc0] sm:$0xff] }
  0x4a   :  { %442 = vmatprep.mubr.bf16.mxu1 %v6608_v0  ;;  %784 = vmatprep.subr.bf16.mxu1 %v6202_v37  ;;  %v6227_v22 = vld [vmem:[%s7845_s1 + $0xe8] ss:$16 sps:$4 sm:$0xff]   ;;  %v6235_v23 = vld [vmem:[%s7845_s1 + $0x10c] ss:$16 sps:$4 sm:$0xff]   ;;  %v6230_v31 = vld [vmem:[%s7845_s1 + $0x100] ss:$16 sps:$4 sm:$0xff]  }
  0x4b   :  { %1057 = vmatprep.subr.bf16.mxu0 %v6208_v44  ;;  %v7155_v27 = vld [vmem:[%s7844_s0 + $0xc8] sm:$0xff]  ;;  %v6238_v36 = vld [vmem:[%s7845_s1 + $0x124] ss:$16 sps:$4 sm:$0xff]   ;;  %v6236_v37 = vld [vmem:[%s7845_s1 + $0x120] ss:$16 sps:$4 sm:$0xff]  }
  0x4c   :  { %v7161_v30 = vpack.c.bf16 %v7155_v27, %v6530_v29  ;;  %v6233_v38 = vld [vmem:[%s7845_s1 + $0x108] ss:$16 sps:$4 sm:$0xff]   ;;  %v6241_v39 = vld [vmem:[%s7845_s1 + $0x12c] ss:$16 sps:$4 sm:$0xff]  }
  0x4d   :  { %785 = vmatpush1.bf16.msra.mxu1 %v6200_v42  ;;  %v6239_v40 = vld [vmem:[%s7845_s1 + $0x128] ss:$16 sps:$4 sm:$0xff]   ;;  %v6265_v41 = vld [vmem:[#allocation3 + $0x104] ss:$8 sps:$4 sm:$0xff]   ;;  %v7256_v42 = vld [vmem:[%s7844_s0 + $0xd0] sm:$0xff] }
  0x4e   :  { %1210 = vmatprep.subr.bf16.mxu1 %v6211_v45  ;;  %v1495_v44 = vpack.c.bf16 %v7256_v42, %v7155_v27  ;;  %v6242_v45 = vld [vmem:[#allocation3] ss:$8 sps:$4 sm:$0xff]   ;;  %v6250_v48 = vld [vmem:[#allocation3 + $0x24] ss:$8 sps:$4 sm:$0xff]   ;;  %v6253_v51 = vld [vmem:[#allocation3 + $0x34] ss:$8 sps:$4 sm:$0xff]  }
  0x4f   :  { %v6256_v52 = vld [vmem:[#allocation3 + $0x44] ss:$8 sps:$4 sm:$0xff]   ;;  %v6263_v55 = vld [vmem:[#allocation3 + $0x100] ss:$8 sps:$4 sm:$0xff]   ;;  %v6259_v56 = vld [vmem:[#allocation3 + $0x54] ss:$8 sps:$4 sm:$0xff]  }
  0x50   :  { %5089 = vmatmul.mubr.msk.bf16.gmra.mrb[8].mxu0 %vm210_vm0, %v6854_v46  ;;  %5100 = vmatmul.mubr.msk.bf16.gmra.mrb[8].mxu1 %vm210_vm0, %v6818_v35  ;;  %v6257_v59 = vld [vmem:[#allocation3 + $0x50] ss:$8 sps:$4 sm:$0xff]   ;;  %v6268_v3 = vld [vmem:[#allocation3 + $0x74] ss:$8 sps:$4 sm:$0xff]   ;;  %v6316_v27 = vld [vmem:[#allocation3 + $0x1a4] ss:$8 sps:$4 sm:$0xff]  }
  0x51   :  { %309 = vmatprep.mubr.bf16.mxu0 %v6608_v0  ;;  %452 = vmatprep.mubr.bf16.mxu1 %v6608_v0  ;;  %v6314_v29 = vld [vmem:[#allocation3 + $0x1a0] ss:$8 sps:$4 sm:$0xff]  }
  0x58   :  { %5090 = vmatmul.mubr.msk.bf16.gmra.mrb[12].mxu0 %vm210_vm0, %v6870_v50  ;;  %5101 = vmatmul.mubr.msk.bf16.gmra.mrb[12].mxu1 %vm210_vm0, %v6854_v46 }
  0x59   :  { %319 = vmatprep.mubr.bf16.mxu0 %v6608_v0  ;;  %462 = vmatprep.mubr.bf16.mxu1 %v6608_v0 }
  0x60   :  { %5091 = vmatmul.mubr.msk.bf16.gmra.mrb[16].mxu0 %vm210_vm0, %v6886_v54  ;;  %5102 = vmatmul.mubr.msk.bf16.gmra.mrb[16].mxu1 %vm210_vm0, %v6870_v50 }
  0x61   :  { %329 = vmatprep.mubr.bf16.mxu0 %v6608_v0  ;;  %472 = vmatprep.mubr.bf16.mxu1 %v6608_v0 }
  0x68   :  { %5092 = vmatmul.mubr.msk.bf16.gmra.mrb[20].mxu0 %vm210_vm0, %v6902_v58  ;;  %5103 = vmatmul.mubr.msk.bf16.gmra.mrb[20].mxu1 %vm210_vm0, %v6886_v54 }
  0x69   :  { %339 = vmatprep.mubr.bf16.mxu0 %v6608_v0  ;;  %482 = vmatprep.mubr.bf16.mxu1 %v6608_v0 }
  0x70   :  { %5093 = vmatmul.mubr.msk.bf16.gmra.mrb[24].mxu0 %vm210_vm0, %v6916_v61  ;;  %5104 = vmatmul.mubr.msk.bf16.gmra.mrb[24].mxu1 %vm210_vm0, %v6902_v58 }
  0x71   :  { %349 = vmatprep.mubr.bf16.mxu0 %v6608_v0  ;;  %492 = vmatprep.mubr.bf16.mxu1 %v6608_v0 }
  0x78   :  { %5094 = vmatmul.mubr.msk.bf16.gmra.mrb[28].mxu0 %vm210_vm0, %v6924_v62  ;;  %5105 = vmatmul.mubr.msk.bf16.gmra.mrb[28].mxu1 %vm210_vm0, %v6916_v61 }
  0x79   :  { %359 = vmatprep.mubr.bf16.mxu0 %v6608_v0  ;;  %502 = vmatprep.mubr.bf16.mxu1 %v6608_v0 }
  0x80   :  { %5095 = vmatmul.mubr.msk.bf16.gmra.mrb[32].mxu0 %vm210_vm0, %v6932_v63  ;;  %5106 = vmatmul.mubr.msk.bf16.gmra.mrb[32].mxu1 %vm210_vm0, %v6924_v62 }
  0x81   :  { %369 = vmatprep.mubr.bf16.mxu0 %v6608_v0  ;;  %512 = vmatprep.mubr.bf16.mxu1 %v6608_v0 }
  0x88   :  { %5096 = vmatmul.mubr.msk.bf16.gmra.mrb[36].mxu0 %vm210_vm0, %v6940_v1  ;;  %5107 = vmatmul.mubr.msk.bf16.gmra.mrb[36].mxu1 %vm210_vm0, %v6932_v63 }
  0x89   :  { %379 = vmatprep.mubr.bf16.mxu0 %v6608_v0  ;;  %522 = vmatprep.mubr.bf16.mxu1 %v6608_v0 }
  0x90   :  { %5097 = vmatmul.mubr.msk.bf16.gmra.mrb[40].mxu0 %vm210_vm0, %v6948_v2  ;;  %5108 = vmatmul.mubr.msk.bf16.gmra.mrb[40].mxu1 %vm210_vm0, %v6940_v1 }
  0x91   :  { %532 = vmatprep.mubr.bf16.mxu1 %v6608_v0  ;;  %661 = vmatprep.mubr.bf16.mxu0 %v6608_v0 }
  0x98   :  { %5109 = vmatmul.mubr.msk.bf16.gmra.mrb[44].mxu1 %vm210_vm0, %v6948_v2  ;;  %5119 = vmatmul.mubr.msk.bf16.vlgmr.msra.gmra.mrb[0].mxu0 %vm210_vm0, %v104_v4 }
  0x99   :  { %542 = vmatprep.mubr.bf16.mxu1 %v6608_v0  ;;  %671 = vmatprep.mubr.bf16.mxu0 %v6608_v0 }
  0x9a   :  { %1058 = vmatpush1.bf16.msra.mxu0 %v6206_v6  ;;  %v6278_v6 = vld [vmem:[#allocation3 + $0x130] ss:$8 sps:$4 sm:$0xff]  }
  0x9b   :  { %1059 = vmatprep.subr.bf16.mxu0 %v6214_v7  ;;  %v6277_v7 = vld [vmem:[#allocation3 + $0x84] ss:$8 sps:$4 sm:$0xff]  }
  0x9e   :  { %1060 = vmatpush1.bf16.msra.mxu0 %v6212_v8  ;;  %v6286_v8 = vld [vmem:[#allocation3 + $0x144] ss:$8 sps:$4 sm:$0xff]  }
  0x9f   :  { %1581 = vmatprep.subr.bf16.mxu0 %v6220_v5  ;;  %v6275_v5 = vld [vmem:[#allocation3 + $0x80] ss:$8 sps:$4 sm:$0xff]  }
  0xa0   :  { %5110 = vmatmul.mubr.msk.bf16.gmra.mrb[48].mxu1 %vm210_vm0, %v6748_v11  ;;  %5120 = vmatmul.mubr.msk.bf16.gmra.mrb[4].mxu0 %vm210_vm0, %v6756_v14 }
  0xa1   :  { %681 = vmatprep.mubr.bf16.mxu0 %v6608_v0  ;;  %814 = vmatprep.mubr.bf16.mxu1 %v6608_v0 }
  0xa8   :  { %5121 = vmatmul.mubr.msk.bf16.gmra.mrb[8].mxu0 %vm210_vm0, %v6773_v20  ;;  %5131 = vmatmul.mubr.msk.bf16.vlgmr.msra.gmra.mrb[4].mxu1 %vm210_vm0, %v104_v4  ;;  %v6266_v4 = vld [vmem:[#allocation3 + $0x70] ss:$8 sps:$4 sm:$0xff]  }
  0xa9   :  { %1211 = vmatpush1.bf16.msra.mxu1 %v6209_v9  ;;  %691 = vmatprep.mubr.bf16.mxu0 %v6608_v0  ;;  %v6284_v9 = vld [vmem:[#allocation3 + $0x140] ss:$8 sps:$4 sm:$0xff]  }
  0xaa   :  { %824 = vmatprep.mubr.bf16.mxu1 %v6608_v0  ;;  %1212 = vmatprep.subr.bf16.mxu1 %v6217_v10  ;;  %v6283_v10 = vld [vmem:[#allocation3 + $0x94] ss:$8 sps:$4 sm:$0xff]  }
  0xad   :  { %1213 = vmatpush1.bf16.msra.mxu1 %v6215_v12  ;;  %v6293_v12 = vld [vmem:[#allocation3 + $0x160] ss:$8 sps:$4 sm:$0xff]  }
  0xae   :  { %1734 = vmatprep.subr.bf16.mxu1 %v6223_v13  ;;  %v6301_v13 = vld [vmem:[#allocation3 + $0x174] ss:$8 sps:$4 sm:$0xff]  }
  0xb0   :  { %5122 = vmatmul.mubr.msk.bf16.gmra.mrb[12].mxu0 %vm210_vm0, %v6800_v28  ;;  %5132 = vmatmul.mubr.msk.bf16.gmra.mrb[8].mxu1 %vm210_vm0, %v6756_v14 }
  0xb1   :  { %701 = vmatprep.mubr.bf16.mxu0 %v6608_v0  ;;  %834 = vmatprep.mubr.bf16.mxu1 %v6608_v0 }
  0xb8   :  { %5123 = vmatmul.mubr.msk.bf16.gmra.mrb[16].mxu0 %vm210_vm0, %v6812_v32  ;;  %5133 = vmatmul.mubr.msk.bf16.gmra.mrb[12].mxu1 %vm210_vm0, %v6773_v20 }
  0xb9   :  { %711 = vmatprep.mubr.bf16.mxu0 %v6608_v0  ;;  %844 = vmatprep.mubr.bf16.mxu1 %v6608_v0 }
  0xc0   :  { %5124 = vmatmul.mubr.msk.bf16.gmra.mrb[20].mxu0 %vm210_vm0, %v6814_v33  ;;  %5134 = vmatmul.mubr.msk.bf16.gmra.mrb[16].mxu1 %vm210_vm0, %v6800_v28 }
  0xc1   :  { %721 = vmatprep.mubr.bf16.mxu0 %v6608_v0  ;;  %854 = vmatprep.mubr.bf16.mxu1 %v6608_v0 }
  0xc8   :  { %5125 = vmatmul.mubr.msk.bf16.gmra.mrb[24].mxu0 %vm210_vm0, %v6816_v34  ;;  %5135 = vmatmul.mubr.msk.bf16.gmra.mrb[20].mxu1 %vm210_vm0, %v6812_v32 }
  0xc9   :  { %731 = vmatprep.mubr.bf16.mxu0 %v6608_v0  ;;  %864 = vmatprep.mubr.bf16.mxu1 %v6608_v0 }
  0xd0   :  { %5126 = vmatmul.mubr.msk.bf16.gmra.mrb[28].mxu0 %vm210_vm0, %v6845_v43  ;;  %5136 = vmatmul.mubr.msk.bf16.gmra.mrb[24].mxu1 %vm210_vm0, %v6814_v33 }
  0xd1   :  { %741 = vmatprep.mubr.bf16.mxu0 %v6608_v0  ;;  %874 = vmatprep.mubr.bf16.mxu1 %v6608_v0 }
  0xd8   :  { %5127 = vmatmul.mubr.msk.bf16.gmra.mrb[32].mxu0 %vm210_vm0, %v6868_v49  ;;  %5137 = vmatmul.mubr.msk.bf16.gmra.mrb[28].mxu1 %vm210_vm0, %v6816_v34 }
  0xd9   :  { %751 = vmatprep.mubr.bf16.mxu0 %v6608_v0  ;;  %884 = vmatprep.mubr.bf16.mxu1 %v6608_v0 }
  0xe0   :  { %5128 = vmatmul.mubr.msk.bf16.gmra.mrb[36].mxu0 %vm210_vm0, %v6884_v53  ;;  %5138 = vmatmul.mubr.msk.bf16.gmra.mrb[32].mxu1 %vm210_vm0, %v6845_v43 }
  0xe1   :  { %761 = vmatprep.mubr.bf16.mxu0 %v6608_v0  ;;  %894 = vmatprep.mubr.bf16.mxu1 %v6608_v0 }
  0xe8   :  { %5129 = vmatmul.mubr.msk.bf16.gmra.mrb[40].mxu0 %vm210_vm0, %v6900_v57  ;;  %5139 = vmatmul.mubr.msk.bf16.gmra.mrb[36].mxu1 %vm210_vm0, %v6868_v49 }
  0xe9   :  { %771 = vmatprep.mubr.bf16.mxu0 %v6608_v0  ;;  %904 = vmatprep.mubr.bf16.mxu1 %v6608_v0 }
  0xf0   :  { %5130 = vmatmul.mubr.msk.bf16.gmra.mrb[44].mxu0 %vm210_vm0, %v6914_v60  ;;  %5140 = vmatmul.mubr.msk.bf16.gmra.mrb[40].mxu1 %vm210_vm0, %v6884_v53 }
  0xf1   :  { %914 = vmatprep.mubr.bf16.mxu1 %v6608_v0  ;;  %1089 = vmatprep.mubr.bf16.mxu0 %v6608_v0 }
  0xf8   :  { %5141 = vmatmul.mubr.msk.bf16.gmra.mrb[44].mxu1 %vm210_vm0, %v6900_v57  ;;  %5183 = vmatmul.mubr.msk.bf16.vlgmr.msra.gmra.mrb[0].mxu0 %vm210_vm0, %v6756_v14 }
  0xf9   :  { %924 = vmatprep.mubr.bf16.mxu1 %v6608_v0  ;;  %1099 = vmatprep.mubr.bf16.mxu0 %v6608_v0 }
  0xfa   :  { %1582 = vmatpush1.bf16.msra.mxu0 %v6218_v15  ;;  %v6299_v15 = vld [vmem:[#allocation3 + $0x170] ss:$8 sps:$4 sm:$0xff]  }
  0xfb   :  { %1583 = vmatprep.subr.bf16.mxu0 %v6226_v16  ;;  %v6296_v16 = vld [vmem:[#allocation3 + $0xb0] ss:$8 sps:$4 sm:$0xff]  }
  0xfe   :  { %1584 = vmatpush1.bf16.msra.mxu0 %v6224_v17  ;;  %v6298_v17 = vld [vmem:[#allocation3 + $0xb4] ss:$8 sps:$4 sm:$0xff]  }
  0xff   :  { %2105 = vmatprep.subr.bf16.mxu0 %v6232_v18  ;;  %v6302_v18 = vld [vmem:[#allocation3 + $0x180] ss:$8 sps:$4 sm:$0xff]  }
 0x100   :  { %5142 = vmatmul.mubr.msk.bf16.gmra.mrb[48].mxu1 %vm210_vm0, %v6914_v60  ;;  %5184 = vmatmul.mubr.msk.bf16.gmra.mrb[4].mxu0 %vm210_vm0, %v6773_v20 }
 0x101   :  { %1109 = vmatprep.mubr.bf16.mxu0 %v6608_v0  ;;  %1242 = vmatprep.mubr.bf16.mxu1 %v6608_v0 }
 0x108   :  { %5185 = vmatmul.mubr.msk.bf16.gmra.mrb[8].mxu0 %vm210_vm0, %v6800_v28  ;;  %5195 = vmatmul.mubr.msk.bf16.vlgmr.msra.gmra.mrb[4].mxu1 %vm210_vm0, %v6756_v14 }
 0x109   :  { %1735 = vmatpush1.bf16.msra.mxu1 %v6221_v19  ;;  %1119 = vmatprep.mubr.bf16.mxu0 %v6608_v0  ;;  %v6307_v19 = vld [vmem:[#allocation3 + $0xc4] ss:$8 sps:$4 sm:$0xff]  }
 0x10a   :  { %1252 = vmatprep.mubr.bf16.mxu1 %v6608_v0  ;;  %1736 = vmatprep.subr.bf16.mxu1 %v6229_v21  ;;  %v6305_v21 = vld [vmem:[#allocation3 + $0xc0] ss:$8 sps:$4 sm:$0xff]  }
 0x10d   :  { %1737 = vmatpush1.bf16.msra.mxu1 %v6227_v22  ;;  %v6310_v22 = vld [vmem:[#allocation3 + $0x194] ss:$8 sps:$4 sm:$0xff]  }
 0x10e   :  { %2258 = vmatprep.subr.bf16.mxu1 %v6235_v23  ;;  %v6308_v23 = vld [vmem:[#allocation3 + $0x190] ss:$8 sps:$4 sm:$0xff]  }
 0x110   :  { %5186 = vmatmul.mubr.msk.bf16.gmra.mrb[12].mxu0 %vm210_vm0, %v6812_v32  ;;  %5196 = vmatmul.mubr.msk.bf16.gmra.mrb[8].mxu1 %vm210_vm0, %v6773_v20 }
 0x111   :  { %1129 = vmatprep.mubr.bf16.mxu0 %v6608_v0  ;;  %1262 = vmatprep.mubr.bf16.mxu1 %v6608_v0 }
 0x113   :  { %v7102_v14 = vpop.f32.mrb[0].mxu1 }
 0x114   :  { %v7104_v24 = vpop.f32.mrb[1].mxu1 }
 0x115   :  { %v7106_v25 = vpop.f32.mrb[2].mxu1 }
 0x116   :  { %v7108_v26 = vpop.f32.mrb[3].mxu1 }
 0x118   :  { %5187 = vmatmul.mubr.msk.bf16.gmra.mrb[16].mxu0 %vm210_vm0, %v6814_v33  ;;  %5197 = vmatmul.mubr.msk.bf16.gmra.mrb[12].mxu1 %vm210_vm0, %v6800_v28 }
 0x119   :  { %1139 = vmatprep.mubr.bf16.mxu0 %v6608_v0  ;;  %1272 = vmatprep.mubr.bf16.mxu1 %v6608_v0 }
 0x120   :  { %5188 = vmatmul.mubr.msk.bf16.gmra.mrb[20].mxu0 %vm210_vm0, %v6816_v34  ;;  %5198 = vmatmul.mubr.msk.bf16.gmra.mrb[16].mxu1 %vm210_vm0, %v6812_v32 }
 0x121   :  { %1149 = vmatprep.mubr.bf16.mxu0 %v6608_v0  ;;  %1282 = vmatprep.mubr.bf16.mxu1 %v6608_v0 }
 0x128   :  { %5189 = vmatmul.mubr.msk.bf16.gmra.mrb[24].mxu0 %vm210_vm0, %v6845_v43  ;;  %5199 = vmatmul.mubr.msk.bf16.gmra.mrb[20].mxu1 %vm210_vm0, %v6814_v33 }
 0x129   :  { %1159 = vmatprep.mubr.bf16.mxu0 %v6608_v0  ;;  %1292 = vmatprep.mubr.bf16.mxu1 %v6608_v0 }
 0x130   :  { %5190 = vmatmul.mubr.msk.bf16.gmra.mrb[28].mxu0 %vm210_vm0, %v6868_v49  ;;  %5200 = vmatmul.mubr.msk.bf16.gmra.mrb[24].mxu1 %vm210_vm0, %v6816_v34 }
 0x131   :  { %1169 = vmatprep.mubr.bf16.mxu0 %v6608_v0  ;;  %1302 = vmatprep.mubr.bf16.mxu1 %v6608_v0 }
 0x138   :  { %5191 = vmatmul.mubr.msk.bf16.gmra.mrb[32].mxu0 %vm210_vm0, %v6884_v53  ;;  %5201 = vmatmul.mubr.msk.bf16.gmra.mrb[28].mxu1 %vm210_vm0, %v6845_v43 }
 0x139   :  { %1179 = vmatprep.mubr.bf16.mxu0 %v6608_v0  ;;  %1312 = vmatprep.mubr.bf16.mxu1 %v6608_v0 }
 0x140   :  { %5192 = vmatmul.mubr.msk.bf16.gmra.mrb[36].mxu0 %vm210_vm0, %v6900_v57  ;;  %5202 = vmatmul.mubr.msk.bf16.gmra.mrb[32].mxu1 %vm210_vm0, %v6868_v49 }
 0x141   :  { %1189 = vmatprep.mubr.bf16.mxu0 %v6608_v0  ;;  %1322 = vmatprep.mubr.bf16.mxu1 %v6608_v0 }
 0x148   :  { %5193 = vmatmul.mubr.msk.bf16.gmra.mrb[40].mxu0 %vm210_vm0, %v6914_v60  ;;  %5203 = vmatmul.mubr.msk.bf16.gmra.mrb[36].mxu1 %vm210_vm0, %v6884_v53 }
 0x149   :  { %1199 = vmatprep.mubr.bf16.mxu0 %v6608_v0  ;;  %1332 = vmatprep.mubr.bf16.mxu1 %v6608_v0 }
 0x150   :  { %5194 = vmatmul.mubr.msk.bf16.gmra.mrb[44].mxu0 %vm210_vm0, %v7161_v30  ;;  %5204 = vmatmul.mubr.msk.bf16.gmra.mrb[40].mxu1 %vm210_vm0, %v6900_v57 }
 0x151   :  { %1342 = vmatprep.mubr.bf16.mxu1 %v6608_v0  ;;  %1613 = vmatprep.mubr.bf16.mxu0 %v6608_v0 }
 0x158   :  { %5205 = vmatmul.mubr.msk.bf16.gmra.mrb[44].mxu1 %vm210_vm0, %v6914_v60  ;;  %5247 = vmatmul.mubr.msk.bf16.vlgmr.msra.gmra.mrb[0].mxu0 %vm210_vm0, %v6818_v35 }
 0x159   :  { %1352 = vmatprep.mubr.bf16.mxu1 %v6608_v0  ;;  %1623 = vmatprep.mubr.bf16.mxu0 %v6608_v0 }
 0x15a   :  { %2106 = vmatpush1.bf16.msra.mxu0 %v6230_v31  ;;  %v6319_v31 = vld [vmem:[#allocation3 + $0x1b4] ss:$8 sps:$4 sm:$0xff]  }
 0x15b   :  { %2107 = vmatprep.subr.bf16.mxu0 %v6238_v36  ;;  %v6317_v36 = vld [vmem:[#allocation3 + $0x1b0] ss:$8 sps:$4 sm:$0xff]  }
 0x15e   :  { %2108 = vmatpush1.bf16.msra.mxu0 %v6236_v37  ;;  %v6322_v37 = vld [vmem:[#allocation3 + $0xe4] ss:$8 sps:$4 sm:$0xff]  }
 0x160   :  { %5206 = vmatmul.mubr.msk.bf16.gmra.mrb[48].mxu1 %vm210_vm0, %v7161_v30  ;;  %5248 = vmatmul.mubr.msk.bf16.gmra.mrb[4].mxu0 %vm210_vm0, %v6854_v46 }
 0x161   :  { %1633 = vmatprep.mubr.bf16.mxu0 %v6608_v0  ;;  %1766 = vmatprep.mubr.bf16.mxu1 %v6608_v0 }
 0x168   :  { %5249 = vmatmul.mubr.msk.bf16.gmra.mrb[8].mxu0 %vm210_vm0, %v6870_v50  ;;  %5259 = vmatmul.mubr.msk.bf16.vlgmr.msra.gmra.mrb[4].mxu1 %vm210_vm0, %v6818_v35  ;;  %v6244_v35 = vld [vmem:[#allocation3 + $0x4] ss:$8 sps:$4 sm:$0xff]  }
 0x169   :  { %2259 = vmatpush1.bf16.msra.mxu1 %v6233_v38  ;;  %1643 = vmatprep.mubr.bf16.mxu0 %v6608_v0  ;;  %v6320_v38 = vld [vmem:[#allocation3 + $0xe0] ss:$8 sps:$4 sm:$0xff]  }
 0x16a   :  { %1776 = vmatprep.mubr.bf16.mxu1 %v6608_v0  ;;  %2260 = vmatprep.subr.bf16.mxu1 %v6241_v39  ;;  %v6325_v39 = vld [vmem:[#allocation3 + $0x1c4] ss:$8 sps:$4 sm:$0xff]  }
 0x16b   :  { %3334 = vmatprep.subr.bf16.mxu0 %v6244_v35  ;;  %v6328_v35 = vld [vmem:[#allocation3 + $0xf4] ss:$8 sps:$4 sm:$0xff]  }
 0x16d   :  { %2261 = vmatpush1.bf16.msra.mxu1 %v6239_v40  ;;  %v6323_v40 = vld [vmem:[#allocation3 + $0x1c0] ss:$8 sps:$4 sm:$0xff]  }
 0x16e   :  { %3101 = vmatprep.subr.bf16.mxu1 %v6265_v41  ;;  %v6326_v41 = vld [vmem:[#allocation3 + $0xf0] ss:$8 sps:$4 sm:$0xff]  }
 0x170   :  { %5250 = vmatmul.mubr.msk.bf16.gmra.mrb[12].mxu0 %vm210_vm0, %v6886_v54  ;;  %5260 = vmatmul.mubr.msk.bf16.gmra.mrb[8].mxu1 %vm210_vm0, %v6854_v46  ;;  %v6247_v46 = vld [vmem:[#allocation3 + $0x14] ss:$8 sps:$4 sm:$0xff]  }
 0x171   :  { %1653 = vmatprep.mubr.bf16.mxu0 %v6608_v0  ;;  %1786 = vmatprep.mubr.bf16.mxu1 %v6608_v0 }
 0x178   :  { %5251 = vmatmul.mubr.msk.bf16.gmra.mrb[16].mxu0 %vm210_vm0, %v6902_v58  ;;  %5261 = vmatmul.mubr.msk.bf16.gmra.mrb[12].mxu1 %vm210_vm0, %v6870_v50  ;;  %v6248_v50 = vld [vmem:[#allocation3 + $0x20] ss:$8 sps:$4 sm:$0xff]  }
 0x179   :  { %1663 = vmatprep.mubr.bf16.mxu0 %v6608_v0  ;;  %1796 = vmatprep.mubr.bf16.mxu1 %v6608_v0 }
 0x180   :  { %5252 = vmatmul.mubr.msk.bf16.gmra.mrb[20].mxu0 %vm210_vm0, %v6916_v61  ;;  %5262 = vmatmul.mubr.msk.bf16.gmra.mrb[16].mxu1 %vm210_vm0, %v6886_v54  ;;  %v6254_v54 = vld [vmem:[#allocation3 + $0x40] ss:$8 sps:$4 sm:$0xff]  }
 0x181   :  { %1673 = vmatprep.mubr.bf16.mxu0 %v6608_v0  ;;  %1806 = vmatprep.mubr.bf16.mxu1 %v6608_v0 }
 0x188   :  { %5253 = vmatmul.mubr.msk.bf16.gmra.mrb[24].mxu0 %vm210_vm0, %v6924_v62  ;;  %5263 = vmatmul.mubr.msk.bf16.gmra.mrb[20].mxu1 %vm210_vm0, %v6902_v58  ;;  %v6271_v58 = vld [vmem:[#allocation3 + $0x114] ss:$8 sps:$4 sm:$0xff]  }
 0x189   :  { %1683 = vmatprep.mubr.bf16.mxu0 %v6608_v0  ;;  %1816 = vmatprep.mubr.bf16.mxu1 %v6608_v0 }
 0x190   :  { %5254 = vmatmul.mubr.msk.bf16.gmra.mrb[28].mxu0 %vm210_vm0, %v6932_v63  ;;  %5264 = vmatmul.mubr.msk.bf16.gmra.mrb[24].mxu1 %vm210_vm0, %v6916_v61  ;;  %v6269_v61 = vld [vmem:[#allocation3 + $0x110] ss:$8 sps:$4 sm:$0xff]  }
 0x191   :  { %1693 = vmatprep.mubr.bf16.mxu0 %v6608_v0  ;;  %1826 = vmatprep.mubr.bf16.mxu1 %v6608_v0 }
 0x198   :  { %5255 = vmatmul.mubr.msk.bf16.gmra.mrb[32].mxu0 %vm210_vm0, %v6940_v1  ;;  %5265 = vmatmul.mubr.msk.bf16.gmra.mrb[28].mxu1 %vm210_vm0, %v6924_v62  ;;  %v6262_v62 = vld [vmem:[#allocation3 + $0x64] ss:$8 sps:$4 sm:$0xff]  }
 0x199   :  { %1703 = vmatprep.mubr.bf16.mxu0 %v6608_v0  ;;  %1836 = vmatprep.mubr.bf16.mxu1 %v6608_v0 }
 0x1a0   :  { %5256 = vmatmul.mubr.msk.bf16.gmra.mrb[36].mxu0 %vm210_vm0, %v6948_v2  ;;  %5266 = vmatmul.mubr.msk.bf16.gmra.mrb[32].mxu1 %vm210_vm0, %v6932_v63  ;;  %v6274_v63 = vld [vmem:[#allocation3 + $0x124] ss:$8 sps:$4 sm:$0xff]  }
 0x1a1   :  { %1713 = vmatprep.mubr.bf16.mxu0 %v6608_v0  ;;  %1846 = vmatprep.mubr.bf16.mxu1 %v6608_v0 }
 0x1a8   :  { %5257 = vmatmul.mubr.msk.bf16.gmra.mrb[40].mxu0 %vm210_vm0, %v6748_v11  ;;  %5267 = vmatmul.mubr.msk.bf16.gmra.mrb[36].mxu1 %vm210_vm0, %v6940_v1  ;;  %v6260_v1 = vld [vmem:[#allocation3 + $0x60] ss:$8 sps:$4 sm:$0xff]  }
 0x1a9   :  { %1723 = vmatprep.mubr.bf16.mxu0 %v6608_v0  ;;  %1856 = vmatprep.mubr.bf16.mxu1 %v6608_v0 }
 0x1b0   :  { %5258 = vmatmul.mubr.msk.bf16.gmra.mrb[44].mxu0 %vm210_vm0, %v1495_v44  ;;  %5268 = vmatmul.mubr.msk.bf16.gmra.mrb[40].mxu1 %vm210_vm0, %v6948_v2  ;;  %v6272_v2 = vld [vmem:[#allocation3 + $0x120] ss:$8 sps:$4 sm:$0xff]  }
 0x1b1   :  { %1866 = vmatprep.mubr.bf16.mxu1 %v6608_v0  ;;  %2137 = vmatprep.mubr.bf16.mxu0 %v6608_v0 }
 0x1b8   :  { %5269 = vmatmul.mubr.msk.bf16.gmra.mrb[44].mxu1 %vm210_vm0, %v6748_v11  ;;  %5311 = vmatmul.mubr.msk.bf16.vlgmr.msra.gmra.mrb[0].mxu0 %vm210_vm0, %v6773_v20  ;;  %v6251_v11 = vld [vmem:[#allocation3 + $0x30] ss:$8 sps:$4 sm:$0xff]  }
 0x1b9   :  { %1876 = vmatprep.mubr.bf16.mxu1 %v6608_v0  ;;  %2147 = vmatprep.mubr.bf16.mxu0 %v6608_v0 }
 0x1ba   :  { %3335 = vmatpush1.bf16.msra.mxu0 %v6242_v45  ;;  %v6334_v45 = vld [vmem:[#allocation3 + $0x204] ss:$8 sps:$4 sm:$0xff]  }
 0x1bb   :  { %3336 = vmatprep.subr.bf16.mxu0 %v6247_v46  ;;  %v6337_v46 = vld [vmem:[#allocation3 + $0x1e4] ss:$8 sps:$4 sm:$0xff]  }
 0x1be   :  { %3337 = vmatpush1.bf16.msra.mxu0 %v6245_v47  ;;  %v6335_v47 = vld [vmem:[#allocation3 + $0x1e0] ss:$8 sps:$4 sm:$0xff]  }
 0x1bf   :  { %3338 = vmatprep.subr.bf16.mxu0 %v6250_v48  ;;  %v6343_v48 = vld [vmem:[#allocation3 + $0x1f4] ss:$8 sps:$4 sm:$0xff]  }
 0x1c0   :  { %5270 = vmatmul.mubr.msk.bf16.gmra.mrb[48].mxu1 %vm210_vm0, %v1495_v44  ;;  %5312 = vmatmul.mubr.msk.bf16.gmra.mrb[4].mxu0 %vm210_vm0, %v6800_v28  ;;  %v6329_v44 = vld [vmem:[#allocation3 + $0x1d0] ss:$8 sps:$4 sm:$0xff]  }
 0x1c1   :  { %2157 = vmatprep.mubr.bf16.mxu0 %v6608_v0  ;;  %2290 = vmatprep.mubr.bf16.mxu1 %v6608_v0 }
 0x1c2   :  { %3339 = vmatpush1.bf16.msra.mxu0 %v6248_v50  ;;  %v6341_v50 = vld [vmem:[#allocation3 + $0x1f0] ss:$8 sps:$4 sm:$0xff]  }
 0x1c3   :  { %3340 = vmatprep.subr.bf16.mxu0 %v6253_v51  ;;  %v2509_v51 = vlaneseq }
 0x1c6   :  { %3341 = vmatpush1.bf16.msra.mxu0 %v6251_v11 }
 0x1c7   :  { %3342 = vmatprep.subr.bf16.mxu0 %v6256_v52 }
 0x1c8   :  { %5313 = vmatmul.mubr.msk.bf16.gmra.mrb[8].mxu0 %vm210_vm0, %v6812_v32  ;;  %5323 = vmatmul.mubr.msk.bf16.vlgmr.msra.gmra.mrb[4].mxu1 %vm210_vm0, %v6773_v20  ;;  %v6280_v20 = vld [vmem:[#allocation3 + $0x134] ss:$8 sps:$4 sm:$0xff]  }
 0x1c9   :  { %2167 = vmatprep.mubr.bf16.mxu0 %v6608_v0  ;;  %2300 = vmatprep.mubr.bf16.mxu1 %v6608_v0 }
 0x1ca   :  { %3343 = vmatpush1.bf16.msra.mxu0 %v6254_v54  ;;  %3102 = vmatpush1.bf16.msra.mxu1 %v6263_v55  ;;  %v7342_v55 = vshrl.u32 %v2509_v51, 7 }
 0x1cb   :  { %3344 = vmatprep.subr.bf16.mxu0 %v6259_v56  ;;  %3103 = vmatprep.subr.bf16.mxu1 %v6271_v58 }
 0x1cc   :  { %v2511_v58 = vsub.s32 0, %v7342_v55 }
 0x1ce   :  { %3345 = vmatpush1.bf16.msra.mxu0 %v6257_v59  ;;  %3104 = vmatpush1.bf16.msra.mxu1 %v6269_v61  ;;  %v2507_v59 = vld [vmem:[%s7846_s2] sm:$0xf]  ;;  %v2515_v61 = vsub.s32 1, %v7342_v55 }
 0x1cf   :  { %3346 = vmatprep.subr.bf16.mxu0 %v6262_v62  ;;  %3105 = vmatprep.subr.bf16.mxu1 %v6274_v63 }
 0x1d0   :  { %5314 = vmatmul.mubr.msk.bf16.gmra.mrb[12].mxu0 %vm210_vm0, %v6814_v33  ;;  %5324 = vmatmul.mubr.msk.bf16.gmra.mrb[8].mxu1 %vm210_vm0, %v6800_v28  ;;  %v6281_v28 = vld [vmem:[#allocation3 + $0x90] ss:$8 sps:$4 sm:$0xff]  }
 0x1d1   :  { %2177 = vmatprep.mubr.bf16.mxu0 %v6608_v0  ;;  %2310 = vmatprep.mubr.bf16.mxu1 %v6608_v0 }
 0x1d2   :  { %3347 = vmatpush1.bf16.msra.mxu0 %v6260_v1  ;;  %3106 = vmatpush1.bf16.msra.mxu1 %v6272_v2  ;;  %v2519_v1 = vsub.s32 2, %v7342_v55 }
 0x1d3   :  { %3348 = vmatprep.subr.bf16.mxu0 %v6268_v3  ;;  %3107 = vmatprep.subr.bf16.mxu1 %v6280_v20  ;;  %v2523_v3 = vsub.s32 3, %v7342_v55  ;;  %v7353_v20 = vrot.slane %v2507_v59, %v2511_v58 }
 0x1d6   :  { %3349 = vmatpush1.bf16.msra.mxu0 %v6266_v4  ;;  %3108 = vmatpush1.bf16.msra.mxu1 %v6278_v6  ;;  %v7357_v6 = vrot.slane %v2507_v59, %v2515_v61 }
 0x1d7   :  { %3350 = vmatprep.subr.bf16.mxu0 %v6277_v7  ;;  %3109 = vmatprep.subr.bf16.mxu1 %v6286_v8  ;;  %v7359_v7 = vrot.slane %v2507_v59, %v2519_v1  ;;  %v7361_v8 = vrot.slane %v2507_v59, %v2523_v3 }
 0x1d8   :  { %5315 = vmatmul.mubr.msk.bf16.gmra.mrb[16].mxu0 %vm210_vm0, %v6816_v34  ;;  %5325 = vmatmul.mubr.msk.bf16.gmra.mrb[12].mxu1 %vm210_vm0, %v6812_v32  ;;  %v5294_v32 = vld [vmem:[%s7844_s0 + $0xd8] sm:$0xff] }
 0x1d9   :  { %2187 = vmatprep.mubr.bf16.mxu0 %v6608_v0  ;;  %2320 = vmatprep.mubr.bf16.mxu1 %v6608_v0 }
 0x1da   :  { %3351 = vmatpush1.bf16.msra.mxu0 %v6275_v5  ;;  %3110 = vmatpush1.bf16.msra.mxu1 %v6284_v9 }
 0x1db   :  { %3352 = vmatprep.subr.bf16.mxu0 %v6283_v10 }
 0x1de   :  { %3353 = vmatpush1.bf16.msra.mxu0 %v6281_v28 }
 0x1e0   :  { %5316 = vmatmul.mubr.msk.bf16.gmra.mrb[20].mxu0 %vm210_vm0, %v6845_v43  ;;  %5326 = vmatmul.mubr.msk.bf16.gmra.mrb[16].mxu1 %vm210_vm0, %v6814_v33  ;;  %v2019_v33 = vpack.c.bf16 %v5294_v32, %v7256_v42  ;;  %v6331_v42 = vld [vmem:[#allocation3 + $0x1d4] ss:$8 sps:$4 sm:$0xff]  }
 0x1e1   :  { %2197 = vmatprep.mubr.bf16.mxu0 %v6608_v0  ;;  %2330 = vmatprep.mubr.bf16.mxu1 %v6608_v0 }
 0x1e8   :  { %5317 = vmatmul.mubr.msk.bf16.gmra.mrb[24].mxu0 %vm210_vm0, %v6868_v49  ;;  %5327 = vmatmul.mubr.msk.bf16.gmra.mrb[20].mxu1 %vm210_vm0, %v6816_v34  ;;  %v6289_v34 = vld [vmem:[#allocation3 + $0x154] ss:$8 sps:$4 sm:$0xff]  }
 0x1e9   :  { %2207 = vmatprep.mubr.bf16.mxu0 %v6608_v0  ;;  %2340 = vmatprep.mubr.bf16.mxu1 %v6608_v0 }
 0x1ea   :  { %3111 = vmatprep.subr.bf16.mxu1 %v6289_v34 }
 0x1f0   :  { %5318 = vmatmul.mubr.msk.bf16.gmra.mrb[28].mxu0 %vm210_vm0, %v6884_v53  ;;  %5328 = vmatmul.mubr.msk.bf16.gmra.mrb[24].mxu1 %vm210_vm0, %v6845_v43  ;;  %v6287_v43 = vld [vmem:[#allocation3 + $0x150] ss:$8 sps:$4 sm:$0xff]  }
 0x1f1   :  { %2217 = vmatprep.mubr.bf16.mxu0 %v6608_v0  ;;  %2350 = vmatprep.mubr.bf16.mxu1 %v6608_v0 }
 0x1f2   :  { %3112 = vmatpush1.bf16.msra.mxu1 %v6287_v43 }
 0x1f8   :  { %5319 = vmatmul.mubr.msk.bf16.gmra.mrb[32].mxu0 %vm210_vm0, %v6900_v57  ;;  %5329 = vmatmul.mubr.msk.bf16.gmra.mrb[28].mxu1 %vm210_vm0, %v6868_v49  ;;  %v6295_v49 = vld [vmem:[#allocation3 + $0x164] ss:$8 sps:$4 sm:$0xff]  }
 0x1f9   :  { %2227 = vmatprep.mubr.bf16.mxu0 %v6608_v0  ;;  %2360 = vmatprep.mubr.bf16.mxu1 %v6608_v0 }
 0x1fa   :  { %3113 = vmatprep.subr.bf16.mxu1 %v6295_v49 }
 0x1fb   :  { %3114 = vmatpush1.bf16.msra.mxu1 %v6293_v12 }
 0x1fc   :  { %3115 = vmatprep.subr.bf16.mxu1 %v6301_v13 }
 0x1ff   :  { %3116 = vmatpush1.bf16.msra.mxu1 %v6299_v15 }
 0x200   :  { %5320 = vmatmul.mubr.msk.bf16.gmra.mrb[36].mxu0 %vm210_vm0, %v6914_v60  ;;  %5330 = vmatmul.mubr.msk.bf16.gmra.mrb[32].mxu1 %vm210_vm0, %v6884_v53  ;;  %v6290_v53 = vld [vmem:[#allocation3 + $0xa0] ss:$8 sps:$4 sm:$0xff]  }
 0x201   :  { %2237 = vmatprep.mubr.bf16.mxu0 %v6608_v0  ;;  %2370 = vmatprep.mubr.bf16.mxu1 %v6608_v0 }
 0x208   :  { %5321 = vmatmul.mubr.msk.bf16.gmra.mrb[40].mxu0 %vm210_vm0, %v7161_v30  ;;  %5331 = vmatmul.mubr.msk.bf16.gmra.mrb[36].mxu1 %vm210_vm0, %v6900_v57  ;;  %v6292_v57 = vld [vmem:[#allocation3 + $0xa4] ss:$8 sps:$4 sm:$0xff]  }
 0x209   :  { %2247 = vmatprep.mubr.bf16.mxu0 %v6608_v0  ;;  %2380 = vmatprep.mubr.bf16.mxu1 %v6608_v0 }
 0x20a   :  { %3354 = vmatprep.subr.bf16.mxu0 %v6292_v57 }
 0x20b   :  { %3355 = vmatpush1.bf16.msra.mxu0 %v6290_v53 }
 0x20c   :  { %3356 = vmatprep.subr.bf16.mxu0 %v6298_v17 }
 0x20f   :  { %3357 = vmatpush1.bf16.msra.mxu0 %v6296_v16 }
 0x210   :  { %5322 = vmatmul.mubr.msk.bf16.gmra.mrb[44].mxu0 %vm210_vm0, %v2019_v33  ;;  %5332 = vmatmul.mubr.msk.bf16.gmra.mrb[40].mxu1 %vm210_vm0, %v6914_v60  ;;  %v6304_v60 = vld [vmem:[#allocation3 + $0x184] ss:$8 sps:$4 sm:$0xff]  }
 0x211   :  { %2390 = vmatprep.mubr.bf16.mxu1 %v6608_v0  ;;  %3117 = vmatprep.subr.bf16.mxu1 %v6304_v60 }
 0x212   :  { %3358 = vmatprep.subr.bf16.mxu0 %v6307_v19  ;;  %3118 = vmatpush1.bf16.msra.mxu1 %v6302_v18 }
 0x213   :  { %3359 = vmatpush1.bf16.msra.mxu0 %v6305_v21  ;;  %3119 = vmatprep.subr.bf16.mxu1 %v6310_v22 }
 0x216   :  { %3120 = vmatpush1.bf16.msra.mxu1 %v6308_v23 }
 0x217   :  { %3121 = vmatprep.subr.bf16.mxu1 %v6316_v27 }
 0x218   :  { %5333 = vmatmul.mubr.msk.bf16.gmra.mrb[44].mxu1 %vm210_vm0, %v7161_v30  ;;  %v6313_v30 = vld [vmem:[#allocation3 + $0xd4] ss:$8 sps:$4 sm:$0xff]  }
 0x219   :  { %2400 = vmatprep.mubr.bf16.mxu1 %v6608_v0  ;;  %v6311_v0 = vld [vmem:[#allocation3 + $0xd0] ss:$8 sps:$4 sm:$0xff]   ;;  %3360 = vmatprep.subr.bf16.mxu0 %v6313_v30 }
 0x21a   :  { %3122 = vmatpush1.bf16.msra.mxu1 %v6314_v29  ;;  %3361 = vmatpush1.bf16.msra.mxu0 %v6311_v0 }
 0x21b   :  { %3123 = vmatprep.subr.bf16.mxu1 %v6319_v31  ;;  %3362 = vmatprep.subr.bf16.mxu0 %v6322_v37 }
 0x21e   :  { %3124 = vmatpush1.bf16.msra.mxu1 %v6317_v36  ;;  %3363 = vmatpush1.bf16.msra.mxu0 %v6320_v38 }
 0x21f   :  { %3125 = vmatprep.subr.bf16.mxu1 %v6325_v39  ;;  %3364 = vmatprep.subr.bf16.mxu0 %v6328_v35 }
 0x220   :  { %5334 = vmatmul.mubr.msk.bf16.gmra.mrb[48].mxu1 %vm210_vm0, %v2019_v33 }
 0x222   :  { %3126 = vmatpush1.bf16.msra.mxu1 %v6323_v40  ;;  %3365 = vmatpush1.bf16.msra.mxu0 %v6326_v41 }
 0x223   :  { %3127 = vmatprep.subr.bf16.mxu1 %v6331_v42  ;;  %3624 = vmatprep.subr.bf16.mxu0 %v6334_v45 }
 0x226   :  { %3128 = vmatpush1.bf16.msra.mxu1 %v6329_v44 }
 0x227   :  { %3129 = vmatprep.subr.bf16.mxu1 %v6337_v46 }
 0x22a   :  { %3130 = vmatpush1.bf16.msra.mxu1 %v6335_v47 }
 0x22b   :  { %3131 = vmatprep.subr.bf16.mxu1 %v6343_v48 }
 0x22e   :  { %3132 = vmatpush1.bf16.msra.mxu1 %v6341_v50 }
 0x28b   :  { %v2139_v11 = vpop.f32.mrb[0].mxu0 }
 0x28c   :  { %v2141_v52 = vpop.f32.mrb[1].mxu0  ;;  %v2529_v5 = vadd.f32 %v7353_v20, %v2139_v11 }
 0x28d   :  { %v2143_v54 = vpop.f32.mrb[2].mxu0  ;;  %v2530_v9 = vadd.f32 %v7357_v6, %v2141_v52 }
 0x28e   :  { %v2145_v56 = vpop.f32.mrb[3].mxu0  ;;  %v2533_v32 = vadd.f32 %v7353_v20, %v2143_v54  ;;  %v2625_v13 = vmax.f32 %v2529_v5, 0.0 }
 0x28f   :  { %v2534_v49 = vadd.f32 %v7357_v6, %v2145_v56  ;;  %v2626_v18 = vmax.f32 %v2530_v9, 0.0 }
 0x290   :  { %v2629_v22 = vmax.f32 %v2533_v32, 0.0 }
 0x291   :  { %v2630_v29 = vmax.f32 %v2534_v49, 0.0 }
 0x293   :  { %v2149_v62 = vpop.f32.mrb[4].mxu0 }
 0x294   :  { %v2151_v63 = vpop.f32.mrb[5].mxu0  ;;  %v2537_v31 = vadd.f32 %v7353_v20, %v2149_v62 }
 0x295   :  { %v2153_v2 = vpop.f32.mrb[6].mxu0  ;;  %v2538_v37 = vadd.f32 %v7357_v6, %v2151_v63 }
 0x296   :  { %v2155_v4 = vpop.f32.mrb[7].mxu0  ;;  %v2541_v35 = vadd.f32 %v7353_v20, %v2153_v2  ;;  %v2633_v11 = vmax.f32 %v2537_v31, 0.0 }
 0x297   :  { %v2542_v46 = vadd.f32 %v7357_v6, %v2155_v4  ;;  %v2634_v62 = vmax.f32 %v2538_v37, 0.0 }
 0x298   :  { %v2637_v2 = vmax.f32 %v2541_v35, 0.0  ;;  %v6332_v35 = vld [vmem:[#allocation3 + $0x200] ss:$8 sps:$4 sm:$0xff]  }
 0x299   :  { %v2638_v5 = vmax.f32 %v2542_v46, 0.0 }
 0x29b   :  { %v2159_v10 = vpop.f32.mrb[8].mxu0  ;;  %v2292_v28 = vpop.f32.mrb[4].mxu1 }
 0x29c   :  { %v2531_v33 = vadd.f32 %v7359_v7, %v2292_v28  ;;  %v2161_v34 = vpop.f32.mrb[9].mxu0  ;;  %v2294_v43 = vpop.f32.mrb[5].mxu1  ;;  %v2545_v32 = vadd.f32 %v7353_v20, %v2159_v10 }
 0x29d   :  { %v2532_v53 = vadd.f32 %v7361_v8, %v2294_v43  ;;  %v2163_v57 = vpop.f32.mrb[10].mxu0  ;;  %v2296_v12 = vpop.f32.mrb[6].mxu1  ;;  %v2546_v43 = vadd.f32 %v7357_v6, %v2161_v34 }
 0x29e   :  { %v2627_v15 = vmax.f32 %v2531_v33, 0.0  ;;  %v2535_v16 = vadd.f32 %v7359_v7, %v2296_v12  ;;  %v2165_v17 = vpop.f32.mrb[11].mxu0  ;;  %v2298_v60 = vpop.f32.mrb[7].mxu1 }
 0x29f   :  { %v2628_v19 = vmax.f32 %v2532_v53, 0.0  ;;  %v2536_v21 = vadd.f32 %v7361_v8, %v2298_v60  ;;  %v2642_v31 = vmax.f32 %v2546_v43, 0.0 }
 0x2a0   :  { %v2721_v23 = vmax.f32 %v2625_v13, %v2627_v15  ;;  %v2631_v27 = vmax.f32 %v2535_v16, 0.0 }
 0x2a1   :  { %v2722_v30 = vmax.f32 %v2626_v18, %v2628_v19  ;;  %v2632_v0 = vmax.f32 %v2536_v21, 0.0  ;;  %v2549_v18 = vadd.f32 %v7353_v20, %v2163_v57 }
 0x2a2   :  { %v2723_v36 = vmax.f32 %v2629_v22, %v2631_v27  ;;  %v2641_v22 = vmax.f32 %v2545_v32, 0.0 }
 0x2a3   :  { %v2724_v38 = vmax.f32 %v2630_v29, %v2632_v0  ;;  %v2169_v39 = vpop.f32.mrb[12].mxu0  ;;  %v2302_v40 = vpop.f32.mrb[8].mxu1 }
 0x2a4   :  { %v2769_v41 = vmax.f32 %v2721_v23, %v2723_v36  ;;  %v2539_v42 = vadd.f32 %v7359_v7, %v2302_v40  ;;  %v2171_v44 = vpop.f32.mrb[13].mxu0  ;;  %v2304_v45 = vpop.f32.mrb[9].mxu1  ;;  %v2550_v23 = vadd.f32 %v7357_v6, %v2165_v17  ;;  %v6340_v17 = vld [vmem:[#allocation3 + $0x214] ss:$8 sps:$4 sm:$0xff]  }
 0x2a5   :  { %v2770_v47 = vmax.f32 %v2722_v30, %v2724_v38  ;;  %v2540_v48 = vadd.f32 %v7361_v8, %v2304_v45  ;;  %v7377_v50 = vpop.f32.mrb[14].mxu0  ;;  %v2306_v51 = vpop.f32.mrb[10].mxu1 }
 0x2a6   :  { %v2635_v52 = vmax.f32 %v2539_v42, 0.0  ;;  %v2543_v54 = vadd.f32 %v7359_v7, %v2306_v51  ;;  %v7380_v56 = vpop.f32.mrb[15].mxu0  ;;  %v2308_v59 = vpop.f32.mrb[11].mxu1  ;;  %v2645_v42 = vmax.f32 %v2549_v18, 0.0 }
 0x2a7   :  { %v2636_v63 = vmax.f32 %v2540_v48, 0.0  ;;  %v2544_v1 = vadd.f32 %v7361_v8, %v2308_v59  ;;  %v2646_v48 = vmax.f32 %v2550_v23, 0.0  ;;  %v2558_v32 = vadd.f32 %v7357_v6, %v7380_v56 }
 0x2a8   :  { %v2725_v3 = vmax.f32 %v2633_v11, %v2635_v52  ;;  %v2639_v4 = vmax.f32 %v2543_v54, 0.0  ;;  %v2554_v11 = vadd.f32 %v7357_v6, %v2171_v44 }
 0x2a9   :  { %v2726_v9 = vmax.f32 %v2634_v62, %v2636_v63  ;;  %v2640_v28 = vmax.f32 %v2544_v1, 0.0 }
 0x2aa   :  { %v2727_v33 = vmax.f32 %v2637_v2, %v2639_v4  ;;  %v6338_v2 = vld [vmem:[#allocation3 + $0x210] ss:$8 sps:$4 sm:$0xff]  }
 0x2ab   :  { %v2728_v49 = vmax.f32 %v2638_v5, %v2640_v28  ;;  %v7385_v53 = vpop.f32.mrb[16].mxu0  ;;  %v2312_v12 = vpop.f32.mrb[12].mxu1 }
 0x2ac   :  { %v7387_v13 = vmax.f32 %v2725_v3, %v2727_v33  ;;  %v2547_v15 = vadd.f32 %v7359_v7, %v2312_v12  ;;  %v7390_v16 = vpop.f32.mrb[17].mxu0  ;;  %v2314_v60 = vpop.f32.mrb[13].mxu1 }
 0x2ad   :  { %v7393_v19 = vmax.f32 %v2726_v9, %v2728_v49  ;;  %v2548_v10 = vadd.f32 %v7361_v8, %v2314_v60  ;;  %v7396_v21 = vpop.f32.mrb[18].mxu0  ;;  %v2316_v34 = vpop.f32.mrb[14].mxu1  ;;  %v6346_v9 = vld [vmem:[#allocation3 + $0x224] ss:$8 sps:$4 sm:$0xff]  }
 0x2ae   :  { %v2844_v27 = vpack.c.bf16 %v7387_v13, %v2769_v41  ;;  %v2643_v29 = vmax.f32 %v2547_v15, 0.0  ;;  %v7400_v30 = vpop.f32.mrb[19].mxu0  ;;  %v2318_v0 = vpop.f32.mrb[15].mxu1  ;;  %v2551_v57 = vadd.f32 %v7359_v7, %v2316_v34  ;;  %v2553_v41 = vadd.f32 %v7353_v20, %v2169_v39 }
 0x2af   :  { %v2644_v36 = vmax.f32 %v2548_v10, 0.0  ;;  %v2552_v38 = vadd.f32 %v7361_v8, %v2318_v0  ;;  %v2845_v40 = vpack.c.bf16 %v7393_v19, %v2770_v47  ;;  %v2557_v39 = vadd.f32 %v7353_v20, %v7377_v50  ;;  %v6349_v0 = vld [vmem:[#allocation3 + $0x234] ss:$8 sps:$4 sm:$0xff]  }
 0x2b0   :  { %v2729_v37 = vmax.f32 %v2641_v22, %v2643_v29  ;;  %v2647_v46 = vmax.f32 %v2551_v57, 0.0  ;;  %v2649_v28 = vmax.f32 %v2553_v41, 0.0  ;;  %v2650_v15 = vmax.f32 %v2554_v11, 0.0  ;;  %v6344_v22 = vld [vmem:[#allocation3 + $0x220] ss:$8 sps:$4 sm:$0xff]  }
 0x2b1   :  { %v2730_v45 = vmax.f32 %v2642_v31, %v2644_v36  ;;  %v2648_v51 = vmax.f32 %v2552_v38, 0.0  ;;  %3366 = vmatprep.mubr.bf16.mxu0 %v2845_v40  ;;  %v2653_v23 = vmax.f32 %v2557_v39, 0.0  ;;  %v2654_v31 = vmax.f32 %v2558_v32, 0.0 }
 0x2b2   :  { %v2731_v52 = vmax.f32 %v2645_v42, %v2647_v46  ;;  %3367 = vmatmul.mubr.bf16.vlgmr.msra.gmra.mrb[48].mxu0 %v2844_v27  ;;  %v2561_v36 = vadd.f32 %v7353_v20, %v7385_v53  ;;  %v2562_v57 = vadd.f32 %v7357_v6, %v7390_v16  ;;  %v6347_v46 = vld [vmem:[#allocation3 + $0x230] ss:$8 sps:$4 sm:$0xff]   ;;  %v2565_v53 = vadd.f32 %v7353_v20, %v7396_v21 }
 0x2b3   :  { %v7407_v54 = vpop.f32.mrb[20].mxu0  ;;  %v2322_v59 = vpop.f32.mrb[16].mxu1  ;;  %v2732_v62 = vmax.f32 %v2646_v48, %v2648_v51  ;;  %3625 = vmatpush1.bf16.msra.mxu0 %v6332_v35  ;;  %v6352_v51 = vld [vmem:[#allocation3 + $0x244] ss:$8 sps:$4 sm:$0xff]  }
 0x2b4   :  { %v2555_v47 = vadd.f32 %v7359_v7, %v2322_v59  ;;  %v7410_v63 = vpop.f32.mrb[21].mxu0  ;;  %v2324_v1 = vpop.f32.mrb[17].mxu1  ;;  %v7414_v3 = vmax.f32 %v2729_v37, %v2731_v52  ;;  %3626 = vmatprep.subr.bf16.mxu0 %v6340_v17  ;;  %v2657_v11 = vmax.f32 %v2561_v36, 0.0  ;;  %v2566_v52 = vadd.f32 %v7357_v6, %v7400_v30 }
 0x2b5   :  { %v2556_v44 = vadd.f32 %v7361_v8, %v2324_v1  ;;  %v7417_v4 = vpop.f32.mrb[22].mxu0  ;;  %v2326_v5 = vpop.f32.mrb[18].mxu1  ;;  %v2779_v33 = vmax.f32 %v2730_v45, %v2732_v62  ;;  %v2661_v32 = vmax.f32 %v2565_v53, 0.0 }
 0x2b6   :  { %v2651_v43 = vmax.f32 %v2555_v47, 0.0  ;;  %v7421_v49 = vpop.f32.mrb[23].mxu0  ;;  %v2328_v12 = vpop.f32.mrb[19].mxu1  ;;  %v2900_v50 = vpack.c.bf16 %v7414_v3, %v7387_v13  ;;  %v2559_v18 = vadd.f32 %v7359_v7, %v2326_v5 }
 0x2b7   :  { %v2652_v60 = vmax.f32 %v2556_v44, 0.0  ;;  %v2560_v34 = vadd.f32 %v7361_v8, %v2328_v12  ;;  %3627 = vmatpush1.bf16.msra.mxu0 %v6338_v2  ;;  %v2901_v29 = vpack.c.bf16 %v2779_v33, %v7393_v19  ;;  %v2658_v2 = vmax.f32 %v2562_v57, 0.0 }
 0x2b8   :  { %v2733_v10 = vmax.f32 %v2649_v28, %v2651_v43  ;;  %v2655_v56 = vmax.f32 %v2559_v18, 0.0  ;;  %3628 = vmatprep.subr.bf16.mxu0 %v6346_v9  ;;  %v6350_v28 = vld [vmem:[#allocation3 + $0x240] ss:$8 sps:$4 sm:$0xff]  }
 0x2b9   :  { %v2734_v27 = vmax.f32 %v2650_v15, %v2652_v60  ;;  %v2656_v13 = vmax.f32 %v2560_v34, 0.0  ;;  %3133 = vmatprep.mubr.bf16.mxu1 %v2901_v29  ;;  %v6355_v15 = vld [vmem:[#allocation3 + $0x254] ss:$8 sps:$4 sm:$0xff]   ;;  %v2569_v60 = vadd.f32 %v7353_v20, %v7407_v54  ;;  %v6353_v54 = vld [vmem:[#allocation3 + $0x250] ss:$8 sps:$4 sm:$0xff]   ;;  %v2573_v29 = vadd.f32 %v7353_v20, %v7417_v4 }
 0x2ba   :  { %v2735_v37 = vmax.f32 %v2653_v23, %v2655_v56  ;;  %3134 = vmatmul.mubr.bf16.vlgmr.msra.gmra.mrb[52].mxu1 %v2900_v50  ;;  %v2662_v50 = vmax.f32 %v2566_v52, 0.0 }
 0x2bb   :  { %v7432_v38 = vpop.f32.mrb[24].mxu0  ;;  %v2332_v40 = vpop.f32.mrb[20].mxu1  ;;  %v2736_v35 = vmax.f32 %v2654_v31, %v2656_v13  ;;  %3629 = vmatpush1.bf16.msra.mxu0 %v6344_v22  ;;  %v6358_v13 = vld [vmem:[#allocation3 + $0x264] ss:$8 sps:$4 sm:$0xff]   ;;  %v2665_v57 = vmax.f32 %v2569_v60, 0.0  ;;  %v2669_v52 = vmax.f32 %v2573_v29, 0.0 }
 0x2bc   :  { %v2563_v19 = vadd.f32 %v7359_v7, %v2332_v40  ;;  %v7435_v42 = vpop.f32.mrb[25].mxu0  ;;  %v2334_v45 = vpop.f32.mrb[21].mxu1  ;;  %v7439_v17 = vmax.f32 %v2733_v10, %v2735_v37  ;;  %3630 = vmatprep.subr.bf16.mxu0 %v6349_v0  ;;  %v2574_v37 = vadd.f32 %v7357_v6, %v7421_v49 }
 0x2bd   :  { %v2564_v16 = vadd.f32 %v7361_v8, %v2334_v45  ;;  %v7442_v48 = vpop.f32.mrb[26].mxu0  ;;  %v2336_v41 = vpop.f32.mrb[22].mxu1  ;;  %v2784_v59 = vmax.f32 %v2734_v27, %v2736_v35 }
 0x2be   :  { %v2659_v62 = vmax.f32 %v2563_v19, 0.0  ;;  %v7446_v47 = vpop.f32.mrb[27].mxu0  ;;  %v2338_v1 = vpop.f32.mrb[23].mxu1  ;;  %v2567_v39 = vadd.f32 %v7359_v7, %v2336_v41  ;;  %v7454_v30 = vpack.c.bf16 %v7439_v17, %v7414_v3 }
 0x2bf   :  { %v2660_v21 = vmax.f32 %v2564_v16, 0.0  ;;  %v2568_v5 = vadd.f32 %v7361_v8, %v2338_v1  ;;  %3631 = vmatpush1.bf16.msra.mxu0 %v6347_v46  ;;  %v7450_v9 = vpack.c.bf16 %v2784_v59, %v2779_v33  ;;  %v2570_v33 = vadd.f32 %v7357_v6, %v7410_v63 }
 0x2c0   :  { %v2737_v44 = vmax.f32 %v2657_v11, %v2659_v62  ;;  %v2663_v12 = vmax.f32 %v2567_v39, 0.0  ;;  %3632 = vmatprep.subr.bf16.mxu0 %v6352_v51  ;;  %v6356_v11 = vld [vmem:[#allocation3 + $0x260] ss:$8 sps:$4 sm:$0xff]   ;;  %v2577_v39 = vadd.f32 %v7353_v20, %v7432_v38  ;;  %v6359_v38 = vld [vmem:[#allocation3 + $0x270] ss:$8 sps:$4 sm:$0xff]  }
 0x2c1   :  { %v2738_v43 = vmax.f32 %v2658_v2, %v2660_v21  ;;  %v2664_v18 = vmax.f32 %v2568_v5, 0.0  ;;  %3376 = vmatprep.mubr.bf16.mxu0 %v7450_v9  ;;  %v2666_v46 = vmax.f32 %v2570_v33, 0.0  ;;  %v6361_v2 = vld [vmem:[#allocation3 + $0x274] ss:$8 sps:$4 sm:$0xff]   ;;  %v2670_v21 = vmax.f32 %v2574_v37, 0.0 }
 0x2c2   :  { %v2739_v10 = vmax.f32 %v2661_v32, %v2663_v12  ;;  %3377 = vmatmul.mubr.bf16.gmra.mrb[52].mxu0 %v7454_v30 }
 0x2c3   :  { %v7462_v34 = vpop.f32.mrb[28].mxu0  ;;  %v2342_v22 = vpop.f32.mrb[24].mxu1  ;;  %v2740_v23 = vmax.f32 %v2662_v50, %v2664_v18  ;;  %3633 = vmatpush1.bf16.msra.mxu0 %v6350_v28  ;;  %v2581_v50 = vadd.f32 %v7353_v20, %v7442_v48 }
 0x2c4   :  { %v2571_v3 = vadd.f32 %v7359_v7, %v2342_v22  ;;  %v7465_v27 = vpop.f32.mrb[29].mxu0  ;;  %v2344_v56 = vpop.f32.mrb[25].mxu1  ;;  %v7469_v0 = vmax.f32 %v2737_v44, %v2739_v10  ;;  %3634 = vmatprep.subr.bf16.mxu0 %v6355_v15  ;;  %v6364_v10 = vld [vmem:[#allocation3 + $0x284] ss:$8 sps:$4 sm:$0xff]   ;;  %v2673_v22 = vmax.f32 %v2577_v39, 0.0 }
 0x2c5   :  { %v2572_v63 = vadd.f32 %v7361_v8, %v2344_v56  ;;  %v7472_v31 = vpop.f32.mrb[30].mxu0  ;;  %v2346_v36 = vpop.f32.mrb[26].mxu1  ;;  %v2789_v40 = vmax.f32 %v2738_v43, %v2740_v23  ;;  %v2582_v23 = vadd.f32 %v7357_v6, %v7446_v47 }
 0x2c6   :  { %v2667_v35 = vmax.f32 %v2571_v3, 0.0  ;;  %v7476_v19 = vpop.f32.mrb[31].mxu0  ;;  %v2348_v45 = vpop.f32.mrb[27].mxu1  ;;  %v2575_v53 = vadd.f32 %v7359_v7, %v2346_v36  ;;  %v7484_v49 = vpack.c.bf16 %v7469_v0, %v7439_v17 }
 0x2c7   :  { %v2668_v4 = vmax.f32 %v2572_v63, 0.0  ;;  %v2576_v41 = vadd.f32 %v7361_v8, %v2348_v45  ;;  %3635 = vmatpush1.bf16.msra.mxu0 %v6353_v54  ;;  %v7480_v51 = vpack.c.bf16 %v2789_v40, %v2784_v59  ;;  %v2578_v59 = vadd.f32 %v7357_v6, %v7435_v42 }
 0x2c8   :  { %v2741_v16 = vmax.f32 %v2665_v57, %v2667_v35  ;;  %v2671_v1 = vmax.f32 %v2575_v53, 0.0  ;;  %3636 = vmatprep.subr.bf16.mxu0 %v6358_v13  ;;  %v6362_v35 = vld [vmem:[#allocation3 + $0x280] ss:$8 sps:$4 sm:$0xff]   ;;  %v2677_v45 = vmax.f32 %v2581_v50, 0.0  ;;  %v6367_v53 = vld [vmem:[#allocation3 + $0x294] ss:$8 sps:$4 sm:$0xff]  }
 0x2c9   :  { %v2742_v62 = vmax.f32 %v2666_v46, %v2668_v4  ;;  %v2672_v44 = vmax.f32 %v2576_v41, 0.0  ;;  %3143 = vmatprep.mubr.bf16.mxu1 %v7480_v51  ;;  %v2674_v63 = vmax.f32 %v2578_v59, 0.0  ;;  %v2585_v41 = vadd.f32 %v7353_v20, %v7462_v34  ;;  %v6365_v34 = vld [vmem:[#allocation3 + $0x290] ss:$8 sps:$4 sm:$0xff]  }
 0x2ca   :  { %v2743_v5 = vmax.f32 %v2669_v52, %v2671_v1  ;;  %3144 = vmatmul.mubr.bf16.gmra.mrb[56].mxu1 %v7484_v49 }
 0x2cb   :  { %v7492_v28 = vpop.f32.mrb[32].mxu0  ;;  %v2352_v32 = vpop.f32.mrb[28].mxu1  ;;  %v2744_v43 = vmax.f32 %v2670_v21, %v2672_v44  ;;  %3637 = vmatpush1.bf16.msra.mxu0 %v6356_v11  ;;  %v2589_v44 = vadd.f32 %v7353_v20, %v7472_v31 }
 0x2cc   :  { %v2579_v17 = vadd.f32 %v7359_v7, %v2352_v32  ;;  %v7495_v12 = vpop.f32.mrb[33].mxu0  ;;  %v2354_v15 = vpop.f32.mrb[29].mxu1  ;;  %v7499_v60 = vmax.f32 %v2741_v16, %v2743_v5  ;;  %3638 = vmatprep.subr.bf16.mxu0 %v6361_v2  ;;  %v2678_v16 = vmax.f32 %v2582_v23, 0.0 }
 0x2cd   :  { %v2580_v42 = vadd.f32 %v7361_v8, %v2354_v15  ;;  %v7502_v18 = vpop.f32.mrb[34].mxu0  ;;  %v2356_v33 = vpop.f32.mrb[30].mxu1  ;;  %v2794_v3 = vmax.f32 %v2742_v62, %v2744_v43  ;;  %v6370_v43 = vld [vmem:[#allocation3 + $0x2a4] ss:$8 sps:$4 sm:$0xff]   ;;  %v2590_v15 = vadd.f32 %v7357_v6, %v7476_v19 }
 0x2ce   :  { %v2675_v56 = vmax.f32 %v2579_v17, 0.0  ;;  %v7506_v54 = vpop.f32.mrb[35].mxu0  ;;  %v2358_v29 = vpop.f32.mrb[31].mxu1  ;;  %v2583_v36 = vadd.f32 %v7359_v7, %v2356_v33  ;;  %v7514_v47 = vpack.c.bf16 %v7499_v60, %v7469_v0  ;;  %v2681_v17 = vmax.f32 %v2585_v41, 0.0 }
 0x2cf   :  { %v2676_v48 = vmax.f32 %v2580_v42, 0.0  ;;  %v2584_v57 = vadd.f32 %v7361_v8, %v2358_v29  ;;  %3639 = vmatpush1.bf16.msra.mxu0 %v6359_v38  ;;  %v7510_v37 = vpack.c.bf16 %v2794_v3, %v2789_v40  ;;  %v2586_v40 = vadd.f32 %v7357_v6, %v7465_v27 }
 0x2d0   :  { %v2745_v13 = vmax.f32 %v2673_v22, %v2675_v56  ;;  %v2679_v4 = vmax.f32 %v2583_v36, 0.0  ;;  %3640 = vmatprep.subr.bf16.mxu0 %v6364_v10 }
 0x2d1   :  { %v2746_v46 = vmax.f32 %v2674_v63, %v2676_v48  ;;  %v2680_v11 = vmax.f32 %v2584_v57, 0.0  ;;  %3386 = vmatprep.mubr.bf16.mxu0 %v7510_v37  ;;  %v2682_v10 = vmax.f32 %v2586_v40, 0.0  ;;  %v6368_v63 = vld [vmem:[#allocation3 + $0x2a0] ss:$8 sps:$4 sm:$0xff]   ;;  %v2685_v48 = vmax.f32 %v2589_v44, 0.0 }
 0x2d2   :  { %v2747_v52 = vmax.f32 %v2677_v45, %v2679_v4  ;;  %3387 = vmatmul.mubr.bf16.gmra.mrb[56].mxu0 %v7514_v47  ;;  %v6373_v57 = vld [vmem:[#allocation3 + $0x2b4] ss:$8 sps:$4 sm:$0xff]   ;;  %v2593_v45 = vadd.f32 %v7353_v20, %v7492_v28  ;;  %v6371_v28 = vld [vmem:[#allocation3 + $0x2b0] ss:$8 sps:$4 sm:$0xff]   ;;  %v2598_v44 = vadd.f32 %v7357_v6, %v7506_v54 }
 0x2d3   :  { %v7522_v62 = vpop.f32.mrb[36].mxu0  ;;  %v2362_v1 = vpop.f32.mrb[32].mxu1  ;;  %v2748_v2 = vmax.f32 %v2678_v16, %v2680_v11  ;;  %3641 = vmatpush1.bf16.msra.mxu0 %v6362_v35  ;;  %v2686_v35 = vmax.f32 %v2590_v15, 0.0 }
 0x2d4   :  { %v2587_v0 = vadd.f32 %v7359_v7, %v2362_v1  ;;  %v7525_v21 = vpop.f32.mrb[37].mxu0  ;;  %v2364_v39 = vpop.f32.mrb[33].mxu1  ;;  %v7529_v59 = vmax.f32 %v2745_v13, %v2747_v52  ;;  %3642 = vmatprep.subr.bf16.mxu0 %v6367_v53  ;;  %v2597_v52 = vadd.f32 %v7353_v20, %v7502_v18 }
 0x2d5   :  { %v2588_v27 = vadd.f32 %v7361_v8, %v2364_v39  ;;  %v7532_v5 = vpop.f32.mrb[38].mxu0  ;;  %v2366_v32 = vpop.f32.mrb[34].mxu1  ;;  %v2799_v38 = vmax.f32 %v2746_v46, %v2748_v2  ;;  %v6376_v39 = vld [vmem:[#allocation3 + $0x2c4] ss:$8 sps:$4 sm:$0xff]  }
 0x2d6   :  { %v2683_v50 = vmax.f32 %v2587_v0, 0.0  ;;  %v7536_v42 = vpop.f32.mrb[39].mxu0  ;;  %v2368_v33 = vpop.f32.mrb[35].mxu1  ;;  %v2591_v22 = vadd.f32 %v7359_v7, %v2366_v32  ;;  %v7544_v19 = vpack.c.bf16 %v7529_v59, %v7499_v60 }
 0x2d7   :  { %v2684_v31 = vmax.f32 %v2588_v27, 0.0  ;;  %v2592_v56 = vadd.f32 %v7361_v8, %v2368_v33  ;;  %3643 = vmatpush1.bf16.msra.mxu0 %v6365_v34  ;;  %v7540_v29 = vpack.c.bf16 %v2799_v38, %v2794_v3  ;;  %v2594_v3 = vadd.f32 %v7357_v6, %v7495_v12 }
 0x2d8   :  { %v2749_v23 = vmax.f32 %v2681_v17, %v2683_v50  ;;  %v2687_v13 = vmax.f32 %v2591_v22, 0.0  ;;  %3644 = vmatprep.subr.bf16.mxu0 %v6370_v43  ;;  %v2689_v34 = vmax.f32 %v2593_v45, 0.0  ;;  %v6374_v22 = vld [vmem:[#allocation3 + $0x2c0] ss:$8 sps:$4 sm:$0xff]  }
 0x2d9   :  { %v2750_v36 = vmax.f32 %v2682_v10, %v2684_v31  ;;  %v2688_v46 = vmax.f32 %v2592_v56, 0.0  ;;  %3153 = vmatprep.mubr.bf16.mxu1 %v7540_v29  ;;  %v2690_v18 = vmax.f32 %v2594_v3, 0.0 }
 0x2da   :  { %v2751_v4 = vmax.f32 %v2685_v48, %v2687_v13  ;;  %3154 = vmatmul.mubr.bf16.gmra.mrb[60].mxu1 %v7544_v19  ;;  %v6379_v48 = vld [vmem:[#allocation3 + $0x2d4] ss:$8 sps:$4 sm:$0xff]   ;;  %v2601_v13 = vadd.f32 %v7353_v20, %v7522_v62 }
 0x2db   :  { %v7552_v53 = vpop.f32.mrb[40].mxu0  ;;  %v2372_v16 = vpop.f32.mrb[36].mxu1  ;;  %v2752_v41 = vmax.f32 %v2686_v35, %v2688_v46  ;;  %3645 = vmatpush1.bf16.msra.mxu0 %v6368_v63  ;;  %v2605_v35 = vadd.f32 %v7353_v20, %v7532_v5  ;;  %v2606_v5 = vadd.f32 %v7357_v6, %v7536_v42 }
 0x2dc   :  { %v2595_v60 = vadd.f32 %v7359_v7, %v2372_v16  ;;  %v7555_v11 = vpop.f32.mrb[41].mxu0  ;;  %v2374_v40 = vpop.f32.mrb[37].mxu1  ;;  %v7559_v1 = vmax.f32 %v2749_v23, %v2751_v4  ;;  %3646 = vmatprep.subr.bf16.mxu0 %v6373_v57  ;;  %v2693_v23 = vmax.f32 %v2597_v52, 0.0 }
 0x2dd   :  { %v2596_v12 = vadd.f32 %v7361_v8, %v2374_v40  ;;  %v7562_v2 = vpop.f32.mrb[42].mxu0  ;;  %v2376_v0 = vpop.f32.mrb[38].mxu1  ;;  %v7566_v27 = vmax.f32 %v2750_v36, %v2752_v41  ;;  %v2694_v36 = vmax.f32 %v2598_v44, 0.0 }
 0x2de   :  { %v2691_v32 = vmax.f32 %v2595_v60, 0.0  ;;  %v7568_v43 = vpop.f32.mrb[43].mxu0  ;;  %v2378_v17 = vpop.f32.mrb[39].mxu1  ;;  %v2599_v50 = vadd.f32 %v7359_v7, %v2376_v0  ;;  %v7577_v63 = vpack.c.bf16 %v7559_v1, %v7529_v59  ;;  %v2697_v0 = vmax.f32 %v2601_v13, 0.0 }
 0x2df   :  { %v2692_v15 = vmax.f32 %v2596_v12, 0.0  ;;  %v2600_v10 = vadd.f32 %v7361_v8, %v2378_v17  ;;  %3647 = vmatpush1.bf16.msra.mxu0 %v6371_v28  ;;  %v7573_v31 = vpack.c.bf16 %v7566_v27, %v2799_v38  ;;  %v2602_v38 = vadd.f32 %v7357_v6, %v7525_v21  ;;  %v6377_v21 = vld [vmem:[#allocation3 + $0x2d0] ss:$8 sps:$4 sm:$0xff]  }
 0x2e0   :  { %v2753_v33 = vmax.f32 %v2689_v34, %v2691_v32  ;;  %v2695_v56 = vmax.f32 %v2599_v50, 0.0  ;;  %3648 = vmatprep.subr.bf16.mxu0 %v6376_v39  ;;  %v2610_v13 = vadd.f32 %v7357_v6, %v7555_v11 }
 0x2e1   :  { %v2754_v54 = vmax.f32 %v2690_v18, %v2692_v15  ;;  %v2696_v57 = vmax.f32 %v2600_v10, 0.0  ;;  %3396 = vmatprep.mubr.bf16.mxu0 %v7573_v31  ;;  %v2698_v17 = vmax.f32 %v2602_v38, 0.0  ;;  %v2701_v10 = vmax.f32 %v2605_v35, 0.0 }
 0x2e2   :  { %v2755_v45 = vmax.f32 %v2693_v23, %v2695_v56  ;;  %3397 = vmatmul.mubr.bf16.gmra.mrb[60].mxu0 %v7577_v63  ;;  %v2609_v56 = vadd.f32 %v7353_v20, %v7552_v53  ;;  %v2613_v35 = vadd.f32 %v7353_v20, %v7562_v2  ;;  %v6388_v2 = vld [vmem:[#allocation3 + $0x304] ss:$8 sps:$4 sm:$0xff]  }
 0x2e3   :  { %v2249_v46 = vpop.f32.mrb[44].mxu0  ;;  %v2382_v59 = vpop.f32.mrb[40].mxu1  ;;  %v2756_v3 = vmax.f32 %v2694_v36, %v2696_v57  ;;  %3649 = vmatpush1.bf16.msra.mxu0 %v6374_v22  ;;  %3656 = vmatprep.mubr.bf16.mxu0 %v7450_v9  ;;  %v2702_v22 = vmax.f32 %v2606_v5, 0.0 }
 0x2e4   :  { %v7588_v4 = vadd.f32 %v2249_v46, %v7102_v14  ;;  %v2603_v62 = vadd.f32 %v7359_v7, %v2382_v59  ;;  %v2251_v16 = vpop.f32.mrb[45].mxu0  ;;  %v2384_v41 = vpop.f32.mrb[41].mxu1  ;;  %v2808_v60 = vmax.f32 %v2753_v33, %v2755_v45  ;;  %3650 = vmatprep.subr.bf16.mxu0 %v6379_v48  ;;  %v6382_v14 = vld [vmem:[#allocation3 + $0x2e4] ss:$8 sps:$4 sm:$0xff]   ;;  %v6380_v33 = vld [vmem:[#allocation3 + $0x2e0] ss:$8 sps:$4 sm:$0xff]  }
 0x2e5   :  { %v7595_v40 = vadd.f32 %v2251_v16, %v7104_v24  ;;  %v2604_v28 = vadd.f32 %v7361_v8, %v2384_v41  ;;  %v2253_v52 = vpop.f32.mrb[46].mxu0  ;;  %v2386_v12 = vpop.f32.mrb[42].mxu1  ;;  %v2809_v39 = vmax.f32 %v2754_v54, %v2756_v3 }
 0x2e6   :  { %v2699_v34 = vmax.f32 %v2603_v62, 0.0  ;;  %v7599_v9 = vadd.f32 %v2253_v52, %v7106_v25  ;;  %v2255_v44 = vpop.f32.mrb[47].mxu0  ;;  %v2388_v32 = vpop.f32.mrb[43].mxu1  ;;  %v2607_v18 = vadd.f32 %v7359_v7, %v2386_v12  ;;  %v6385_v25 = vld [vmem:[#allocation3 + $0x2f4] ss:$8 sps:$4 sm:$0xff]   ;;  %v2705_v62 = vmax.f32 %v2609_v56, 0.0 }
 0x2e7   :  { %v2700_v42 = vmax.f32 %v2604_v28, 0.0  ;;  %v7603_v24 = vadd.f32 %v2255_v44, %v7108_v26  ;;  %v2608_v50 = vadd.f32 %v7361_v8, %v2388_v32  ;;  %3651 = vmatpush1.bf16.msra.mxu0 %v6377_v21  ;;  %v7609_v36 = vpack.c.bf16 %v2809_v39, %v7566_v27  ;;  %v6383_v27 = vld [vmem:[#allocation3 + $0x2f0] ss:$8 sps:$4 sm:$0xff]   ;;  %v6386_v44 = vld [vmem:[#allocation3 + $0x300] ss:$8 sps:$4 sm:$0xff]  }
 0x2e8   :  { %v2757_v15 = vmax.f32 %v2697_v0, %v2699_v34  ;;  %v2703_v54 = vmax.f32 %v2607_v18, 0.0  ;;  %3652 = vmatprep.subr.bf16.mxu0 %v6382_v14  ;;  %v7612_v26 = vpack.c.bf16 %v2808_v60, %v7559_v1  ;;  %v2614_v1 = vadd.f32 %v7357_v6, %v7568_v43 }
 0x2e9   :  { %v2758_v23 = vmax.f32 %v2698_v17, %v2700_v42  ;;  %v2704_v48 = vmax.f32 %v2608_v50, 0.0  ;;  %3163 = vmatprep.mubr.bf16.mxu1 %v7609_v36  ;;  %v2706_v28 = vmax.f32 %v2610_v13, 0.0  ;;  %v2709_v14 = vmax.f32 %v2613_v35, 0.0  ;;  %v6394_v13 = vld [vmem:[#allocation3 + $0x324] ss:$8 sps:$4 sm:$0xff]  }
 0x2ea   :  { %v2759_v57 = vmax.f32 %v2701_v10, %v2703_v54  ;;  %3164 = vmatmul.mubr.bf16.gmra.mrb[64].mxu1 %v7612_v26  ;;  %v2710_v17 = vmax.f32 %v2614_v1, 0.0  ;;  %v2617_v50 = vadd.f32 %v7588_v4, %v7353_v20  ;;  %v6389_v4 = vld [vmem:[#allocation3 + $0x310] ss:$8 sps:$4 sm:$0xff]   ;;  %v2622_v56 = vadd.f32 %v7603_v24, %v7357_v6 }
 0x2eb   :  { %v2392_v38 = vpop.f32.mrb[44].mxu1  ;;  %v2760_v45 = vmax.f32 %v2702_v22, %v2704_v48  ;;  %3653 = vmatpush1.bf16.msra.mxu0 %v6380_v33 }
 0x2ec   :  { %v2611_v53 = vadd.f32 %v7359_v7, %v2392_v38  ;;  %v2394_v46 = vpop.f32.mrb[45].mxu1  ;;  %v7622_v59 = vmax.f32 %v2757_v15, %v2759_v57  ;;  %3654 = vmatprep.subr.bf16.mxu0 %v6385_v25  ;;  %v6391_v15 = vld [vmem:[#allocation3 + $0x314] ss:$8 sps:$4 sm:$0xff]  }
 0x2ed   :  { %v2612_v11 = vadd.f32 %v7361_v8, %v2394_v46  ;;  %v2396_v3 = vpop.f32.mrb[46].mxu1  ;;  %v7626_v16 = vmax.f32 %v2758_v23, %v2760_v45 }
 0x2ee   :  { %v2707_v41 = vmax.f32 %v2611_v53, 0.0  ;;  %v2615_v21 = vadd.f32 %v7359_v7, %v2396_v3  ;;  %v2398_v5 = vpop.f32.mrb[47].mxu1  ;;  %v7631_v12 = vpack.c.bf16 %v7622_v59, %v2808_v60  ;;  %v2618_v60 = vadd.f32 %v7595_v40, %v7357_v6 }
 0x2ef   :  { %v2708_v52 = vmax.f32 %v2612_v11, 0.0  ;;  %v2616_v43 = vadd.f32 %v7361_v8, %v2398_v5  ;;  %3655 = vmatpush1.bf16.msra.mxu0 %v6383_v27  ;;  %v7634_v32 = vpack.c.bf16 %v7626_v16, %v2809_v39  ;;  %v2621_v39 = vadd.f32 %v7599_v9, %v7353_v20  ;;  %v6392_v11 = vld [vmem:[#allocation3 + $0x320] ss:$8 sps:$4 sm:$0xff]  }
 0x2f0   :  { %v2761_v0 = vmax.f32 %v2705_v62, %v2707_v41  ;;  %v2711_v34 = vmax.f32 %v2615_v21, 0.0  ;;  %3930 = vmatprep.subr.bf16.mxu0 %v6388_v2  ;;  %v2713_v20 = vmax.f32 %v2617_v50, 0.0  ;;  %v2714_v45 = vmax.f32 %v2618_v60, 0.0  ;;  %v6412_v50 = vld [vmem:[#allocation3 + $0x384] ss:$8 sps:$4 sm:$0xff]  }
 0x2f1   :  { %v2762_v42 = vmax.f32 %v2706_v28, %v2708_v52  ;;  %v2712_v18 = vmax.f32 %v2616_v43, 0.0  ;;  %v2717_v24 = vmax.f32 %v2621_v39, 0.0  ;;  %v2718_v3 = vmax.f32 %v2622_v56, 0.0  ;;  %v6400_v52 = vld [vmem:[#allocation3 + $0x344] ss:$8 sps:$4 sm:$0xff]  }
 0x2f2   :  { %v2763_v33 = vmax.f32 %v2709_v14, %v2711_v34  ;;  %3657 = vmatmul.mubr.bf16.vlgmr.msra.gmra.mrb[48].mxu0 %v7454_v30  ;;  %v6403_v34 = vld [vmem:[#allocation3 + $0x354] ss:$8 sps:$4 sm:$0xff]   ;;  %v6416_v39 = vld [vmem:[#allocation3 + $0x3a0] ss:$8 sps:$4 sm:$0xff]  }
 0x2f3   :  { %v2764_v10 = vmax.f32 %v2710_v17, %v2712_v18  ;;  %v2402_v22 = vpop.f32.mrb[48].mxu1  ;;  %3666 = vmatprep.mubr.bf16.mxu0 %v7510_v37  ;;  %3931 = vmatpush1.bf16.msra.mxu0 %v6386_v44  ;;  %v6401_v44 = vld [vmem:[#allocation3 + $0x350] ss:$8 sps:$4 sm:$0xff]   ;;  %v6406_v17 = vld [vmem:[#allocation3 + $0x364] ss:$8 sps:$4 sm:$0xff]  }
 0x2f4   :  { %v7643_v23 = vmax.f32 %v2761_v0, %v2763_v33  ;;  %v2619_v54 = vadd.f32 %v7359_v7, %v2402_v22  ;;  %v2404_v25 = vpop.f32.mrb[49].mxu1  ;;  %3932 = vmatprep.subr.bf16.mxu0 %v6391_v15  ;;  %v6398_v0 = vld [vmem:[#allocation3 + $0x340] ss:$8 sps:$4 sm:$0xff]   ;;  %v6409_v18 = vld [vmem:[#allocation3 + $0x374] ss:$8 sps:$4 sm:$0xff]  }
 0x2f5   :  { %v7649_v40 = vmax.f32 %v2762_v42, %v2764_v10  ;;  %v2620_v30 = vadd.f32 %v7361_v8, %v2404_v25  ;;  %v2406_v48 = vpop.f32.mrb[50].mxu1  ;;  %v6404_v42 = vld [vmem:[#allocation3 + $0x360] ss:$8 sps:$4 sm:$0xff]   ;;  %v6407_v15 = vld [vmem:[#allocation3 + $0x370] ss:$8 sps:$4 sm:$0xff]  }
 0x2f6   :  { %v2715_v9 = vmax.f32 %v2619_v54, 0.0  ;;  %v2623_v57 = vadd.f32 %v7359_v7, %v2406_v48  ;;  %v2408_v38 = vpop.f32.mrb[51].mxu1  ;;  %v3735_v35 = vpack.c.bf16 %v7643_v23, %v7622_v59  ;;  %v6397_v7 = vld [vmem:[#allocation3 + $0x334] ss:$8 sps:$4 sm:$0xff]   ;;  %v6410_v33 = vld [vmem:[#allocation3 + $0x380] ss:$8 sps:$4 sm:$0xff]  }
 0x2f7   :  { %v2716_v53 = vmax.f32 %v2620_v30, 0.0  ;;  %v2624_v46 = vadd.f32 %v7361_v8, %v2408_v38  ;;  %v3736_v6 = vpack.c.bf16 %v7649_v40, %v7626_v16  ;;  %3933 = vmatpush1.bf16.msra.mxu0 %v6389_v4  ;;  %v6395_v8 = vld [vmem:[#allocation3 + $0x330] ss:$8 sps:$4 sm:$0xff]   ;;  %v6415_v60 = vld [vmem:[#allocation3 + $0x394] ss:$8 sps:$4 sm:$0xff]  }
 0x2f8   :  { %v2765_v27 = vmax.f32 %v2713_v20, %v2715_v9  ;;  %v2719_v1 = vmax.f32 %v2623_v57, 0.0  ;;  %3934 = vmatprep.subr.bf16.mxu0 %v6394_v13  ;;  %v6413_v10 = vld [vmem:[#allocation3 + $0x390] ss:$8 sps:$4 sm:$0xff]   ;;  %v6418_v22 = vld [vmem:[#allocation3 + $0x3a4] ss:$8 sps:$4 sm:$0xff]  }
 0x2f9   :  { %v2766_v2 = vmax.f32 %v2714_v45, %v2716_v53  ;;  %v2720_v62 = vmax.f32 %v2624_v46, 0.0  ;;  %v6421_v54 = vld [vmem:[#allocation3 + $0x3b4] ss:$8 sps:$4 sm:$0xff]   ;;  %v6419_v25 = vld [vmem:[#allocation3 + $0x3b0] ss:$8 sps:$4 sm:$0xff]  }
 0x2fa   :  { %v2767_v41 = vmax.f32 %v2717_v24, %v2719_v1  ;;  %3667 = vmatmul.mubr.bf16.gmra.mrb[52].mxu0 %v7514_v47  ;;  %v6424_v4 = vld [vmem:[#allocation3 + $0x3c4] ss:$8 sps:$4 sm:$0xff]   ;;  %v6427_v56 = vld [vmem:[#allocation3 + $0x3d4] ss:$8 sps:$4 sm:$0xff]   ;;  %v6425_v30 = vld [vmem:[#allocation3 + $0x3d0] ss:$8 sps:$4 sm:$0xff]  }
 0x2fb   :  { %v2768_v21 = vmax.f32 %v2718_v3, %v2720_v62  ;;  %3676 = vmatprep.mubr.bf16.mxu0 %v7573_v31  ;;  %3935 = vmatpush1.bf16.msra.mxu0 %v6392_v11  ;;  %v6430_v48 = vld [vmem:[#allocation3 + $0x3e4] ss:$8 sps:$4 sm:$0xff]   ;;  %v6428_v13 = vld [vmem:[#allocation3 + $0x3e0] ss:$8 sps:$4 sm:$0xff]   ;;  %v6433_v20 = vld [vmem:[#allocation3 + $0x3f4] ss:$8 sps:$4 sm:$0xff]  }
 0x2fc   :  { %v2823_v5 = vmax.f32 %v2765_v27, %v2767_v41  ;;  %3936 = vmatprep.subr.bf16.mxu0 %v6397_v7  ;;  %v6431_v9 = vld [vmem:[#allocation3 + $0x3f0] ss:$8 sps:$4 sm:$0xff]   ;;  %v6436_v57 = vld [vmem:[#allocation3 + $0x404] ss:$8 sps:$4 sm:$0xff]   ;;  %v6434_v38 = vld [vmem:[#allocation3 + $0x400] ss:$8 sps:$4 sm:$0xff]  }
 0x2fd   :  { %v2824_v28 = vmax.f32 %v2766_v2, %v2768_v21  ;;  %v6439_v45 = vld [vmem:[#allocation3 + $0x414] ss:$8 sps:$4 sm:$0xff]   ;;  %v6437_v53 = vld [vmem:[#allocation3 + $0x410] ss:$8 sps:$4 sm:$0xff]   ;;  %v6442_v46 = vld [vmem:[#allocation3 + $0x424] ss:$8 sps:$4 sm:$0xff]  }
 0x2fe   :  { %v7661_v43 = vpack.c.bf16 %v2823_v5, %v7643_v23  ;;  %v6440_v24 = vld [vmem:[#allocation3 + $0x420] ss:$8 sps:$4 sm:$0xff]   ;;  %v6445_v27 = vld [vmem:[#allocation3 + $0x434] ss:$8 sps:$4 sm:$0xff]   ;;  %v6443_v1 = vld [vmem:[#allocation3 + $0x430] ss:$8 sps:$4 sm:$0xff]  }
 0x2ff   :  { %v7664_v14 = vpack.c.bf16 %v2824_v28, %v7649_v40  ;;  %3937 = vmatpush1.bf16.msra.mxu0 %v6395_v8  ;;  %v6448_v11 = vld [vmem:[#allocation3 + $0x444] ss:$8 sps:$4 sm:$0xff]   ;;  %v6449_v2 = vld [vmem:[#allocation3 + $0x450] ss:$8 sps:$4 sm:$0xff]   ;;  %v6452_v7 = vld [vmem:[#allocation3 + $0x460] ss:$8 sps:$4 sm:$0xff]  }
 0x300   :  { %3938 = vmatprep.subr.bf16.mxu0 %v6400_v52  ;;  %v6482_v3 = vld [vmem:[#allocation5 + $0x40] sm:$0xff]   ;;  %v6483_v62 = vld [vmem:[#allocation5 + $0x48] sm:$0xff]   ;;  %v6455_v16 = vld [vmem:[#allocation3 + $0x470] ss:$8 sps:$4 sm:$0xff]  }
 0x301   :  { %v6460_v40 = vld [vmem:[#allocation3 + $0x484] ss:$8 sps:$4 sm:$0xff]   ;;  %v6463_v41 = vld [vmem:[#allocation3 + $0x494] ss:$8 sps:$4 sm:$0xff]   ;;  %v6461_v21 = vld [vmem:[#allocation3 + $0x490] ss:$8 sps:$4 sm:$0xff]  }
 0x302   :  { %3677 = vmatmul.mubr.bf16.gmra.mrb[56].mxu0 %v7577_v63  ;;  %v6466_v5 = vld [vmem:[#allocation3 + $0x4a4] ss:$8 sps:$4 sm:$0xff]   ;;  %v6464_v8 = vld [vmem:[#allocation3 + $0x4a0] ss:$8 sps:$4 sm:$0xff]   ;;  %v6469_v59 = vld [vmem:[#allocation3 + $0x4b4] ss:$8 sps:$4 sm:$0xff]  }
 0x303   :  { %3686 = vmatprep.mubr.bf16.mxu0 %v7634_v32  ;;  %3939 = vmatpush1.bf16.msra.mxu0 %v6398_v0  ;;  %v6467_v23 = vld [vmem:[#allocation3 + $0x4b0] ss:$8 sps:$4 sm:$0xff]   ;;  %v6475_v28 = vld [vmem:[#allocation3 + $0x4d4] ss:$8 sps:$4 sm:$0xff]   ;;  %v6478_v0 = vld [vmem:[#allocation3 + $0x4e4] ss:$8 sps:$4 sm:$0xff]  }
 0x304   :  { %3940 = vmatprep.subr.bf16.mxu0 %v6403_v34  ;;  %v6473_v52 = vld [vmem:[#allocation3 + $0x4d0] ss:$8 sps:$4 sm:$0xff]   ;;  %v6476_v34 = vld [vmem:[#allocation3 + $0x4e0] ss:$8 sps:$4 sm:$0xff]  }
 0x307   :  { %3941 = vmatpush1.bf16.msra.mxu0 %v6401_v44  ;;  %v6481_v44 = vld [vmem:[#allocation3 + $0x4f4] ss:$8 sps:$4 sm:$0xff]  }
 0x308   :  { %3942 = vmatprep.subr.bf16.mxu0 %v6406_v17  ;;  %v6479_v17 = vld [vmem:[#allocation3 + $0x4f0] ss:$8 sps:$4 sm:$0xff]  }
 0x30a   :  { %3687 = vmatmul.mubr.bf16.gmra.mrb[60].mxu0 %v7631_v12 }
 0x30b   :  { %3943 = vmatpush1.bf16.msra.mxu0 %v6404_v42  ;;  %3962 = vmatprep.mubr.bf16.mxu0 %v7480_v51  ;;  %v6422_v51 = vld [vmem:[#allocation3 + $0x3c0] ss:$8 sps:$4 sm:$0xff]  }
 0x30c   :  { %3944 = vmatprep.subr.bf16.mxu0 %v6409_v18 }
 0x30f   :  { %3945 = vmatpush1.bf16.msra.mxu0 %v6407_v15 }
 0x310   :  { %3946 = vmatprep.subr.bf16.mxu0 %v6412_v50 }
 0x313   :  { %3947 = vmatpush1.bf16.msra.mxu0 %v6410_v33 }
 0x314   :  { %3948 = vmatprep.subr.bf16.mxu0 %v6415_v60 }
 0x317   :  { %3949 = vmatpush1.bf16.msra.mxu0 %v6413_v10 }
 0x318   :  { %3950 = vmatprep.subr.bf16.mxu0 %v6418_v22 }
 0x31b   :  { %3951 = vmatpush1.bf16.msra.mxu0 %v6416_v39 }
 0x31c   :  { %3952 = vmatprep.subr.bf16.mxu0 %v6421_v54  ;;  %v6484_v54 = vld [vmem:[#allocation5 + $0x50] sm:$0xff]  }
 0x31f   :  { %3953 = vmatpush1.bf16.msra.mxu0 %v6419_v25  ;;  %v6485_v25 = vld [vmem:[#allocation5 + $0x58] sm:$0xff]  }
 0x320   :  { %3954 = vmatprep.subr.bf16.mxu0 %v6424_v4  ;;  %v6486_v4 = vld [vmem:[#allocation5 + $0x60] sm:$0xff]  }
 0x323   :  { %3955 = vmatpush1.bf16.msra.mxu0 %v6422_v51  ;;  %v6487_v51 = vld [vmem:[#allocation5 + $0x68] sm:$0xff]  }
 0x324   :  { %3956 = vmatprep.subr.bf16.mxu0 %v6427_v56  ;;  %v6488_v56 = vld [vmem:[#allocation5 + $0x70] sm:$0xff]  }
 0x327   :  { %3957 = vmatpush1.bf16.msra.mxu0 %v6425_v30  ;;  %v6489_v30 = vld [vmem:[#allocation5 + $0x78] sm:$0xff]  }
 0x328   :  { %3958 = vmatprep.subr.bf16.mxu0 %v6430_v48  ;;  %v4325_v48 = vld [vmem:[%s7848_s4] sm:$0x3] }
 0x32b   :  { %3959 = vmatpush1.bf16.msra.mxu0 %v6428_v13  ;;  %v7721_v13 = vrot.slane %v4325_v48, %v2511_v58 }
 0x32c   :  { %3960 = vmatprep.subr.bf16.mxu0 %v6433_v20 }
 0x32f   :  { %3961 = vmatpush1.bf16.msra.mxu0 %v6431_v9  ;;  %v7725_v9 = vrot.slane %v4325_v48, %v2515_v61 }
 0x330   :  { %4236 = vmatprep.subr.bf16.mxu0 %v6436_v57 }
 0x332   :  { %3963 = vmatmul.mubr.bf16.vlgmr.msra.gmra.mrb[48].mxu0 %v7484_v49  ;;  %v6446_v49 = vld [vmem:[#allocation3 + $0x440] ss:$8 sps:$4 sm:$0xff]  }
 0x333   :  { %3972 = vmatprep.mubr.bf16.mxu0 %v7540_v29  ;;  %4237 = vmatpush1.bf16.msra.mxu0 %v6434_v38  ;;  %v6451_v29 = vld [vmem:[#allocation3 + $0x454] ss:$8 sps:$4 sm:$0xff]  }
 0x334   :  { %4238 = vmatprep.subr.bf16.mxu0 %v6439_v45 }
 0x337   :  { %4239 = vmatpush1.bf16.msra.mxu0 %v6437_v53 }
 0x338   :  { %4240 = vmatprep.subr.bf16.mxu0 %v6442_v46 }
 0x33a   :  { %3973 = vmatmul.mubr.bf16.gmra.mrb[52].mxu0 %v7544_v19  ;;  %v6454_v19 = vld [vmem:[#allocation3 + $0x464] ss:$8 sps:$4 sm:$0xff]  }
 0x33b   :  { %3982 = vmatprep.mubr.bf16.mxu0 %v7609_v36  ;;  %4241 = vmatpush1.bf16.msra.mxu0 %v6440_v24  ;;  %v6609_v36 = vmov 0.0  }
 0x33c   :  { %4242 = vmatprep.subr.bf16.mxu0 %v6445_v27  ;;  %5600 = vmatprep.subr.bf16.mxu1 %v6609_v36 }
 0x33d   :  { %5601 = vmatpush3.bf16.msra.mxu1 %v6482_v3  ;;  %5616 = vmatprep.mubr.msk.bf16.mxu1 %vm6610_vm1, %v6609_v36 }
 0x33e   :  { %5602 = vmatprep.subr.bf16.mxu1 %v6609_v36 }
 0x33f   :  { %4243 = vmatpush1.bf16.msra.mxu0 %v6443_v1 }
 0x340   :  { %4244 = vmatprep.subr.bf16.mxu0 %v6448_v11 }
 0x341   :  { %5603 = vmatpush3.bf16.msra.mxu1 %v6483_v62 }
 0x342   :  { %3983 = vmatmul.mubr.bf16.gmra.mrb[56].mxu0 %v7612_v26  ;;  %v6457_v26 = vld [vmem:[#allocation3 + $0x474] ss:$8 sps:$4 sm:$0xff]   ;;  %5604 = vmatprep.subr.bf16.mxu1 %v6609_v36 }
 0x343   :  { %3992 = vmatprep.mubr.bf16.mxu0 %v3736_v6  ;;  %4245 = vmatpush1.bf16.msra.mxu0 %v6446_v49  ;;  %v6458_v6 = vld [vmem:[#allocation3 + $0x480] ss:$8 sps:$4 sm:$0xff]  }
 0x344   :  { %4246 = vmatprep.subr.bf16.mxu0 %v6451_v29 }
 0x345   :  { %5605 = vmatpush3.bf16.msra.mxu1 %v6484_v54 }
 0x346   :  { %5606 = vmatprep.subr.bf16.mxu1 %v6609_v36 }
 0x347   :  { %4247 = vmatpush1.bf16.msra.mxu0 %v6449_v2 }
 0x348   :  { %4248 = vmatprep.subr.bf16.mxu0 %v6454_v19 }
 0x349   :  { %5607 = vmatpush3.bf16.msra.mxu1 %v6485_v25 }
 0x34a   :  { %3993 = vmatmul.mubr.bf16.gmra.mrb[60].mxu0 %v3735_v35  ;;  %v6472_v35 = vld [vmem:[#allocation3 + $0x4c4] ss:$8 sps:$4 sm:$0xff]   ;;  %5608 = vmatprep.subr.bf16.mxu1 %v6609_v36 }
 0x34b   :  { %4249 = vmatpush1.bf16.msra.mxu0 %v6452_v7  ;;  %4268 = vmatprep.mubr.bf16.mxu0 %v7510_v37  ;;  %v6470_v37 = vld [vmem:[#allocation3 + $0x4c0] ss:$8 sps:$4 sm:$0xff]  }
 0x34c   :  { %4250 = vmatprep.subr.bf16.mxu0 %v6457_v26 }
 0x34d   :  { %5609 = vmatpush3.bf16.msra.mxu1 %v6486_v4 }
 0x34e   :  { %5610 = vmatprep.subr.bf16.mxu1 %v6609_v36 }
 0x34f   :  { %4251 = vmatpush1.bf16.msra.mxu0 %v6455_v16 }
 0x350   :  { %4252 = vmatprep.subr.bf16.mxu0 %v6460_v40 }
 0x351   :  { %5611 = vmatpush3.bf16.msra.mxu1 %v6487_v51 }
 0x352   :  { %5612 = vmatprep.subr.bf16.mxu1 %v6609_v36 }
 0x353   :  { %4253 = vmatpush1.bf16.msra.mxu0 %v6458_v6 }
 0x354   :  { %4254 = vmatprep.subr.bf16.mxu0 %v6463_v41 }
 0x355   :  { %5613 = vmatpush3.bf16.msra.mxu1 %v6488_v56  ;;  %v6490_v56 = vld [vmem:[#allocation5] sm:$0xff]  }
 0x356   :  { %5614 = vmatprep.subr.bf16.mxu1 %v6609_v36 }
 0x357   :  { %4255 = vmatpush1.bf16.msra.mxu0 %v6461_v21 }
 0x358   :  { %4256 = vmatprep.subr.bf16.mxu0 %v6466_v5 }
 0x359   :  { %5615 = vmatpush3.bf16.msra.mxu1 %v6489_v30 }
 0x35a   :  { %5620 = vmatprep.subr.bf16.mxu1 %v6609_v36 }
 0x35b   :  { %4257 = vmatpush1.bf16.msra.mxu0 %v6464_v8 }
 0x35c   :  { %4258 = vmatprep.subr.bf16.mxu0 %v6469_v59 }
 0x35f   :  { %4259 = vmatpush1.bf16.msra.mxu0 %v6467_v23 }
 0x360   :  { %4260 = vmatprep.subr.bf16.mxu0 %v6472_v35 }
 0x363   :  { %4261 = vmatpush1.bf16.msra.mxu0 %v6470_v37 }
 0x364   :  { %4262 = vmatprep.subr.bf16.mxu0 %v6475_v28 }
 0x367   :  { %4263 = vmatpush1.bf16.msra.mxu0 %v6473_v52 }
 0x368   :  { %4264 = vmatprep.subr.bf16.mxu0 %v6478_v0 }
 0x36b   :  { %4265 = vmatpush1.bf16.msra.mxu0 %v6476_v34 }
 0x36c   :  { %4266 = vmatprep.subr.bf16.mxu0 %v6481_v44 }
 0x36f   :  { %4267 = vmatpush1.bf16.msra.mxu0 %v6479_v17 }
 0x372   :  { %4269 = vmatmul.mubr.bf16.vlgmr.msra.gmra.mrb[48].mxu0 %v7514_v47 }
 0x373   :  { %4278 = vmatprep.mubr.bf16.mxu0 %v7573_v31 }
 0x37a   :  { %4279 = vmatmul.mubr.bf16.gmra.mrb[52].mxu0 %v7577_v63 }
 0x37b   :  { %4288 = vmatprep.mubr.bf16.mxu0 %v7634_v32 }
 0x382   :  { %4289 = vmatmul.mubr.bf16.gmra.mrb[56].mxu0 %v7631_v12 }
 0x383   :  { %4298 = vmatprep.mubr.bf16.mxu0 %v7664_v14 }
 0x38a   :  { %4299 = vmatmul.mubr.bf16.gmra.mrb[60].mxu0 %v7661_v43 }
 0x38d   :  { %v3135_v42 = vpop.f32.mrb[52].mxu1 }
 0x38e   :  { %v3137_v18 = vpop.f32.mrb[53].mxu1 }
 0x38f   :  { %v3139_v15 = vpop.f32.mrb[54].mxu1 }
 0x390   :  { %v3141_v50 = vpop.f32.mrb[55].mxu1 }
 0x39d   :  { %v3145_v33 = vpop.f32.mrb[56].mxu1 }
 0x39e   :  { %v3147_v60 = vpop.f32.mrb[57].mxu1 }
 0x39f   :  { %v3149_v10 = vpop.f32.mrb[58].mxu1 }
 0x3a0   :  { %v3151_v47 = vpop.f32.mrb[59].mxu1 }
 0x3ad   :  { %v7692_v22 = vpop.f32.mrb[60].mxu1 }
 0x3ae   :  { %v7694_v31 = vpop.f32.mrb[61].mxu1 }
 0x3af   :  { %v7696_v63 = vpop.f32.mrb[62].mxu1 }
 0x3b0   :  { %v7698_v32 = vpop.f32.mrb[63].mxu1 }
 0x3bd   :  { %v7700_v12 = vpop.f32.mrb[64].mxu1 }
 0x3be   :  { %v7702_v14 = vpop.f32.mrb[65].mxu1 }
 0x3bf   :  { %v7704_v43 = vpop.f32.mrb[66].mxu1 }
 0x3c0   :  { %v7706_v39 = vpop.f32.mrb[67].mxu1 }
 0x445   :  { %v4270_v20 = vpop.f32.mrb[48].mxu0 }
 0x446   :  { %v5728_v57 = vadd.f32 %v4270_v20, %v3135_v42  ;;  %v4272_v38 = vpop.f32.mrb[49].mxu0 }
 0x447   :  { %v5729_v45 = vadd.f32 %v4272_v38, %v3137_v18  ;;  %v4274_v53 = vpop.f32.mrb[50].mxu0 }
 0x448   :  { %v4337_v46 = vadd.f32 %v5728_v57, %v7721_v13  ;;  %v5730_v24 = vadd.f32 %v4274_v53, %v3139_v15  ;;  %v4276_v27 = vpop.f32.mrb[51].mxu0  ;;  %v6491_v53 = vld [vmem:[#allocation5 + $0x8] sm:$0xff]  }
 0x449   :  { %v4338_v1 = vadd.f32 %v5729_v45, %v7725_v9  ;;  %v5731_v11 = vadd.f32 %v4276_v27, %v3141_v50 }
 0x44a   :  { %v4353_v49 = vmax.f32 %v4337_v46, 0.0  ;;  %v4339_v58 = vadd.f32 %v5730_v24, %v7721_v13 }
 0x44b   :  { %v4354_v29 = vmax.f32 %v4338_v1, 0.0  ;;  %v4340_v3 = vadd.f32 %v5731_v11, %v7725_v9 }
 0x44c   :  { %v4355_v55 = vmax.f32 %v4339_v58, 0.0 }
 0x44d   :  { %v4369_v61 = vmax.f32 %v4353_v49, %v4354_v29  ;;  %v4356_v2 = vmax.f32 %v4340_v3, 0.0  ;;  %v4280_v19 = vpop.f32.mrb[52].mxu0 }
 0x44e   :  { %v5732_v62 = vadd.f32 %v4280_v19, %v3145_v33  ;;  %v4282_v7 = vpop.f32.mrb[53].mxu0 }
 0x44f   :  { %v4370_v26 = vmax.f32 %v4355_v55, %v4356_v2  ;;  %v5733_v16 = vadd.f32 %v4282_v7, %v3147_v60  ;;  %v4284_v40 = vpop.f32.mrb[54].mxu0  ;;  %v6492_v55 = vld [vmem:[#allocation5 + $0x10] sm:$0xff]  }
 0x450   :  { %v4341_v6 = vadd.f32 %v5732_v62, %v7721_v13  ;;  %v5734_v41 = vadd.f32 %v4284_v40, %v3149_v10  ;;  %v4286_v21 = vpop.f32.mrb[55].mxu0  ;;  %v6498_v40 = vld [vmem:[#allocation5 + $0x80] sm:$0xff]  }
 0x451   :  { %v7732_v5 = vmax.f32 %v4369_v61, %v4370_v26  ;;  %v4342_v8 = vadd.f32 %v5733_v16, %v7725_v9  ;;  %v5735_v59 = vadd.f32 %v4286_v21, %v3151_v47  ;;  %v6497_v16 = vld [vmem:[#allocation5 + $0x38] sm:$0xff]   ;;  %v6500_v21 = vld [vmem:[#allocation5 + $0x90] sm:$0xff]  }
 0x452   :  { %v4357_v23 = vmax.f32 %v4341_v6, 0.0  ;;  %v4343_v35 = vadd.f32 %v5734_v41, %v7721_v13  ;;  %v6499_v41 = vld [vmem:[#allocation5 + $0x88] sm:$0xff]  }
 0x453   :  { %v4358_v37 = vmax.f32 %v4342_v8, 0.0  ;;  %v4344_v28 = vadd.f32 %v5735_v59, %v7725_v9  ;;  %v4378_v6 = vpack.c.bf16 %v7732_v5, %v7732_v5  ;;  %v6501_v8 = vld [vmem:[#allocation5 + $0x98] sm:$0xff]   ;;  %v6502_v5 = vld [vmem:[#allocation5 + $0xa0] sm:$0xff]   ;;  %v6503_v59 = vld [vmem:[#allocation5 + $0xa8] sm:$0xff]  }
 0x454   :  { %v4359_v52 = vmax.f32 %v4343_v35, 0.0  ;;  %v6505_v35 = vld [vmem:[#allocation5 + $0xb8] sm:$0xff]  }
 0x455   :  { %v4371_v0 = vmax.f32 %v4357_v23, %v4358_v37  ;;  %v4360_v34 = vmax.f32 %v4344_v28, 0.0  ;;  %v4290_v44 = vpop.f32.mrb[56].mxu0  ;;  %v6504_v23 = vld [vmem:[#allocation5 + $0xb0] sm:$0xff]   ;;  %v6506_v37 = vld [vmem:[#allocation5 + $0xc0] sm:$0xff]  }
 0x456   :  { %v5736_v17 = vadd.f32 %v4290_v44, %v7692_v22  ;;  %v4292_v42 = vpop.f32.mrb[57].mxu0  ;;  %v6510_v44 = vld [vmem:[#allocation5 + $0xe0] sm:$0xff]  }
 0x457   :  { %v4372_v18 = vmax.f32 %v4359_v52, %v4360_v34  ;;  %v5737_v15 = vadd.f32 %v4292_v42, %v7694_v31  ;;  %v4294_v50 = vpop.f32.mrb[58].mxu0  ;;  %v6507_v52 = vld [vmem:[#allocation5 + $0xc8] sm:$0xff]   ;;  %v6509_v34 = vld [vmem:[#allocation5 + $0xd8] sm:$0xff]   ;;  %v6512_v42 = vld [vmem:[#allocation5 + $0xf0] sm:$0xff]  }
 0x458   :  { %v4345_v33 = vadd.f32 %v5736_v17, %v7721_v13  ;;  %v5738_v60 = vadd.f32 %v4294_v50, %v7696_v63  ;;  %v4296_v10 = vpop.f32.mrb[59].mxu0  ;;  %v6511_v17 = vld [vmem:[#allocation5 + $0xe8] sm:$0xff]   ;;  %v6514_v50 = vld [vmem:[%s7851_s7] sm:$0xff]  }
 0x459   :  { %v4395_v47 = vmax.f32 %v4371_v0, %v4372_v18  ;;  %v4346_v54 = vadd.f32 %v5737_v15, %v7725_v9  ;;  %v5739_v25 = vadd.f32 %v4296_v10, %v7698_v32  ;;  %v6508_v0 = vld [vmem:[#allocation5 + $0xd0] sm:$0xff]   ;;  %v6513_v18 = vld [vmem:[#allocation5 + $0xf8] sm:$0xff]  }
 0x45a   :  { %v4361_v4 = vmax.f32 %v4345_v33, 0.0  ;;  %v4347_v51 = vadd.f32 %v5738_v60, %v7721_v13  ;;  %v6515_v33 = vld [vmem:[%s7851_s7 + $0x8] sm:$0xff]   ;;  %v6516_v60 = vld [vmem:[%s7851_s7 + $0x10] sm:$0xff]   ;;  %v6517_v10 = vld [vmem:[%s7851_s7 + $0x18] sm:$0xff]  }
 0x45b   :  { %v4396_v22 = vpack.c.bf16 %v4395_v47, %v4395_v47  ;;  %v4362_v30 = vmax.f32 %v4346_v54, 0.0  ;;  %v4348_v48 = vadd.f32 %v5739_v25, %v7725_v9  ;;  %v6518_v47 = vld [vmem:[%s7851_s7 + $0x20] sm:$0xff]   ;;  %v6519_v54 = vld [vmem:[%s7851_s7 + $0x28] sm:$0xff]   ;;  %v6520_v25 = vld [vmem:[%s7851_s7 + $0x30] sm:$0xff]  }
 0x45c   :  { %v4363_v31 = vmax.f32 %v4347_v51, 0.0 }
 0x45d   :  { %v4373_v20 = vmax.f32 %v4361_v4, %v4362_v30  ;;  %v4364_v57 = vmax.f32 %v4348_v48, 0.0  ;;  %v4300_v38 = vpop.f32.mrb[60].mxu0  ;;  %5617 = vmatmul.mubr.bf16.vlgmr.msra.gmra.mrb[68].mxu1 %v4396_v22  ;;  %v6521_v4 = vld [vmem:[%s7851_s7 + $0x38] sm:$0xff]  }
 0x45e   :  { %v5740_v63 = vadd.f32 %v4300_v38, %v7700_v12  ;;  %5621 = vmatpush3.bf16.msra.mxu1 %v6490_v56  ;;  %v4302_v45 = vpop.f32.mrb[61].mxu0  ;;  %5636 = vmatprep.mubr.msk.bf16.mxu1 %vm6610_vm1, %v6609_v36 }
 0x45f   :  { %v4374_v32 = vmax.f32 %v4363_v31, %v4364_v57  ;;  %v5741_v46 = vadd.f32 %v4302_v45, %v7702_v14  ;;  %v4304_v24 = vpop.f32.mrb[62].mxu0  ;;  %5622 = vmatprep.subr.bf16.mxu1 %v6609_v36 }
 0x460   :  { %v4349_v27 = vadd.f32 %v5740_v63, %v7721_v13  ;;  %v5742_v1 = vadd.f32 %v4304_v24, %v7704_v43  ;;  %v4306_v11 = vpop.f32.mrb[63].mxu0  ;;  %v6493_v43 = vld [vmem:[#allocation5 + $0x18] sm:$0xff]  }
 0x461   :  { %v4590_v49 = vmax.f32 %v4373_v20, %v4374_v32  ;;  %v4350_v12 = vadd.f32 %v5741_v46, %v7725_v9  ;;  %v5743_v58 = vadd.f32 %v4306_v11, %v7706_v39  ;;  %v6494_v39 = vld [vmem:[#allocation5 + $0x20] sm:$0xff]  }
 0x462   :  { %v4365_v29 = vmax.f32 %v4349_v27, 0.0  ;;  %v4351_v3 = vadd.f32 %v5742_v1, %v7721_v13  ;;  %5623 = vmatpush3.bf16.msra.mxu1 %v6491_v53  ;;  %v6495_v13 = vld [vmem:[#allocation5 + $0x28] sm:$0xff]   ;;  %v5527_v27 = vld [vmem:[%s7850_s6] ss:$0 sm:$0xff] }
 0x463   :  { %v4366_v61 = vmax.f32 %v4350_v12, 0.0  ;;  %v4352_v14 = vadd.f32 %v5743_v58, %v7725_v9  ;;  %5624 = vmatprep.subr.bf16.mxu1 %v6609_v36  ;;  %v6496_v9 = vld [vmem:[#allocation5 + $0x30] sm:$0xff]   ;;  %v4591_v28 = vpack.c.bf16 %v4590_v49, %v4590_v49 }
 0x464   :  { %v4367_v2 = vmax.f32 %v4351_v3, 0.0  ;;  %v6522_v3 = vld [vmem:[#allocation7] sm:$0xff]  }
 0x465   :  { %v4375_v19 = vmax.f32 %v4365_v29, %v4366_v61  ;;  %v4368_v62 = vmax.f32 %v4352_v14, 0.0  ;;  %v6523_v61 = vld [vmem:[#allocation7 + $0x8] sm:$0xff]   ;;  %v6524_v14 = vld [vmem:[#allocation7 + $0x10] sm:$0xff]  }
 0x466   :  { %5625 = vmatpush3.bf16.msra.mxu1 %v6492_v55 }
 0x467   :  { %v4376_v7 = vmax.f32 %v4367_v2, %v4368_v62  ;;  %5626 = vmatprep.subr.bf16.mxu1 %v6609_v36  ;;  %v6525_v2 = vld [vmem:[#allocation7 + $0x18] sm:$0xff]   ;;  %v6527_v62 = vld [vmem:[#allocation7 + $0x28] sm:$0xff]  }
 0x469   :  { %v7758_v26 = vmax.f32 %v4375_v19, %v4376_v7  ;;  %v6526_v19 = vld [vmem:[#allocation7 + $0x20] sm:$0xff]   ;;  %v6529_v7 = vld [vmem:[#allocation7 + $0x38] sm:$0xff]  }
 0x46a   :  { %5627 = vmatpush3.bf16.msra.mxu1 %v6493_v43  ;;  %v6528_v43 = vld [vmem:[#allocation7 + $0x30] sm:$0xff]  }
 0x46b   :  { %5628 = vmatprep.subr.bf16.mxu1 %v6609_v36  ;;  %v4699_v15 = vpack.c.bf16 %v7758_v26, %v7758_v26  ;;  %v5528_v26 = vld [vmem:[%s7852_s8] ss:$0 sm:$0xff] }
 0x46e   :  { %5629 = vmatpush3.bf16.msra.mxu1 %v6494_v39 }
 0x46f   :  { %5630 = vmatprep.subr.bf16.mxu1 %v6609_v36 }
 0x472   :  { %5631 = vmatpush3.bf16.msra.mxu1 %v6495_v13 }
 0x473   :  { %5632 = vmatprep.subr.bf16.mxu1 %v6609_v36 }
 0x476   :  { %5633 = vmatpush3.bf16.msra.mxu1 %v6496_v9 }
 0x477   :  { %5634 = vmatprep.subr.bf16.mxu1 %v6609_v36 }
 0x47a   :  { %5635 = vmatpush3.bf16.msra.mxu1 %v6497_v16 }
 0x47b   :  { %5640 = vmatprep.subr.bf16.mxu1 %v6609_v36 }
 0x47d   :  { %5637 = vmatmul.mubr.bf16.vlgmr.msra.gmra.mrb[72].mxu1 %v4378_v6 }
 0x47e   :  { %5641 = vmatpush3.bf16.msra.mxu1 %v6498_v40  ;;  %5656 = vmatprep.mubr.msk.bf16.mxu1 %vm6610_vm1, %v6609_v36 }
 0x47f   :  { %5642 = vmatprep.subr.bf16.mxu1 %v6609_v36 }
 0x482   :  { %5643 = vmatpush3.bf16.msra.mxu1 %v6499_v41 }
 0x483   :  { %5644 = vmatprep.subr.bf16.mxu1 %v6609_v36 }
 0x486   :  { %5645 = vmatpush3.bf16.msra.mxu1 %v6500_v21  ;;  %v5537_v21 = vld [vmem:[%s7854_s10] ss:$0 sm:$0xff] }
 0x487   :  { %5646 = vmatprep.subr.bf16.mxu1 %v6609_v36 }
 0x48a   :  { %5647 = vmatpush3.bf16.msra.mxu1 %v6501_v8 }
 0x48b   :  { %5648 = vmatprep.subr.bf16.mxu1 %v6609_v36 }
 0x48e   :  { %5649 = vmatpush3.bf16.msra.mxu1 %v6502_v5 }
 0x48f   :  { %5650 = vmatprep.subr.bf16.mxu1 %v6609_v36 }
 0x492   :  { %5651 = vmatpush3.bf16.msra.mxu1 %v6503_v59 }
 0x493   :  { %5652 = vmatprep.subr.bf16.mxu1 %v6609_v36 }
 0x496   :  { %5653 = vmatpush3.bf16.msra.mxu1 %v6504_v23 }
 0x497   :  { %5654 = vmatprep.subr.bf16.mxu1 %v6609_v36 }
 0x49a   :  { %5655 = vmatpush3.bf16.msra.mxu1 %v6505_v35 }
 0x49b   :  { %5660 = vmatprep.subr.bf16.mxu1 %v6609_v36 }
 0x49d   :  { %5657 = vmatmul.mubr.bf16.vlgmr.msra.gmra.mrb[76].mxu1 %v4591_v28 }
 0x49e   :  { %5661 = vmatpush3.bf16.msra.mxu1 %v6506_v37  ;;  %5676 = vmatprep.mubr.msk.bf16.mxu1 %vm6610_vm1, %v6609_v36 }
 0x49f   :  { %5662 = vmatprep.subr.bf16.mxu1 %v6609_v36 }
 0x4a2   :  { %5663 = vmatpush3.bf16.msra.mxu1 %v6507_v52 }
 0x4a3   :  { %5664 = vmatprep.subr.bf16.mxu1 %v6609_v36 }
 0x4a6   :  { %5665 = vmatpush3.bf16.msra.mxu1 %v6508_v0 }
 0x4a7   :  { %5666 = vmatprep.subr.bf16.mxu1 %v6609_v36 }
 0x4aa   :  { %5667 = vmatpush3.bf16.msra.mxu1 %v6509_v34 }
 0x4ab   :  { %5668 = vmatprep.subr.bf16.mxu1 %v6609_v36 }
 0x4ae   :  { %5669 = vmatpush3.bf16.msra.mxu1 %v6510_v44 }
 0x4af   :  { %5670 = vmatprep.subr.bf16.mxu1 %v6609_v36 }
 0x4b2   :  { %5671 = vmatpush3.bf16.msra.mxu1 %v6511_v17 }
 0x4b3   :  { %5672 = vmatprep.subr.bf16.mxu1 %v6609_v36 }
 0x4b6   :  { %5673 = vmatpush3.bf16.msra.mxu1 %v6512_v42 }
 0x4b7   :  { %5674 = vmatprep.subr.bf16.mxu1 %v6609_v36 }
 0x4ba   :  { %5675 = vmatpush3.bf16.msra.mxu1 %v6513_v18 }
 0x4bb   :  { %5680 = vmatprep.subr.bf16.mxu1 %v6609_v36 }
 0x4bd   :  { %5677 = vmatmul.mubr.bf16.vlgmr.msra.gmra.mrb[80].mxu1 %v4699_v15 }
 0x4be   :  { %5696 = vmatprep.mubr.msk.bf16.mxu1 %vm6610_vm1, %v6609_v36  ;;  %5681 = vmatpush3.bf16.msra.mxu1 %v6514_v50 }
 0x4bf   :  { %5682 = vmatprep.subr.bf16.mxu1 %v6609_v36 }
 0x4c2   :  { %5683 = vmatpush3.bf16.msra.mxu1 %v6515_v33 }
 0x4c3   :  { %5684 = vmatprep.subr.bf16.mxu1 %v6609_v36 }
 0x4c6   :  { %5685 = vmatpush3.bf16.msra.mxu1 %v6516_v60 }
 0x4c7   :  { %5686 = vmatprep.subr.bf16.mxu1 %v6609_v36 }
 0x4ca   :  { %5687 = vmatpush3.bf16.msra.mxu1 %v6517_v10 }
 0x4cb   :  { %5688 = vmatprep.subr.bf16.mxu1 %v6609_v36 }
 0x4ce   :  { %5689 = vmatpush3.bf16.msra.mxu1 %v6518_v47 }
 0x4cf   :  { %5690 = vmatprep.subr.bf16.mxu1 %v6609_v36 }
 0x4d2   :  { %5691 = vmatpush3.bf16.msra.mxu1 %v6519_v54 }
 0x4d3   :  { %5692 = vmatprep.subr.bf16.mxu1 %v6609_v36 }
 0x4d6   :  { %5693 = vmatpush3.bf16.msra.mxu1 %v6520_v25 }
 0x4d7   :  { %5694 = vmatprep.subr.bf16.mxu1 %v6609_v36 }
 0x4da   :  { %5695 = vmatpush3.bf16.msra.mxu1 %v6521_v4 }
 0x4db   :  { %5700 = vmatprep.subr.bf16.mxu1 %v6609_v36 }
 0x530   :  { %v4496_v51 = vpop.f32.mrb[68].mxu1 }
 0x531   :  { %v5618_v56 = vpop.f32.mrb[69].mxu1 }
 0x532   :  { %v4499_v22 = vpop.f32.mrb[70].mxu1 }
 0x533   :  { %v5619_v30 = vpop.f32.mrb[71].mxu1 }
 0x550   :  { %v4584_v48 = vpop.f32.mrb[72].mxu1 }
 0x551   :  { %v4585_v31 = vadd.f32 %v4584_v48, %v4496_v51  ;;  %v5638_v20 = vpop.f32.mrb[73].mxu1 }
 0x552   :  { %v4587_v57 = vpop.f32.mrb[74].mxu1 }
 0x553   :  { %v5639_v38 = vpop.f32.mrb[75].mxu1 }
 0x570   :  { %v4691_v63 = vpop.f32.mrb[76].mxu1 }
 0x571   :  { %v4697_v45 = vadd.f32 %v4691_v63, %v4585_v31  ;;  %v5658_v53 = vpop.f32.mrb[77].mxu1 }
 0x572   :  { %v4694_v32 = vpop.f32.mrb[78].mxu1 }
 0x573   :  { %v5659_v46 = vpop.f32.mrb[79].mxu1 }
 0x590   :  { %v4799_v24 = vpop.f32.mrb[80].mxu1 }
 0x591   :  { %v4805_v1 = vadd.f32 %v4799_v24, %v4697_v45  ;;  %v5678_v11 = vpop.f32.mrb[81].mxu1 }
 0x592   :  { %v4802_v49 = vpop.f32.mrb[82].mxu1 }
 0x593   :  { %v4813_v12 = vadd.f32 %v5527_v27, %v4805_v1  ;;  %v5679_v58 = vpop.f32.mrb[83].mxu1 }
 0x595   :  { %v4814_v29 = vmax.f32 %v4813_v12, 0.0 }
 0x597   :  { %v4815_v55 = vpack.c.bf16 %v4814_v29, %v4814_v29 }
 0x599   :  { %5697 = vmatmul.mubr.bf16.vlgmr.msra.gmra.mrb[84].mxu1 %v4815_v55 }
 0x59a   :  { %5701 = vmatpush3.bf16.msra.mxu1 %v6522_v3  ;;  %5716 = vmatprep.mubr.msk.bf16.mxu1 %vm6610_vm1, %v6609_v36 }
 0x59b   :  { %5702 = vmatprep.subr.bf16.mxu1 %v6609_v36 }
 0x59e   :  { %5703 = vmatpush3.bf16.msra.mxu1 %v6523_v61 }
 0x59f   :  { %5704 = vmatprep.subr.bf16.mxu1 %v6609_v36 }
 0x5a2   :  { %5705 = vmatpush3.bf16.msra.mxu1 %v6524_v14 }
 0x5a3   :  { %5706 = vmatprep.subr.bf16.mxu1 %v6609_v36 }
 0x5a6   :  { %5707 = vmatpush3.bf16.msra.mxu1 %v6525_v2 }
 0x5a7   :  { %5708 = vmatprep.subr.bf16.mxu1 %v6609_v36 }
 0x5aa   :  { %5709 = vmatpush3.bf16.msra.mxu1 %v6526_v19 }
 0x5ab   :  { %5710 = vmatprep.subr.bf16.mxu1 %v6609_v36 }
 0x5ae   :  { %5711 = vmatpush3.bf16.msra.mxu1 %v6527_v62 }
 0x5af   :  { %5712 = vmatprep.subr.bf16.mxu1 %v6609_v36 }
 0x5b2   :  { %5713 = vmatpush3.bf16.msra.mxu1 %v6528_v43 }
 0x5b3   :  { %5714 = vmatprep.subr.bf16.mxu1 %v6609_v36 }
 0x5b6   :  { %5715 = vmatpush3.bf16.msra.mxu1 %v6529_v7 }
 0x66c   :  { %v4921_v39 = vpop.f32.mrb[84].mxu1 }
 0x66d   :  { %v4922_v13 = vadd.f32 %v5528_v26, %v4921_v39  ;;  %v5698_v9 = vpop.f32.mrb[85].mxu1 }
 0x66e   :  { %v4924_v16 = vpop.f32.mrb[86].mxu1 }
 0x66f   :  { %v4927_v40 = vmax.f32 %v4922_v13, 0.0  ;;  %v5699_v6 = vpop.f32.mrb[87].mxu1 }
 0x671   :  { %v4928_v41 = vpack.c.bf16 %v4927_v40, %v4927_v40 }
 0x673   :  { %5717 = vmatmul.mubr.bf16.vlgmr.msra.gmra.mrb[88].mxu1 %v4928_v41 }
 0x746   :  { %v5034_v8 = vpop.f32.mrb[88].mxu1 }
 0x747   :  { %v5035_v36 = vadd.f32 %v5537_v21, %v5034_v8  ;;  %v5718_v5 = vpop.f32.mrb[89].mxu1 }
 0x748   :  { %v5037_v59 = vpop.f32.mrb[90].mxu1 }
 0x749   :  { %5040 = vst [vmem:[%s7855_s11] sm:$0xff] %v5035_v36  ;;  %v5719_v23 = vpop.f32.mrb[91].mxu1 }
 0x74a   :  { %5045 = vsyncpa [#allocation4], 1 }
 0x74b   :  { %5046 = vsyncpa [#allocation6], 1 }

</bundles_post_ra>
